<compile_context>
chip_gen: v5e
topology: v5e:2x2
jax: 0.10.0
libtpu: 0.0.40
codegen_flags: <defaults>
</compile_context>

<pallas_src>
import functools

import jax
import jax.numpy as jnp
import numpy as np
from jax.experimental import pallas as pl
from jax.experimental.pallas import tpu as pltpu


# ----------------------------------------------------------------------------
# Fused Pallas kernel: whole FCNHead forward for one image
# ----------------------------------------------------------------------------
def _fcn_head_kernel(x_ref, w0cx_ref, b0_ref, w1_ref, b1_ref,
                     wcy_ref, bc_ref, ws_ref, bs_ref,
                     o_ref, xp_ref, yp_ref, *, H, W, LP):
    """Fused FCNHead forward for a single batch element.

    x_ref    : (1, H, W, Cin)         input feature map tile (NHWC)
    w0cx_ref : (9, 2C, Cin)           convs[0] and conv_cat-x taps, stacked on out-ch
    w1_ref   : (9, C, C)              convs[1] taps
    wcy_ref  : (9, C, C)              conv_cat taps acting on the y channels
    b*_ref   : (C, 1)                 biases (column vectors, broadcast over pixels)
    ws_ref   : (num_classes, C)       1x1 classifier weight (transposed)
    bs_ref   : (num_classes, 1)
    o_ref    : (1, num_classes, H*W)  channel-major logits (lane-dense; reshape->NCHW)
    xp_ref   : (H+2, W+LP+1, Cin)     VMEM scratch: zero-padded input, interior at col LP
    yp_ref   : (H+2, W+LP+1, C)       VMEM scratch: zero-padded intermediate activation
    """
    f32 = jnp.float32
    C = w1_ref.shape[1]
    HW = H * W

    # Stage the input once in zero-padded VMEM scratch; the 1-px halo stays zero.
    # (Interior starts at column LP so the staging stores are sublane-aligned.)
    xp_ref[...] = jnp.zeros_like(xp_ref)
    yp_ref[...] = jnp.zeros_like(yp_ref)
    xp_ref[1:H + 1, LP:LP + W, :] = x_ref[0].astype(f32)

    def conv3x3(src_ref, w9_ref, acc):
        # acc[o, p] += sum_{ky,kx,i} w9[ky*3+kx, o, i] * src[py+ky, LP-1+px+kx, i]
        # Each tap is one MXU matmul contracting the channel dim of both operands,
        # keeping the (out_channels, H*W) accumulator lane-dense with no transposes.
        cin = src_ref.shape[-1]
        for ky in range(3):
            for kx in range(3):
                patch = src_ref[ky:ky + H, LP - 1 + kx:LP - 1 + kx + W, :]
                patch = patch.reshape(HW, cin)
                acc = acc + jax.lax.dot_general(
                    w9_ref[ky * 3 + kx], patch,
                    dimension_numbers=(((1,), (1,)), ((), ())),
                    preferred_element_type=f32)
        return acc

    def write_padded(y_chw):
        # (C, H*W) -> interior of the zero-padded channels-last scratch.
        yp_ref[1:H + 1, LP:LP + W, :] = jnp.transpose(y_chw).reshape(H, W, C)

    # convs[0] and conv_cat's x-half share the same 9 patches of x: one fused matmul
    # per tap into a (2C, H*W) accumulator, then split on the (8-aligned) sublane dim.
    acc0 = conv3x3(xp_ref, w0cx_ref, jnp.zeros((2 * C, HW), f32))
    y = jnp.maximum(acc0[:C] + b0_ref[...], 0.0)        # convs[0] output (+bias, ReLU)
    cat_x = acc0[C:]                                    # conv_cat x-contribution

    # convs[1]: channels -> channels, 3x3 + bias + ReLU
    write_padded(y)
    y = jnp.maximum(conv3x3(yp_ref, w1_ref, jnp.zeros((C, HW), f32))
                    + b1_ref[...], 0.0)

    # conv_cat: conv3x3(concat([x, y])) via split weights -- concat never materialized.
    write_padded(y)
    y = jnp.maximum(conv3x3(yp_ref, wcy_ref, cat_x) + bc_ref[...], 0.0)

    # Dropout2d(0.1): identity at inference.
    # TODO(synk): training-mode channel dropout mask not implemented.

    # conv_seg (1x1): (num_classes, C) @ (C, H*W) + b -> channel-major, lane-dense.
    out = jnp.dot(ws_ref[...], y, preferred_element_type=f32) + bs_ref[...]
    o_ref[0] = out.astype(o_ref.dtype)


# ----------------------------------------------------------------------------
# FCNHead module (parameter container + fused forward)
# ----------------------------------------------------------------------------
class FCNHeadPallas:
    def __init__(self, in_channels, channels, num_classes, key):
        self.in_channels = in_channels
        self.channels = channels
        self.num_classes = num_classes
        ks = jax.random.split(key, 8)

        def winit(k, kh, kw, cin, cout):
            fan_in = kh * kw * cin
            return (jax.random.normal(k, (kh, kw, cin, cout), jnp.float32)
                    * np.sqrt(2.0 / fan_in))

        # convs[0]: in_channels -> channels
        self.w0 = winit(ks[0], 3, 3, in_channels, channels)
        self.b0 = jax.random.normal(ks[1], (channels,), jnp.float32) * 0.01
        # convs[1]: channels -> channels
        self.w1 = winit(ks[2], 3, 3, channels, channels)
        self.b1 = jax.random.normal(ks[3], (channels,), jnp.float32) * 0.01
        # conv_cat: in_channels + channels -> channels
        self.wc = winit(ks[4], 3, 3, in_channels + channels, channels)
        self.bc = jax.random.normal(ks[5], (channels,), jnp.float32) * 0.01
        # conv_seg: 1x1, channels -> num_classes
        self.ws = (jax.random.normal(ks[6], (channels, num_classes), jnp.float32)
                   * np.sqrt(2.0 / channels))
        self.bs = jax.random.normal(ks[7], (num_classes,), jnp.float32) * 0.01

    def forward(self, inputs_nchw_list):
        # _transform_inputs: input_transform=None, in_index=-1 -> take the last map.
        x_nchw = inputs_nchw_list[-1]
        N, Cin, H, W = x_nchw.shape
        C, NC = self.channels, self.num_classes
        LP = 8  # sublane-aligned left margin for the padded VMEM scratch interior

        # Single cheap layout op on the input; everything else is one fused kernel.
        x = jnp.transpose(x_nchw, (0, 2, 3, 1))                       # NCHW -> NHWC

        def taps(w_hwio):                                             # (3,3,I,O) -> (9,O,I)
            return jnp.transpose(w_hwio, (0, 1, 3, 2)).reshape(
                9, w_hwio.shape[3], w_hwio.shape[2])

        w0_9, w1_9 = taps(self.w0), taps(self.w1)
        wcx_9 = taps(self.wc[:, :, :Cin, :])      # conv_cat taps hitting the x channels
        wcy_9 = taps(self.wc[:, :, Cin:, :])      # conv_cat taps hitting the y channels
        # convs[0] and conv_cat-x share input patches -> stack their taps on out-ch.
        w0cx_9 = jnp.concatenate([w0_9, wcx_9], axis=1)               # (9, 2C, Cin)
        b0c, b1c, bcc = (b.reshape(C, 1) for b in (self.b0, self.b1, self.bc))
        ws_t = self.ws.T                          # (num_classes, channels)
        bsc = self.bs.reshape(NC, 1)

        def rep(shape):  # weights/biases: whole (small) array, same block every step
            return pl.BlockSpec(shape, lambda n: (0,) * len(shape))

        kernel = functools.partial(_fcn_head_kernel, H=H, W=W, LP=LP)
        out = pl.pallas_call(
            kernel,
            out_shape=jax.ShapeDtypeStruct((N, NC, H * W), x.dtype),
            grid=(N,),
            in_specs=[
                pl.BlockSpec((1, H, W, Cin), lambda n: (n, 0, 0, 0)),
                rep((9, 2 * C, Cin)), rep((C, 1)),
                rep((9, C, C)), rep((C, 1)),
                rep((9, C, C)), rep((C, 1)),
                rep((NC, C)), rep((NC, 1)),
            ],
            out_specs=pl.BlockSpec((1, NC, H * W), lambda n: (n, 0, 0)),
            scratch_shapes=[
                pltpu.VMEM((H + 2, W + LP + 1, Cin), jnp.float32),    # padded x
                pltpu.VMEM((H + 2, W + LP + 1, C), jnp.float32),      # padded intermediate y
            ],
            compiler_params=pltpu.CompilerParams(
                dimension_semantics=("parallel",)),                   # batch across TCs
        )(x, w0cx_9, b0c, w1_9, b1c, wcy_9, bcc, ws_t, bsc)

        # Per-image (num_classes, H*W) is already channel-major -> pure reshape to NCHW.
        return out.reshape(N, NC, H, W)


# ----------------------------------------------------------------------------
# Pure-JAX reference (for correctness check)
# ----------------------------------------------------------------------------
def _ref_forward(head, inputs_nchw_list):
    x = jnp.transpose(inputs_nchw_list[-1], (0, 2, 3, 1))
    dn = ("NHWC", "HWIO", "NHWC")

    def conv(inp, w, b, relu):
        o = jax.lax.conv_general_dilated(
            inp, w, (1, 1), "SAME", dimension_numbers=dn,
            precision=jax.lax.Precision.HIGHEST) + b
        return jnp.maximum(o, 0.0) if relu else o

    y = conv(x, head.w0, head.b0, True)
    y = conv(y, head.w1, head.b1, True)
    y = conv(jnp.concatenate([x, y], axis=-1), head.wc, head.bc, True)
    o = conv(y, head.ws.reshape(1, 1, head.channels, head.num_classes),
             head.bs, False)
    return jnp.transpose(o, (0, 3, 1, 2))


if __name__ == "__main__":
    key = jax.random.PRNGKey(0)
    k_in, k_par = jax.random.split(key)

    N, Cin, H, W = 2, 8, 16, 16
    channels, num_classes = 16, 5

    x = jax.random.normal(k_in, (N, Cin, H, W), jnp.float32)  # NCHW, like PyTorch
    head = FCNHeadPallas(Cin, channels, num_classes, k_par)

    out = jax.block_until_ready(head.forward([x]))
    assert out.shape == (N, num_classes, H, W), out.shape

    ref = jax.block_until_ready(_ref_forward(head, [x]))
    np.testing.assert_allclose(np.asarray(out), np.asarray(ref),
                               rtol=1e-4, atol=1e-4)
    print("KERNEL_OK")
</pallas_src>

<mosaic_0001>
module attributes {stable_mosaic.version = 11 : i64} {
  func.func @_fcn_head_kernel(%arg0: i32, %arg1: memref<1x16x16x8xf32, #tpu.memory_space<vmem>>, %arg2: memref<9x32x8xf32, #tpu.memory_space<vmem>>, %arg3: memref<16x1xf32, #tpu.memory_space<vmem>>, %arg4: memref<9x16x16xf32, #tpu.memory_space<vmem>>, %arg5: memref<16x1xf32, #tpu.memory_space<vmem>>, %arg6: memref<9x16x16xf32, #tpu.memory_space<vmem>>, %arg7: memref<16x1xf32, #tpu.memory_space<vmem>>, %arg8: memref<5x16xf32, #tpu.memory_space<vmem>>, %arg9: memref<5x1xf32, #tpu.memory_space<vmem>>, %arg10: memref<1x5x256xf32, #tpu.memory_space<vmem>>, %arg11: memref<18x25x8xf32, #tpu.memory_space<vmem>>, %arg12: memref<18x25x16xf32, #tpu.memory_space<vmem>>) attributes {dimension_semantics = [#tpu.dimension_semantics<parallel>], iteration_bounds = array<i64: 2>, scalar_prefetch = 0 : i64, scratch_operands = 2 : i64, tpu.core_type = #tpu.core_type<tc>, window_params = [{transform_indices = @transform_0, window_bounds = array<i64: 1, 16, 16, 8>}, {pipeline_mode = #tpu.pipeline_mode<synchronous>, transform_indices = @transform_1, window_bounds = array<i64: 9, 32, 8>}, {pipeline_mode = #tpu.pipeline_mode<synchronous>, transform_indices = @transform_2, window_bounds = array<i64: 16, 1>}, {pipeline_mode = #tpu.pipeline_mode<synchronous>, transform_indices = @transform_3, window_bounds = array<i64: 9, 16, 16>}, {pipeline_mode = #tpu.pipeline_mode<synchronous>, transform_indices = @transform_4, window_bounds = array<i64: 16, 1>}, {pipeline_mode = #tpu.pipeline_mode<synchronous>, transform_indices = @transform_5, window_bounds = array<i64: 9, 16, 16>}, {pipeline_mode = #tpu.pipeline_mode<synchronous>, transform_indices = @transform_6, window_bounds = array<i64: 16, 1>}, {pipeline_mode = #tpu.pipeline_mode<synchronous>, transform_indices = @transform_7, window_bounds = array<i64: 5, 16>}, {pipeline_mode = #tpu.pipeline_mode<synchronous>, transform_indices = @transform_8, window_bounds = array<i64: 5, 1>}, {transform_indices = @transform_9, window_bounds = array<i64: 1, 5, 256>}]} {
    %cst = arith.constant 0.000000e+00 : f32
    %0 = vector.broadcast %cst : f32 to vector<18x25x8xf32>
    %c0 = arith.constant 0 : index
    %c0_0 = arith.constant 0 : index
    %c0_1 = arith.constant 0 : index
    %1 = vector.load %arg11[%c0, %c0_0, %c0_1] : memref<18x25x8xf32, #tpu.memory_space<vmem>>, vector<18x25x8xf32>
    tpu.vector_store %arg11[%c0, %c0_0, %c0_1], %0 {strides = array<i32>} : memref<18x25x8xf32, #tpu.memory_space<vmem>>, vector<18x25x8xf32>,
    %cst_2 = arith.constant 0.000000e+00 : f32
    %2 = vector.broadcast %cst_2 : f32 to vector<18x25x16xf32>
    %c0_3 = arith.constant 0 : index
    %c0_4 = arith.constant 0 : index
    %c0_5 = arith.constant 0 : index
    %3 = vector.load %arg12[%c0_3, %c0_4, %c0_5] : memref<18x25x16xf32, #tpu.memory_space<vmem>>, vector<18x25x16xf32>
    tpu.vector_store %arg12[%c0_3, %c0_4, %c0_5], %2 {strides = array<i32>} : memref<18x25x16xf32, #tpu.memory_space<vmem>>, vector<18x25x16xf32>,
    %c0_6 = arith.constant 0 : index
    %c0_7 = arith.constant 0 : index
    %c0_8 = arith.constant 0 : index
    %c0_9 = arith.constant 0 : index
    %4 = vector.load %arg1[%c0_6, %c0_7, %c0_8, %c0_9] : memref<1x16x16x8xf32, #tpu.memory_space<vmem>>, vector<1x16x16x8xf32>
    %5 = vector.shape_cast %4 : vector<1x16x16x8xf32> to vector<16x16x8xf32>
    %c1 = arith.constant 1 : index
    %c8 = arith.constant 8 : index
    %c0_10 = arith.constant 0 : index
    %6 = vector.load %arg11[%c1, %c8, %c0_10] : memref<18x25x8xf32, #tpu.memory_space<vmem>>, vector<16x16x8xf32>
    tpu.vector_store %arg11[%c1, %c8, %c0_10], %5 {strides = array<i32>} : memref<18x25x8xf32, #tpu.memory_space<vmem>>, vector<16x16x8xf32>,
    %cst_11 = arith.constant 0.000000e+00 : f32
    %7 = vector.broadcast %cst_11 : f32 to vector<32x256xf32>
    %c0_12 = arith.constant 0 : index
    %c7 = arith.constant 7 : index
    %c0_13 = arith.constant 0 : index
    %8 = vector.load %arg11[%c0_12, %c7, %c0_13] : memref<18x25x8xf32, #tpu.memory_space<vmem>>, vector<16x16x8xf32>
    %9 = vector.shape_cast %8 : vector<16x16x8xf32> to vector<256x8xf32>
    %c0_14 = arith.constant 0 : index
    %c0_15 = arith.constant 0 : index
    %c0_16 = arith.constant 0 : index
    %10 = vector.load %arg2[%c0_14, %c0_15, %c0_16] : memref<9x32x8xf32, #tpu.memory_space<vmem>>, vector<1x32x8xf32>
    %11 = vector.shape_cast %10 : vector<1x32x8xf32> to vector<32x8xf32>
    %cst_17 = arith.constant dense<0.000000e+00> : vector<32x256xf32>
    %12 = tpu.matmul %11, %9, %cst_17 {dimension_numbers = #tpu.dot_dimension_numbers<[1], [1], [0], [0], [0, 0, 1, 0], [], []>} : vector<32x8xf32>, vector<256x8xf32>, vector<32x256xf32> -> vector<32x256xf32>
    %13 = arith.addf %7, %12 : vector<32x256xf32>
    %c0_18 = arith.constant 0 : index
    %c8_19 = arith.constant 8 : index
    %c0_20 = arith.constant 0 : index
    %14 = vector.load %arg11[%c0_18, %c8_19, %c0_20] : memref<18x25x8xf32, #tpu.memory_space<vmem>>, vector<16x16x8xf32>
    %15 = vector.shape_cast %14 : vector<16x16x8xf32> to vector<256x8xf32>
    %c1_21 = arith.constant 1 : index
    %c0_22 = arith.constant 0 : index
    %c0_23 = arith.constant 0 : index
    %16 = vector.load %arg2[%c1_21, %c0_22, %c0_23] : memref<9x32x8xf32, #tpu.memory_space<vmem>>, vector<1x32x8xf32>
    %17 = vector.shape_cast %16 : vector<1x32x8xf32> to vector<32x8xf32>
    %cst_24 = arith.constant dense<0.000000e+00> : vector<32x256xf32>
    %18 = tpu.matmul %17, %15, %cst_24 {dimension_numbers = #tpu.dot_dimension_numbers<[1], [1], [0], [0], [0, 0, 1, 0], [], []>} : vector<32x8xf32>, vector<256x8xf32>, vector<32x256xf32> -> vector<32x256xf32>
    %19 = arith.addf %13, %18 : vector<32x256xf32>
    %c0_25 = arith.constant 0 : index
    %c9 = arith.constant 9 : index
    %c0_26 = arith.constant 0 : index
    %20 = vector.load %arg11[%c0_25, %c9, %c0_26] : memref<18x25x8xf32, #tpu.memory_space<vmem>>, vector<16x16x8xf32>
    %21 = vector.shape_cast %20 : vector<16x16x8xf32> to vector<256x8xf32>
    %c2 = arith.constant 2 : index
    %c0_27 = arith.constant 0 : index
    %c0_28 = arith.constant 0 : index
    %22 = vector.load %arg2[%c2, %c0_27, %c0_28] : memref<9x32x8xf32, #tpu.memory_space<vmem>>, vector<1x32x8xf32>
    %23 = vector.shape_cast %22 : vector<1x32x8xf32> to vector<32x8xf32>
    %cst_29 = arith.constant dense<0.000000e+00> : vector<32x256xf32>
    %24 = tpu.matmul %23, %21, %cst_29 {dimension_numbers = #tpu.dot_dimension_numbers<[1], [1], [0], [0], [0, 0, 1, 0], [], []>} : vector<32x8xf32>, vector<256x8xf32>, vector<32x256xf32> -> vector<32x256xf32>
    %25 = arith.addf %19, %24 : vector<32x256xf32>
    %c1_30 = arith.constant 1 : index
    %c7_31 = arith.constant 7 : index
    %c0_32 = arith.constant 0 : index
    %26 = vector.load %arg11[%c1_30, %c7_31, %c0_32] : memref<18x25x8xf32, #tpu.memory_space<vmem>>, vector<16x16x8xf32>
    %27 = vector.shape_cast %26 : vector<16x16x8xf32> to vector<256x8xf32>
    %c3 = arith.constant 3 : index
    %c0_33 = arith.constant 0 : index
    %c0_34 = arith.constant 0 : index
    %28 = vector.load %arg2[%c3, %c0_33, %c0_34] : memref<9x32x8xf32, #tpu.memory_space<vmem>>, vector<1x32x8xf32>
    %29 = vector.shape_cast %28 : vector<1x32x8xf32> to vector<32x8xf32>
    %cst_35 = arith.constant dense<0.000000e+00> : vector<32x256xf32>
    %30 = tpu.matmul %29, %27, %cst_35 {dimension_numbers = #tpu.dot_dimension_numbers<[1], [1], [0], [0], [0, 0, 1, 0], [], []>} : vector<32x8xf32>, vector<256x8xf32>, vector<32x256xf32> -> vector<32x256xf32>
    %31 = arith.addf %25, %30 : vector<32x256xf32>
    %c1_36 = arith.constant 1 : index
    %c8_37 = arith.constant 8 : index
    %c0_38 = arith.constant 0 : index
    %32 = vector.load %arg11[%c1_36, %c8_37, %c0_38] : memref<18x25x8xf32, #tpu.memory_space<vmem>>, vector<16x16x8xf32>
    %33 = vector.shape_cast %32 : vector<16x16x8xf32> to vector<256x8xf32>
    %c4 = arith.constant 4 : index
    %c0_39 = arith.constant 0 : index
    %c0_40 = arith.constant 0 : index
    %34 = vector.load %arg2[%c4, %c0_39, %c0_40] : memref<9x32x8xf32, #tpu.memory_space<vmem>>, vector<1x32x8xf32>
    %35 = vector.shape_cast %34 : vector<1x32x8xf32> to vector<32x8xf32>
    %cst_41 = arith.constant dense<0.000000e+00> : vector<32x256xf32>
    %36 = tpu.matmul %35, %33, %cst_41 {dimension_numbers = #tpu.dot_dimension_numbers<[1], [1], [0], [0], [0, 0, 1, 0], [], []>} : vector<32x8xf32>, vector<256x8xf32>, vector<32x256xf32> -> vector<32x256xf32>
    %37 = arith.addf %31, %36 : vector<32x256xf32>
    %c1_42 = arith.constant 1 : index
    %c9_43 = arith.constant 9 : index
    %c0_44 = arith.constant 0 : index
    %38 = vector.load %arg11[%c1_42, %c9_43, %c0_44] : memref<18x25x8xf32, #tpu.memory_space<vmem>>, vector<16x16x8xf32>
    %39 = vector.shape_cast %38 : vector<16x16x8xf32> to vector<256x8xf32>
    %c5 = arith.constant 5 : index
    %c0_45 = arith.constant 0 : index
    %c0_46 = arith.constant 0 : index
    %40 = vector.load %arg2[%c5, %c0_45, %c0_46] : memref<9x32x8xf32, #tpu.memory_space<vmem>>, vector<1x32x8xf32>
    %41 = vector.shape_cast %40 : vector<1x32x8xf32> to vector<32x8xf32>
    %cst_47 = arith.constant dense<0.000000e+00> : vector<32x256xf32>
    %42 = tpu.matmul %41, %39, %cst_47 {dimension_numbers = #tpu.dot_dimension_numbers<[1], [1], [0], [0], [0, 0, 1, 0], [], []>} : vector<32x8xf32>, vector<256x8xf32>, vector<32x256xf32> -> vector<32x256xf32>
    %43 = arith.addf %37, %42 : vector<32x256xf32>
    %c2_48 = arith.constant 2 : index
    %c7_49 = arith.constant 7 : index
    %c0_50 = arith.constant 0 : index
    %44 = vector.load %arg11[%c2_48, %c7_49, %c0_50] : memref<18x25x8xf32, #tpu.memory_space<vmem>>, vector<16x16x8xf32>
    %45 = vector.shape_cast %44 : vector<16x16x8xf32> to vector<256x8xf32>
    %c6 = arith.constant 6 : index
    %c0_51 = arith.constant 0 : index
    %c0_52 = arith.constant 0 : index
    %46 = vector.load %arg2[%c6, %c0_51, %c0_52] : memref<9x32x8xf32, #tpu.memory_space<vmem>>, vector<1x32x8xf32>
    %47 = vector.shape_cast %46 : vector<1x32x8xf32> to vector<32x8xf32>
    %cst_53 = arith.constant dense<0.000000e+00> : vector<32x256xf32>
    %48 = tpu.matmul %47, %45, %cst_53 {dimension_numbers = #tpu.dot_dimension_numbers<[1], [1], [0], [0], [0, 0, 1, 0], [], []>} : vector<32x8xf32>, vector<256x8xf32>, vector<32x256xf32> -> vector<32x256xf32>
    %49 = arith.addf %43, %48 : vector<32x256xf32>
    %c2_54 = arith.constant 2 : index
    %c8_55 = arith.constant 8 : index
    %c0_56 = arith.constant 0 : index
    %50 = vector.load %arg11[%c2_54, %c8_55, %c0_56] : memref<18x25x8xf32, #tpu.memory_space<vmem>>, vector<16x16x8xf32>
    %51 = vector.shape_cast %50 : vector<16x16x8xf32> to vector<256x8xf32>
    %c7_57 = arith.constant 7 : index
    %c0_58 = arith.constant 0 : index
    %c0_59 = arith.constant 0 : index
    %52 = vector.load %arg2[%c7_57, %c0_58, %c0_59] : memref<9x32x8xf32, #tpu.memory_space<vmem>>, vector<1x32x8xf32>
    %53 = vector.shape_cast %52 : vector<1x32x8xf32> to vector<32x8xf32>
    %cst_60 = arith.constant dense<0.000000e+00> : vector<32x256xf32>
    %54 = tpu.matmul %53, %51, %cst_60 {dimension_numbers = #tpu.dot_dimension_numbers<[1], [1], [0], [0], [0, 0, 1, 0], [], []>} : vector<32x8xf32>, vector<256x8xf32>, vector<32x256xf32> -> vector<32x256xf32>
    %55 = arith.addf %49, %54 : vector<32x256xf32>
    %c2_61 = arith.constant 2 : index
    %c9_62 = arith.constant 9 : index
    %c0_63 = arith.constant 0 : index
    %56 = vector.load %arg11[%c2_61, %c9_62, %c0_63] : memref<18x25x8xf32, #tpu.memory_space<vmem>>, vector<16x16x8xf32>
    %57 = vector.shape_cast %56 : vector<16x16x8xf32> to vector<256x8xf32>
    %c8_64 = arith.constant 8 : index
    %c0_65 = arith.constant 0 : index
    %c0_66 = arith.constant 0 : index
    %58 = vector.load %arg2[%c8_64, %c0_65, %c0_66] : memref<9x32x8xf32, #tpu.memory_space<vmem>>, vector<1x32x8xf32>
    %59 = vector.shape_cast %58 : vector<1x32x8xf32> to vector<32x8xf32>
    %cst_67 = arith.constant dense<0.000000e+00> : vector<32x256xf32>
    %60 = tpu.matmul %59, %57, %cst_67 {dimension_numbers = #tpu.dot_dimension_numbers<[1], [1], [0], [0], [0, 0, 1, 0], [], []>} : vector<32x8xf32>, vector<256x8xf32>, vector<32x256xf32> -> vector<32x256xf32>
    %61 = arith.addf %55, %60 : vector<32x256xf32>
    %62 = vector.extract_strided_slice %61 {offsets = [0, 0], sizes = [16, 256], strides = [1, 1]} : vector<32x256xf32> to vector<16x256xf32>
    %c0_68 = arith.constant 0 : index
    %c0_69 = arith.constant 0 : index
    %63 = vector.load %arg3[%c0_68, %c0_69] : memref<16x1xf32, #tpu.memory_space<vmem>>, vector<16x1xf32>
    %64 = vector.broadcast %63 : vector<16x1xf32> to vector<16x256xf32>
    %65 = arith.addf %62, %64 : vector<16x256xf32>
    %cst_70 = arith.constant 0.000000e+00 : f32
    %66 = vector.broadcast %cst_70 : f32 to vector<16x256xf32>
    %67 = arith.maximumf %65, %66 : vector<16x256xf32>
    %68 = vector.extract_strided_slice %61 {offsets = [16, 0], sizes = [16, 256], strides = [1, 1]} : vector<32x256xf32> to vector<16x256xf32>
    %69 = tpu.transpose %67, [1, 0] : vector<16x256xf32> -> vector<256x16xf32>
    %70 = vector.shape_cast %69 : vector<256x16xf32> to vector<16x16x16xf32>
    %c1_71 = arith.constant 1 : index
    %c8_72 = arith.constant 8 : index
    %c0_73 = arith.constant 0 : index
    %71 = vector.load %arg12[%c1_71, %c8_72, %c0_73] : memref<18x25x16xf32, #tpu.memory_space<vmem>>, vector<16x16x16xf32>
    tpu.vector_store %arg12[%c1_71, %c8_72, %c0_73], %70 {strides = array<i32>} : memref<18x25x16xf32, #tpu.memory_space<vmem>>, vector<16x16x16xf32>,
    %cst_74 = arith.constant 0.000000e+00 : f32
    %72 = vector.broadcast %cst_74 : f32 to vector<16x256xf32>
    %c0_75 = arith.constant 0 : index
    %c7_76 = arith.constant 7 : index
    %c0_77 = arith.constant 0 : index
    %73 = vector.load %arg12[%c0_75, %c7_76, %c0_77] : memref<18x25x16xf32, #tpu.memory_space<vmem>>, vector<16x16x16xf32>
    %74 = vector.shape_cast %73 : vector<16x16x16xf32> to vector<256x16xf32>
    %c0_78 = arith.constant 0 : index
    %c0_79 = arith.constant 0 : index
    %c0_80 = arith.constant 0 : index
    %75 = vector.load %arg4[%c0_78, %c0_79, %c0_80] : memref<9x16x16xf32, #tpu.memory_space<vmem>>, vector<1x16x16xf32>
    %76 = vector.shape_cast %75 : vector<1x16x16xf32> to vector<16x16xf32>
    %cst_81 = arith.constant dense<0.000000e+00> : vector<16x256xf32>
    %77 = tpu.matmul %76, %74, %cst_81 {dimension_numbers = #tpu.dot_dimension_numbers<[1], [1], [0], [0], [0, 0, 1, 0], [], []>} : vector<16x16xf32>, vector<256x16xf32>, vector<16x256xf32> -> vector<16x256xf32>
    %78 = arith.addf %72, %77 : vector<16x256xf32>
    %c0_82 = arith.constant 0 : index
    %c8_83 = arith.constant 8 : index
    %c0_84 = arith.constant 0 : index
    %79 = vector.load %arg12[%c0_82, %c8_83, %c0_84] : memref<18x25x16xf32, #tpu.memory_space<vmem>>, vector<16x16x16xf32>
    %80 = vector.shape_cast %79 : vector<16x16x16xf32> to vector<256x16xf32>
    %c1_85 = arith.constant 1 : index
    %c0_86 = arith.constant 0 : index
    %c0_87 = arith.constant 0 : index
    %81 = vector.load %arg4[%c1_85, %c0_86, %c0_87] : memref<9x16x16xf32, #tpu.memory_space<vmem>>, vector<1x16x16xf32>
    %82 = vector.shape_cast %81 : vector<1x16x16xf32> to vector<16x16xf32>
    %cst_88 = arith.constant dense<0.000000e+00> : vector<16x256xf32>
    %83 = tpu.matmul %82, %80, %cst_88 {dimension_numbers = #tpu.dot_dimension_numbers<[1], [1], [0], [0], [0, 0, 1, 0], [], []>} : vector<16x16xf32>, vector<256x16xf32>, vector<16x256xf32> -> vector<16x256xf32>
    %84 = arith.addf %78, %83 : vector<16x256xf32>
    %c0_89 = arith.constant 0 : index
    %c9_90 = arith.constant 9 : index
    %c0_91 = arith.constant 0 : index
    %85 = vector.load %arg12[%c0_89, %c9_90, %c0_91] : memref<18x25x16xf32, #tpu.memory_space<vmem>>, vector<16x16x16xf32>
    %86 = vector.shape_cast %85 : vector<16x16x16xf32> to vector<256x16xf32>
    %c2_92 = arith.constant 2 : index
    %c0_93 = arith.constant 0 : index
    %c0_94 = arith.constant 0 : index
    %87 = vector.load %arg4[%c2_92, %c0_93, %c0_94] : memref<9x16x16xf32, #tpu.memory_space<vmem>>, vector<1x16x16xf32>
    %88 = vector.shape_cast %87 : vector<1x16x16xf32> to vector<16x16xf32>
    %cst_95 = arith.constant dense<0.000000e+00> : vector<16x256xf32>
    %89 = tpu.matmul %88, %86, %cst_95 {dimension_numbers = #tpu.dot_dimension_numbers<[1], [1], [0], [0], [0, 0, 1, 0], [], []>} : vector<16x16xf32>, vector<256x16xf32>, vector<16x256xf32> -> vector<16x256xf32>
    %90 = arith.addf %84, %89 : vector<16x256xf32>
    %c1_96 = arith.constant 1 : index
    %c7_97 = arith.constant 7 : index
    %c0_98 = arith.constant 0 : index
    %91 = vector.load %arg12[%c1_96, %c7_97, %c0_98] : memref<18x25x16xf32, #tpu.memory_space<vmem>>, vector<16x16x16xf32>
    %92 = vector.shape_cast %91 : vector<16x16x16xf32> to vector<256x16xf32>
    %c3_99 = arith.constant 3 : index
    %c0_100 = arith.constant 0 : index
    %c0_101 = arith.constant 0 : index
    %93 = vector.load %arg4[%c3_99, %c0_100, %c0_101] : memref<9x16x16xf32, #tpu.memory_space<vmem>>, vector<1x16x16xf32>
    %94 = vector.shape_cast %93 : vector<1x16x16xf32> to vector<16x16xf32>
    %cst_102 = arith.constant dense<0.000000e+00> : vector<16x256xf32>
    %95 = tpu.matmul %94, %92, %cst_102 {dimension_numbers = #tpu.dot_dimension_numbers<[1], [1], [0], [0], [0, 0, 1, 0], [], []>} : vector<16x16xf32>, vector<256x16xf32>, vector<16x256xf32> -> vector<16x256xf32>
    %96 = arith.addf %90, %95 : vector<16x256xf32>
    %c1_103 = arith.constant 1 : index
    %c8_104 = arith.constant 8 : index
    %c0_105 = arith.constant 0 : index
    %97 = vector.load %arg12[%c1_103, %c8_104, %c0_105] : memref<18x25x16xf32, #tpu.memory_space<vmem>>, vector<16x16x16xf32>
    %98 = vector.shape_cast %97 : vector<16x16x16xf32> to vector<256x16xf32>
    %c4_106 = arith.constant 4 : index
    %c0_107 = arith.constant 0 : index
    %c0_108 = arith.constant 0 : index
    %99 = vector.load %arg4[%c4_106, %c0_107, %c0_108] : memref<9x16x16xf32, #tpu.memory_space<vmem>>, vector<1x16x16xf32>
    %100 = vector.shape_cast %99 : vector<1x16x16xf32> to vector<16x16xf32>
    %cst_109 = arith.constant dense<0.000000e+00> : vector<16x256xf32>
    %101 = tpu.matmul %100, %98, %cst_109 {dimension_numbers = #tpu.dot_dimension_numbers<[1], [1], [0], [0], [0, 0, 1, 0], [], []>} : vector<16x16xf32>, vector<256x16xf32>, vector<16x256xf32> -> vector<16x256xf32>
    %102 = arith.addf %96, %101 : vector<16x256xf32>
    %c1_110 = arith.constant 1 : index
    %c9_111 = arith.constant 9 : index
    %c0_112 = arith.constant 0 : index
    %103 = vector.load %arg12[%c1_110, %c9_111, %c0_112] : memref<18x25x16xf32, #tpu.memory_space<vmem>>, vector<16x16x16xf32>
    %104 = vector.shape_cast %103 : vector<16x16x16xf32> to vector<256x16xf32>
    %c5_113 = arith.constant 5 : index
    %c0_114 = arith.constant 0 : index
    %c0_115 = arith.constant 0 : index
    %105 = vector.load %arg4[%c5_113, %c0_114, %c0_115] : memref<9x16x16xf32, #tpu.memory_space<vmem>>, vector<1x16x16xf32>
    %106 = vector.shape_cast %105 : vector<1x16x16xf32> to vector<16x16xf32>
    %cst_116 = arith.constant dense<0.000000e+00> : vector<16x256xf32>
    %107 = tpu.matmul %106, %104, %cst_116 {dimension_numbers = #tpu.dot_dimension_numbers<[1], [1], [0], [0], [0, 0, 1, 0], [], []>} : vector<16x16xf32>, vector<256x16xf32>, vector<16x256xf32> -> vector<16x256xf32>
    %108 = arith.addf %102, %107 : vector<16x256xf32>
    %c2_117 = arith.constant 2 : index
    %c7_118 = arith.constant 7 : index
    %c0_119 = arith.constant 0 : index
    %109 = vector.load %arg12[%c2_117, %c7_118, %c0_119] : memref<18x25x16xf32, #tpu.memory_space<vmem>>, vector<16x16x16xf32>
    %110 = vector.shape_cast %109 : vector<16x16x16xf32> to vector<256x16xf32>
    %c6_120 = arith.constant 6 : index
    %c0_121 = arith.constant 0 : index
    %c0_122 = arith.constant 0 : index
    %111 = vector.load %arg4[%c6_120, %c0_121, %c0_122] : memref<9x16x16xf32, #tpu.memory_space<vmem>>, vector<1x16x16xf32>
    %112 = vector.shape_cast %111 : vector<1x16x16xf32> to vector<16x16xf32>
    %cst_123 = arith.constant dense<0.000000e+00> : vector<16x256xf32>
    %113 = tpu.matmul %112, %110, %cst_123 {dimension_numbers = #tpu.dot_dimension_numbers<[1], [1], [0], [0], [0, 0, 1, 0], [], []>} : vector<16x16xf32>, vector<256x16xf32>, vector<16x256xf32> -> vector<16x256xf32>
    %114 = arith.addf %108, %113 : vector<16x256xf32>
    %c2_124 = arith.constant 2 : index
    %c8_125 = arith.constant 8 : index
    %c0_126 = arith.constant 0 : index
    %115 = vector.load %arg12[%c2_124, %c8_125, %c0_126] : memref<18x25x16xf32, #tpu.memory_space<vmem>>, vector<16x16x16xf32>
    %116 = vector.shape_cast %115 : vector<16x16x16xf32> to vector<256x16xf32>
    %c7_127 = arith.constant 7 : index
    %c0_128 = arith.constant 0 : index
    %c0_129 = arith.constant 0 : index
    %117 = vector.load %arg4[%c7_127, %c0_128, %c0_129] : memref<9x16x16xf32, #tpu.memory_space<vmem>>, vector<1x16x16xf32>
    %118 = vector.shape_cast %117 : vector<1x16x16xf32> to vector<16x16xf32>
    %cst_130 = arith.constant dense<0.000000e+00> : vector<16x256xf32>
    %119 = tpu.matmul %118, %116, %cst_130 {dimension_numbers = #tpu.dot_dimension_numbers<[1], [1], [0], [0], [0, 0, 1, 0], [], []>} : vector<16x16xf32>, vector<256x16xf32>, vector<16x256xf32> -> vector<16x256xf32>
    %120 = arith.addf %114, %119 : vector<16x256xf32>
    %c2_131 = arith.constant 2 : index
    %c9_132 = arith.constant 9 : index
    %c0_133 = arith.constant 0 : index
    %121 = vector.load %arg12[%c2_131, %c9_132, %c0_133] : memref<18x25x16xf32, #tpu.memory_space<vmem>>, vector<16x16x16xf32>
    %122 = vector.shape_cast %121 : vector<16x16x16xf32> to vector<256x16xf32>
    %c8_134 = arith.constant 8 : index
    %c0_135 = arith.constant 0 : index
    %c0_136 = arith.constant 0 : index
    %123 = vector.load %arg4[%c8_134, %c0_135, %c0_136] : memref<9x16x16xf32, #tpu.memory_space<vmem>>, vector<1x16x16xf32>
    %124 = vector.shape_cast %123 : vector<1x16x16xf32> to vector<16x16xf32>
    %cst_137 = arith.constant dense<0.000000e+00> : vector<16x256xf32>
    %125 = tpu.matmul %124, %122, %cst_137 {dimension_numbers = #tpu.dot_dimension_numbers<[1], [1], [0], [0], [0, 0, 1, 0], [], []>} : vector<16x16xf32>, vector<256x16xf32>, vector<16x256xf32> -> vector<16x256xf32>
    %126 = arith.addf %120, %125 : vector<16x256xf32>
    %c0_138 = arith.constant 0 : index
    %c0_139 = arith.constant 0 : index
    %127 = vector.load %arg5[%c0_138, %c0_139] : memref<16x1xf32, #tpu.memory_space<vmem>>, vector<16x1xf32>
    %128 = vector.broadcast %127 : vector<16x1xf32> to vector<16x256xf32>
    %129 = arith.addf %126, %128 : vector<16x256xf32>
    %cst_140 = arith.constant 0.000000e+00 : f32
    %130 = vector.broadcast %cst_140 : f32 to vector<16x256xf32>
    %131 = arith.maximumf %129, %130 : vector<16x256xf32>
    %132 = tpu.transpose %131, [1, 0] : vector<16x256xf32> -> vector<256x16xf32>
    %133 = vector.shape_cast %132 : vector<256x16xf32> to vector<16x16x16xf32>
    %c1_141 = arith.constant 1 : index
    %c8_142 = arith.constant 8 : index
    %c0_143 = arith.constant 0 : index
    %134 = vector.load %arg12[%c1_141, %c8_142, %c0_143] : memref<18x25x16xf32, #tpu.memory_space<vmem>>, vector<16x16x16xf32>
    tpu.vector_store %arg12[%c1_141, %c8_142, %c0_143], %133 {strides = array<i32>} : memref<18x25x16xf32, #tpu.memory_space<vmem>>, vector<16x16x16xf32>,
    %c0_144 = arith.constant 0 : index
    %c7_145 = arith.constant 7 : index
    %c0_146 = arith.constant 0 : index
    %135 = vector.load %arg12[%c0_144, %c7_145, %c0_146] : memref<18x25x16xf32, #tpu.memory_space<vmem>>, vector<16x16x16xf32>
    %136 = vector.shape_cast %135 : vector<16x16x16xf32> to vector<256x16xf32>
    %c0_147 = arith.constant 0 : index
    %c0_148 = arith.constant 0 : index
    %c0_149 = arith.constant 0 : index
    %137 = vector.load %arg6[%c0_147, %c0_148, %c0_149] : memref<9x16x16xf32, #tpu.memory_space<vmem>>, vector<1x16x16xf32>
    %138 = vector.shape_cast %137 : vector<1x16x16xf32> to vector<16x16xf32>
    %cst_150 = arith.constant dense<0.000000e+00> : vector<16x256xf32>
    %139 = tpu.matmul %138, %136, %cst_150 {dimension_numbers = #tpu.dot_dimension_numbers<[1], [1], [0], [0], [0, 0, 1, 0], [], []>} : vector<16x16xf32>, vector<256x16xf32>, vector<16x256xf32> -> vector<16x256xf32>
    %140 = arith.addf %68, %139 : vector<16x256xf32>
    %c0_151 = arith.constant 0 : index
    %c8_152 = arith.constant 8 : index
    %c0_153 = arith.constant 0 : index
    %141 = vector.load %arg12[%c0_151, %c8_152, %c0_153] : memref<18x25x16xf32, #tpu.memory_space<vmem>>, vector<16x16x16xf32>
    %142 = vector.shape_cast %141 : vector<16x16x16xf32> to vector<256x16xf32>
    %c1_154 = arith.constant 1 : index
    %c0_155 = arith.constant 0 : index
    %c0_156 = arith.constant 0 : index
    %143 = vector.load %arg6[%c1_154, %c0_155, %c0_156] : memref<9x16x16xf32, #tpu.memory_space<vmem>>, vector<1x16x16xf32>
    %144 = vector.shape_cast %143 : vector<1x16x16xf32> to vector<16x16xf32>
    %cst_157 = arith.constant dense<0.000000e+00> : vector<16x256xf32>
    %145 = tpu.matmul %144, %142, %cst_157 {dimension_numbers = #tpu.dot_dimension_numbers<[1], [1], [0], [0], [0, 0, 1, 0], [], []>} : vector<16x16xf32>, vector<256x16xf32>, vector<16x256xf32> -> vector<16x256xf32>
    %146 = arith.addf %140, %145 : vector<16x256xf32>
    %c0_158 = arith.constant 0 : index
    %c9_159 = arith.constant 9 : index
    %c0_160 = arith.constant 0 : index
    %147 = vector.load %arg12[%c0_158, %c9_159, %c0_160] : memref<18x25x16xf32, #tpu.memory_space<vmem>>, vector<16x16x16xf32>
    %148 = vector.shape_cast %147 : vector<16x16x16xf32> to vector<256x16xf32>
    %c2_161 = arith.constant 2 : index
    %c0_162 = arith.constant 0 : index
    %c0_163 = arith.constant 0 : index
    %149 = vector.load %arg6[%c2_161, %c0_162, %c0_163] : memref<9x16x16xf32, #tpu.memory_space<vmem>>, vector<1x16x16xf32>
    %150 = vector.shape_cast %149 : vector<1x16x16xf32> to vector<16x16xf32>
    %cst_164 = arith.constant dense<0.000000e+00> : vector<16x256xf32>
    %151 = tpu.matmul %150, %148, %cst_164 {dimension_numbers = #tpu.dot_dimension_numbers<[1], [1], [0], [0], [0, 0, 1, 0], [], []>} : vector<16x16xf32>, vector<256x16xf32>, vector<16x256xf32> -> vector<16x256xf32>
    %152 = arith.addf %146, %151 : vector<16x256xf32>
    %c1_165 = arith.constant 1 : index
    %c7_166 = arith.constant 7 : index
    %c0_167 = arith.constant 0 : index
    %153 = vector.load %arg12[%c1_165, %c7_166, %c0_167] : memref<18x25x16xf32, #tpu.memory_space<vmem>>, vector<16x16x16xf32>
    %154 = vector.shape_cast %153 : vector<16x16x16xf32> to vector<256x16xf32>
    %c3_168 = arith.constant 3 : index
    %c0_169 = arith.constant 0 : index
    %c0_170 = arith.constant 0 : index
    %155 = vector.load %arg6[%c3_168, %c0_169, %c0_170] : memref<9x16x16xf32, #tpu.memory_space<vmem>>, vector<1x16x16xf32>
    %156 = vector.shape_cast %155 : vector<1x16x16xf32> to vector<16x16xf32>
    %cst_171 = arith.constant dense<0.000000e+00> : vector<16x256xf32>
    %157 = tpu.matmul %156, %154, %cst_171 {dimension_numbers = #tpu.dot_dimension_numbers<[1], [1], [0], [0], [0, 0, 1, 0], [], []>} : vector<16x16xf32>, vector<256x16xf32>, vector<16x256xf32> -> vector<16x256xf32>
    %158 = arith.addf %152, %157 : vector<16x256xf32>
    %c1_172 = arith.constant 1 : index
    %c8_173 = arith.constant 8 : index
    %c0_174 = arith.constant 0 : index
    %159 = vector.load %arg12[%c1_172, %c8_173, %c0_174] : memref<18x25x16xf32, #tpu.memory_space<vmem>>, vector<16x16x16xf32>
    %160 = vector.shape_cast %159 : vector<16x16x16xf32> to vector<256x16xf32>
    %c4_175 = arith.constant 4 : index
    %c0_176 = arith.constant 0 : index
    %c0_177 = arith.constant 0 : index
    %161 = vector.load %arg6[%c4_175, %c0_176, %c0_177] : memref<9x16x16xf32, #tpu.memory_space<vmem>>, vector<1x16x16xf32>
    %162 = vector.shape_cast %161 : vector<1x16x16xf32> to vector<16x16xf32>
    %cst_178 = arith.constant dense<0.000000e+00> : vector<16x256xf32>
    %163 = tpu.matmul %162, %160, %cst_178 {dimension_numbers = #tpu.dot_dimension_numbers<[1], [1], [0], [0], [0, 0, 1, 0], [], []>} : vector<16x16xf32>, vector<256x16xf32>, vector<16x256xf32> -> vector<16x256xf32>
    %164 = arith.addf %158, %163 : vector<16x256xf32>
    %c1_179 = arith.constant 1 : index
    %c9_180 = arith.constant 9 : index
    %c0_181 = arith.constant 0 : index
    %165 = vector.load %arg12[%c1_179, %c9_180, %c0_181] : memref<18x25x16xf32, #tpu.memory_space<vmem>>, vector<16x16x16xf32>
    %166 = vector.shape_cast %165 : vector<16x16x16xf32> to vector<256x16xf32>
    %c5_182 = arith.constant 5 : index
    %c0_183 = arith.constant 0 : index
    %c0_184 = arith.constant 0 : index
    %167 = vector.load %arg6[%c5_182, %c0_183, %c0_184] : memref<9x16x16xf32, #tpu.memory_space<vmem>>, vector<1x16x16xf32>
    %168 = vector.shape_cast %167 : vector<1x16x16xf32> to vector<16x16xf32>
    %cst_185 = arith.constant dense<0.000000e+00> : vector<16x256xf32>
    %169 = tpu.matmul %168, %166, %cst_185 {dimension_numbers = #tpu.dot_dimension_numbers<[1], [1], [0], [0], [0, 0, 1, 0], [], []>} : vector<16x16xf32>, vector<256x16xf32>, vector<16x256xf32> -> vector<16x256xf32>
    %170 = arith.addf %164, %169 : vector<16x256xf32>
    %c2_186 = arith.constant 2 : index
    %c7_187 = arith.constant 7 : index
    %c0_188 = arith.constant 0 : index
    %171 = vector.load %arg12[%c2_186, %c7_187, %c0_188] : memref<18x25x16xf32, #tpu.memory_space<vmem>>, vector<16x16x16xf32>
    %172 = vector.shape_cast %171 : vector<16x16x16xf32> to vector<256x16xf32>
    %c6_189 = arith.constant 6 : index
    %c0_190 = arith.constant 0 : index
    %c0_191 = arith.constant 0 : index
    %173 = vector.load %arg6[%c6_189, %c0_190, %c0_191] : memref<9x16x16xf32, #tpu.memory_space<vmem>>, vector<1x16x16xf32>
    %174 = vector.shape_cast %173 : vector<1x16x16xf32> to vector<16x16xf32>
    %cst_192 = arith.constant dense<0.000000e+00> : vector<16x256xf32>
    %175 = tpu.matmul %174, %172, %cst_192 {dimension_numbers = #tpu.dot_dimension_numbers<[1], [1], [0], [0], [0, 0, 1, 0], [], []>} : vector<16x16xf32>, vector<256x16xf32>, vector<16x256xf32> -> vector<16x256xf32>
    %176 = arith.addf %170, %175 : vector<16x256xf32>
    %c2_193 = arith.constant 2 : index
    %c8_194 = arith.constant 8 : index
    %c0_195 = arith.constant 0 : index
    %177 = vector.load %arg12[%c2_193, %c8_194, %c0_195] : memref<18x25x16xf32, #tpu.memory_space<vmem>>, vector<16x16x16xf32>
    %178 = vector.shape_cast %177 : vector<16x16x16xf32> to vector<256x16xf32>
    %c7_196 = arith.constant 7 : index
    %c0_197 = arith.constant 0 : index
    %c0_198 = arith.constant 0 : index
    %179 = vector.load %arg6[%c7_196, %c0_197, %c0_198] : memref<9x16x16xf32, #tpu.memory_space<vmem>>, vector<1x16x16xf32>
    %180 = vector.shape_cast %179 : vector<1x16x16xf32> to vector<16x16xf32>
    %cst_199 = arith.constant dense<0.000000e+00> : vector<16x256xf32>
    %181 = tpu.matmul %180, %178, %cst_199 {dimension_numbers = #tpu.dot_dimension_numbers<[1], [1], [0], [0], [0, 0, 1, 0], [], []>} : vector<16x16xf32>, vector<256x16xf32>, vector<16x256xf32> -> vector<16x256xf32>
    %182 = arith.addf %176, %181 : vector<16x256xf32>
    %c2_200 = arith.constant 2 : index
    %c9_201 = arith.constant 9 : index
    %c0_202 = arith.constant 0 : index
    %183 = vector.load %arg12[%c2_200, %c9_201, %c0_202] : memref<18x25x16xf32, #tpu.memory_space<vmem>>, vector<16x16x16xf32>
    %184 = vector.shape_cast %183 : vector<16x16x16xf32> to vector<256x16xf32>
    %c8_203 = arith.constant 8 : index
    %c0_204 = arith.constant 0 : index
    %c0_205 = arith.constant 0 : index
    %185 = vector.load %arg6[%c8_203, %c0_204, %c0_205] : memref<9x16x16xf32, #tpu.memory_space<vmem>>, vector<1x16x16xf32>
    %186 = vector.shape_cast %185 : vector<1x16x16xf32> to vector<16x16xf32>
    %cst_206 = arith.constant dense<0.000000e+00> : vector<16x256xf32>
    %187 = tpu.matmul %186, %184, %cst_206 {dimension_numbers = #tpu.dot_dimension_numbers<[1], [1], [0], [0], [0, 0, 1, 0], [], []>} : vector<16x16xf32>, vector<256x16xf32>, vector<16x256xf32> -> vector<16x256xf32>
    %188 = arith.addf %182, %187 : vector<16x256xf32>
    %c0_207 = arith.constant 0 : index
    %c0_208 = arith.constant 0 : index
    %189 = vector.load %arg7[%c0_207, %c0_208] : memref<16x1xf32, #tpu.memory_space<vmem>>, vector<16x1xf32>
    %190 = vector.broadcast %189 : vector<16x1xf32> to vector<16x256xf32>
    %191 = arith.addf %188, %190 : vector<16x256xf32>
    %cst_209 = arith.constant 0.000000e+00 : f32
    %192 = vector.broadcast %cst_209 : f32 to vector<16x256xf32>
    %193 = arith.maximumf %191, %192 : vector<16x256xf32>
    %c0_210 = arith.constant 0 : index
    %c0_211 = arith.constant 0 : index
    %194 = vector.load %arg8[%c0_210, %c0_211] : memref<5x16xf32, #tpu.memory_space<vmem>>, vector<5x16xf32>
    %cst_212 = arith.constant dense<0.000000e+00> : vector<5x256xf32>
    %195 = tpu.matmul %194, %193, %cst_212 {dimension_numbers = #tpu.dot_dimension_numbers<[1], [0], [0], [1], [0, 0, 1, 1], [], []>} : vector<5x16xf32>, vector<16x256xf32>, vector<5x256xf32> -> vector<5x256xf32>
    %c0_213 = arith.constant 0 : index
    %c0_214 = arith.constant 0 : index
    %196 = vector.load %arg9[%c0_213, %c0_214] : memref<5x1xf32, #tpu.memory_space<vmem>>, vector<5x1xf32>
    %197 = vector.broadcast %196 : vector<5x1xf32> to vector<5x256xf32>
    %198 = arith.addf %195, %197 : vector<5x256xf32>
    %c0_215 = arith.constant 0 : index
    %c0_216 = arith.constant 0 : index
    %c0_217 = arith.constant 0 : index
    %199 = vector.load %arg10[%c0_215, %c0_216, %c0_217] : memref<1x5x256xf32, #tpu.memory_space<vmem>>, vector<1x5x256xf32>
    %200 = vector.shape_cast %199 : vector<1x5x256xf32> to vector<5x256xf32>
    %201 = vector.shape_cast %198 : vector<5x256xf32> to vector<1x5x256xf32>
    tpu.vector_store %arg10[%c0_215, %c0_216, %c0_217], %201 {strides = array<i32>} : memref<1x5x256xf32, #tpu.memory_space<vmem>>, vector<1x5x256xf32>,
    return
  }
  func.func @transform_0(%arg0: i32) -> (i32, i32, i32, i32) {
    %c0_i32 = arith.constant 0 : i32
    %c0_i32_0 = arith.constant 0 : i32
    %c0_i32_1 = arith.constant 0 : i32
    %c0_i32_2 = arith.constant 0 : i32
    return %arg0, %c0_i32, %c0_i32_0, %c0_i32_1 : i32, i32, i32, i32
  }
  func.func @transform_1(%arg0: i32) -> (i32, i32, i32) {
    %c0_i32 = arith.constant 0 : i32
    %c0_i32_0 = arith.constant 0 : i32
    %c0_i32_1 = arith.constant 0 : i32
    %c0_i32_2 = arith.constant 0 : i32
    return %c0_i32, %c0_i32_0, %c0_i32_1 : i32, i32, i32
  }
  func.func @transform_2(%arg0: i32) -> (i32, i32) {
    %c0_i32 = arith.constant 0 : i32
    %c0_i32_0 = arith.constant 0 : i32
    %c0_i32_1 = arith.constant 0 : i32
    return %c0_i32, %c0_i32_0 : i32, i32
  }
  func.func @transform_3(%arg0: i32) -> (i32, i32, i32) {
    %c0_i32 = arith.constant 0 : i32
    %c0_i32_0 = arith.constant 0 : i32
    %c0_i32_1 = arith.constant 0 : i32
    %c0_i32_2 = arith.constant 0 : i32
    return %c0_i32, %c0_i32_0, %c0_i32_1 : i32, i32, i32
  }
  func.func @transform_4(%arg0: i32) -> (i32, i32) {
    %c0_i32 = arith.constant 0 : i32
    %c0_i32_0 = arith.constant 0 : i32
    %c0_i32_1 = arith.constant 0 : i32
    return %c0_i32, %c0_i32_0 : i32, i32
  }
  func.func @transform_5(%arg0: i32) -> (i32, i32, i32) {
    %c0_i32 = arith.constant 0 : i32
    %c0_i32_0 = arith.constant 0 : i32
    %c0_i32_1 = arith.constant 0 : i32
    %c0_i32_2 = arith.constant 0 : i32
    return %c0_i32, %c0_i32_0, %c0_i32_1 : i32, i32, i32
  }
  func.func @transform_6(%arg0: i32) -> (i32, i32) {
    %c0_i32 = arith.constant 0 : i32
    %c0_i32_0 = arith.constant 0 : i32
    %c0_i32_1 = arith.constant 0 : i32
    return %c0_i32, %c0_i32_0 : i32, i32
  }
  func.func @transform_7(%arg0: i32) -> (i32, i32) {
    %c0_i32 = arith.constant 0 : i32
    %c0_i32_0 = arith.constant 0 : i32
    %c0_i32_1 = arith.constant 0 : i32
    return %c0_i32, %c0_i32_0 : i32, i32
  }
  func.func @transform_8(%arg0: i32) -> (i32, i32) {
    %c0_i32 = arith.constant 0 : i32
    %c0_i32_0 = arith.constant 0 : i32
    %c0_i32_1 = arith.constant 0 : i32
    return %c0_i32, %c0_i32_0 : i32, i32
  }
  func.func @transform_9(%arg0: i32) -> (i32, i32, i32) {
    %c0_i32 = arith.constant 0 : i32
    %c0_i32_0 = arith.constant 0 : i32
    %c0_i32_1 = arith.constant 0 : i32
    return %arg0, %c0_i32, %c0_i32_0 : i32, i32, i32
  }
}

</mosaic_0001>

<bundles_post_ra>
// kernel: tpu_custom_call.1
= control target key start
LH: loop header
LB: loop body
LE: loop exit
PB: predicated region body
PF: predicated region fallthrough
CT: control target
= control target key end

     0   :  { %s7306_s30 = smov 0   ;;  %s10478_s0 = inlined_call_operand.vmem [shape: f32[2,16,16,8], index: 0, kind: input, shape index: {}]   ;;  %s10479_s1 = inlined_call_operand.vmem [shape: f32[9,32,8], index: 1, kind: input, shape index: {}]   ;;  %s10480_s2 = inlined_call_operand.vmem [shape: f32[16,1], index: 2, kind: input, shape index: {}]   ;;  %s10481_s3 = inlined_call_operand.vmem [shape: f32[9,16,16], index: 3, kind: input, shape index: {}]   ;;  %s10482_s4 = inlined_call_operand.vmem [shape: f32[16,1], index: 4, kind: input, shape index: {}]   ;;  %s10483_s5 = inlined_call_operand.vmem [shape: f32[9,16,16], index: 5, kind: input, shape index: {}]   ;;  %s10484_s6 = inlined_call_operand.vmem [shape: f32[16,1], index: 6, kind: input, shape index: {}]   ;;  %s10485_s7 = inlined_call_operand.vmem [shape: f32[5,16], index: 7, kind: input, shape index: {}]   ;;  %s10486_s8 = inlined_call_operand.vmem [shape: f32[5,1], index: 8, kind: input, shape index: {}]   ;;  %s10487_s9 = inlined_call_operand.vmem [shape: f32[2,5,256], index: 9, kind: output, shape index: {}]  }
   0x1 LB: > { %s6146_s10 = sadd.s32 4294967295, %s7252_s30   ;;  %p6150_p0 = scmp.ge.s32.totalorder %s7252_s30, 1  ;;  %s7252_s30 = sphi %s7306_s30, %s19_s30  }
   0x2   : > { %p287_p1 = scmp.lt.s32.totalorder %s7252_s30, 3 }
   0x4   : > { %p288_p2 = pnand %p6150_p0, %p287_p1 }
   0x6   : > { %291 = sbr.rel (%p288_p2) target bundleno = 2123 (0x84b), region = 56 }
   0xb   : > { %p323_p3 = scmp.lt.s32.totalorder %s6146_s10, 1  ;;  %vm333_vm0 = vcmask 64512   ;;  %v10488_v0 = vmov 0.0   ;;  %vm337_vm1 = vcmask 57344   ;;  %vm407_vm2 = vcmask 130048  }
   0xc   : > { %365 = vst.msk [vmem:[#allocation2 + $0xf0] sm:$0xff] %vm333_vm0, %v10488_v0  ;;  %vm411_vm3 = vcmask 122880  }
   0xd   : > { %s10787_s10 = smov (!%p323_p3, %s6146_s10), 1  ;;  %334 = vst.msk [vmem:[#allocation2] sm:$0xff] %vm333_vm0, %v10488_v0 }
   0xe   : > { %335 = vst.msk [vmem:[#allocation2 + $0x8] sm:$0xff] %vm333_vm0, %v10488_v0  ;;  %s7231_s11 = sshll.u32 %s10787_s10, 8  ;;  %s7232_s23 = sshll.u32 %s10787_s10, 4 }
   0xf   : > { %336 = vst.msk [vmem:[#allocation2 + $0x10] sm:$0xff] %vm333_vm0, %v10488_v0  ;;  %s7328_s14 = scalar_lea.vmem %s10478_s0, %s7231_s11  ;;  %s332_s26 = scalar_lea.vmem %s10487_s9, %s7232_s23 }
  0x10   : > { %339 = vst.msk [vmem:[#allocation2 + $0x20] sm:$0xff] %vm333_vm0, %v10488_v0  ;;  %v494_v1 = vld [vmem:[%s7328_s14 + $0x68] sm:$0xff]  ;;  %v493_v4 = vld [vmem:[%s7328_s14 + $0x60] sm:$0xff]  ;;  %v492_v6 = vld [vmem:[%s7328_s14 + $0x58] sm:$0xff] }
  0x11   : > { %340 = vst.msk [vmem:[#allocation2 + $0x28] sm:$0xff] %vm333_vm0, %v10488_v0  ;;  %v510_v3 = vld [vmem:[%s7328_s14 + $0xe8] sm:$0xff]  ;;  %v509_v5 = vld [vmem:[%s7328_s14 + $0xe0] sm:$0xff]  ;;  %v508_v7 = vld [vmem:[%s7328_s14 + $0xd8] sm:$0xff] }
  0x12   : > { %527 = vst.msk [vmem:[#allocation2 + $0xf0] sm:$0xff] %vm333_vm0, %v494_v1  ;;  %v491_v8 = vld [vmem:[%s7328_s14 + $0x50] sm:$0xff]  ;;  %v490_v10 = vld [vmem:[%s7328_s14 + $0x48] sm:$0xff]  ;;  %v489_v12 = vld [vmem:[%s7328_s14 + $0x40] sm:$0xff] }
  0x13   : > { %341 = vst.msk [vmem:[#allocation2 + $0x30] sm:$0xff] %vm333_vm0, %v10488_v0  ;;  %v507_v9 = vld [vmem:[%s7328_s14 + $0xd0] sm:$0xff]  ;;  %v506_v11 = vld [vmem:[%s7328_s14 + $0xc8] sm:$0xff]  ;;  %v505_v14 = vld [vmem:[%s7328_s14 + $0xc0] sm:$0xff] }
  0x14   : > { %343 = vst.msk [vmem:[#allocation2 + $0x40] sm:$0xff] %vm333_vm0, %v10488_v0  ;;  %v488_v17 = vld [vmem:[%s7328_s14 + $0x38] sm:$0xff]  ;;  %v487_v23 = vld [vmem:[%s7328_s14 + $0x30] sm:$0xff]  ;;  %v486_v26 = vld [vmem:[%s7328_s14 + $0x28] sm:$0xff] }
  0x15   : > { %344 = vst.msk [vmem:[#allocation2 + $0x48] sm:$0xff] %vm333_vm0, %v10488_v0  ;;  %v504_v20 = vld [vmem:[%s7328_s14 + $0xb8] sm:$0xff]  ;;  %v503_v25 = vld [vmem:[%s7328_s14 + $0xb0] sm:$0xff]  ;;  %v502_v28 = vld [vmem:[%s7328_s14 + $0xa8] sm:$0xff] }
  0x16   : > { %345 = vst.msk [vmem:[#allocation2 + $0x50] sm:$0xff] %vm333_vm0, %v10488_v0  ;;  %v485_v31 = vld [vmem:[%s7328_s14 + $0x20] sm:$0xff]  ;;  %v484_v34 = vld [vmem:[%s7328_s14 + $0x18] sm:$0xff]  ;;  %v483_v39 = vld [vmem:[%s7328_s14 + $0x10] sm:$0xff] }
  0x17   : > { %347 = vst.msk [vmem:[#allocation2 + $0x60] sm:$0xff] %vm333_vm0, %v10488_v0  ;;  %v501_v33 = vld [vmem:[%s7328_s14 + $0xa0] sm:$0xff]  ;;  %v500_v36 = vld [vmem:[%s7328_s14 + $0x98] sm:$0xff]  ;;  %v499_v41 = vld [vmem:[%s7328_s14 + $0x90] sm:$0xff] }
  0x18   : > { %348 = vst.msk [vmem:[#allocation2 + $0x68] sm:$0xff] %vm333_vm0, %v10488_v0  ;;  %v482_v42 = vld [vmem:[%s7328_s14 + $0x8] sm:$0xff]  ;;  %v481_v47 = vld [vmem:[%s7328_s14] sm:$0xff]  ;;  %v496_v53 = vld [vmem:[%s7328_s14 + $0x78] sm:$0xff] }
  0x19   : > { %v7348_v2 = vld [vmem:[#allocation2 + $0xf0] sm:$0xff]  ;;  %349 = vst.msk [vmem:[#allocation2 + $0x70] sm:$0xff] %vm333_vm0, %v10488_v0  ;;  %v498_v44 = vld [vmem:[%s7328_s14 + $0x88] sm:$0xff]  ;;  %v497_v49 = vld [vmem:[%s7328_s14 + $0x80] sm:$0xff] }
  0x1a   : > { %6159 = vmatpush.xpose.msk.msra.mxu0 %vm333_vm0, %v7348_v2  ;;  %351 = vst.msk [vmem:[#allocation2 + $0x80] sm:$0xff] %vm333_vm0, %v10488_v0  ;;  %v495_v54 = vld [vmem:[%s7328_s14 + $0x70] sm:$0xff] }
  0x1b   : > { %352 = vst.msk [vmem:[#allocation2 + $0x88] sm:$0xff] %vm333_vm0, %v10488_v0 }
  0x1c   : > { %353 = vst.msk [vmem:[#allocation2 + $0x90] sm:$0xff] %vm333_vm0, %v10488_v0 }
  0x1d   : > { %355 = vst.msk [vmem:[#allocation2 + $0xa0] sm:$0xff] %vm333_vm0, %v10488_v0 }
  0x1e   : > { %356 = vst.msk [vmem:[#allocation2 + $0xa8] sm:$0xff] %vm333_vm0, %v10488_v0 }
  0x1f   : > { %357 = vst.msk [vmem:[#allocation2 + $0xb0] sm:$0xff] %vm333_vm0, %v10488_v0 }
  0x20   : > { %359 = vst.msk [vmem:[#allocation2 + $0xc0] sm:$0xff] %vm333_vm0, %v10488_v0 }
  0x21   : > { %360 = vst.msk [vmem:[#allocation2 + $0xc8] sm:$0xff] %vm333_vm0, %v10488_v0 }
  0x22   : > { %361 = vst.msk [vmem:[#allocation2 + $0xd0] sm:$0xff] %vm333_vm0, %v10488_v0 }
  0x23   : > { %363 = vst.msk [vmem:[#allocation2 + $0xe0] sm:$0xff] %vm333_vm0, %v10488_v0 }
  0x24   : > { %364 = vst.msk [vmem:[#allocation2 + $0xe8] sm:$0xff] %vm333_vm0, %v10488_v0 }
  0x25   : > { %367 = vst.msk [vmem:[#allocation2 + $0x100] sm:$0xff] %vm333_vm0, %v10488_v0 }
  0x26   : > { %368 = vst.msk [vmem:[#allocation2 + $0x108] sm:$0xff] %vm333_vm0, %v10488_v0 }
  0x27   : > { %369 = vst.msk [vmem:[#allocation2 + $0x110] sm:$0xff] %vm333_vm0, %v10488_v0 }
  0x28   : > { %371 = vst.msk [vmem:[#allocation2 + $0x120] sm:$0xff] %vm333_vm0, %v10488_v0 }
  0x29   : > { %372 = vst.msk [vmem:[#allocation2 + $0x128] sm:$0xff] %vm333_vm0, %v10488_v0 }
  0x2a   : > { %373 = vst.msk [vmem:[#allocation2 + $0x130] sm:$0xff] %vm333_vm0, %v10488_v0 }
  0x2b   : > { %375 = vst.msk [vmem:[#allocation2 + $0x140] sm:$0xff] %vm333_vm0, %v10488_v0 }
  0x2c   : > { %376 = vst.msk [vmem:[#allocation2 + $0x148] sm:$0xff] %vm333_vm0, %v10488_v0 }
  0x2d   : > { %377 = vst.msk [vmem:[#allocation2 + $0x150] sm:$0xff] %vm333_vm0, %v10488_v0 }
  0x2e   : > { %379 = vst.msk [vmem:[#allocation2 + $0x160] sm:$0xff] %vm333_vm0, %v10488_v0 }
  0x2f   : > { %380 = vst.msk [vmem:[#allocation2 + $0x168] sm:$0xff] %vm333_vm0, %v10488_v0 }
  0x30   : > { %381 = vst.msk [vmem:[#allocation2 + $0x170] sm:$0xff] %vm333_vm0, %v10488_v0 }
  0x31   : > { %383 = vst.msk [vmem:[#allocation2 + $0x180] sm:$0xff] %vm333_vm0, %v10488_v0 }
  0x32   : > { %384 = vst.msk [vmem:[#allocation2 + $0x188] sm:$0xff] %vm333_vm0, %v10488_v0 }
  0x33   : > { %385 = vst.msk [vmem:[#allocation2 + $0x190] sm:$0xff] %vm333_vm0, %v10488_v0 }
  0x34   : > { %387 = vst.msk [vmem:[#allocation2 + $0x1a0] sm:$0xff] %vm333_vm0, %v10488_v0 }
  0x35   : > { %388 = vst.msk [vmem:[#allocation2 + $0x1a8] sm:$0xff] %vm333_vm0, %v10488_v0 }
  0x36   : > { %389 = vst.msk [vmem:[#allocation2 + $0x1b0] sm:$0xff] %vm333_vm0, %v10488_v0 }
  0x37   : > { %391 = vst.msk [vmem:[#allocation2 + $0x1c0] sm:$0xff] %vm333_vm0, %v10488_v0 }
  0x38   : > { %392 = vst.msk [vmem:[#allocation2 + $0x1c8] sm:$0xff] %vm333_vm0, %v10488_v0 }
  0x39   : > { %393 = vst.msk [vmem:[#allocation2 + $0x1d0] sm:$0xff] %vm333_vm0, %v10488_v0 }
  0x3a   : > { %395 = vst.msk [vmem:[#allocation2 + $0x1e0] sm:$0xff] %vm333_vm0, %v10488_v0 }
  0x3b   : > { %396 = vst.msk [vmem:[#allocation2 + $0x1e8] sm:$0xff] %vm333_vm0, %v10488_v0 }
  0x3c   : > { %397 = vst.msk [vmem:[#allocation2 + $0x1f0] sm:$0xff] %vm333_vm0, %v10488_v0 }
  0x3d   : > { %399 = vst.msk [vmem:[#allocation2 + $0x200] sm:$0xff] %vm333_vm0, %v10488_v0 }
  0x3e   : > { %400 = vst.msk [vmem:[#allocation2 + $0x208] sm:$0xff] %vm333_vm0, %v10488_v0 }
  0x3f   : > { %401 = vst.msk [vmem:[#allocation2 + $0x210] sm:$0xff] %vm333_vm0, %v10488_v0 }
  0x40   : > { %403 = vst.msk [vmem:[#allocation2 + $0x220] sm:$0xff] %vm333_vm0, %v10488_v0 }
  0x41   : > { %404 = vst.msk [vmem:[#allocation2 + $0x228] sm:$0xff] %vm333_vm0, %v10488_v0 }
  0x42   : > { %405 = vst.msk [vmem:[#allocation2 + $0x230] sm:$0xff] %vm333_vm0, %v10488_v0 }
  0x43   : > { %543 = vst.msk [vmem:[#allocation2 + $0x1f0] sm:$0xff] %vm333_vm0, %v510_v3 }
  0x44   : > { %526 = vst.msk [vmem:[#allocation2 + $0xe8] sm:$0xff] %vm333_vm0, %v493_v4 }
  0x45   : > { %542 = vst.msk [vmem:[#allocation2 + $0x1e8] sm:$0xff] %vm333_vm0, %v509_v5 }
  0x46   : > { %525 = vst.msk [vmem:[#allocation2 + $0xd0] sm:$0xff] %vm333_vm0, %v492_v6 }
  0x47   : > { %541 = vst.msk [vmem:[#allocation2 + $0x1d0] sm:$0xff] %vm333_vm0, %v508_v7 }
  0x48   : > { %524 = vst.msk [vmem:[#allocation2 + $0xc8] sm:$0xff] %vm333_vm0, %v491_v8 }
  0x49   : > { %540 = vst.msk [vmem:[#allocation2 + $0x1c8] sm:$0xff] %vm333_vm0, %v507_v9 }
  0x4a   : > { %v7453_v13 = vld [vmem:[#allocation2 + $0x1f0] sm:$0xff]  ;;  %523 = vst.msk [vmem:[#allocation2 + $0xb0] sm:$0xff] %vm333_vm0, %v490_v10 }
  0x4b   : > { %6179 = vmatpush.xpose.msk.msra.mxu1 %vm333_vm0, %v7453_v13  ;;  %v7459_v15 = vld [vmem:[#allocation2 + $0xef] sm:$0xff]  ;;  %539 = vst.msk [vmem:[#allocation2 + $0x1b0] sm:$0xff] %vm333_vm0, %v506_v11  ;;  %v7477_v21 = vld [vmem:[#allocation2 + $0xe7] sm:$0xff] }
  0x4c   : > { %v7461_v16 = vld [vmem:[#allocation2 + $0xe8] sm:$0xff]  ;;  %6199 = vmatpush.xpose.msk.msra.mxu2 %vm333_vm0, %v7459_v15  ;;  %522 = vst.msk [vmem:[#allocation2 + $0xa8] sm:$0xff] %vm333_vm0, %v489_v12 }
  0x4d   : > { %v7467_v18 = vld [vmem:[#allocation2 + $0x1ef] sm:$0xff]  ;;  %6160 = vmatpush.xpose.msk.msra.mxu0 %vm333_vm0, %v7461_v16  ;;  %538 = vst.msk [vmem:[#allocation2 + $0x1a8] sm:$0xff] %vm333_vm0, %v505_v14  ;;  %v7483_v24 = vld [vmem:[#allocation2 + $0x1e7] sm:$0xff] }
  0x4e   : > { %v7471_v19 = vld [vmem:[#allocation2 + $0x1e8] sm:$0xff]  ;;  %6219 = vmatpush.xpose.msk.msra.mxu3 %vm333_vm0, %v7467_v18  ;;  %v7479_v22 = vld [vmem:[#allocation2 + $0xd0] sm:$0xff]  ;;  %521 = vst.msk [vmem:[#allocation2 + $0x90] sm:$0xff] %vm333_vm0, %v488_v17 }
  0x4f   : > { %6180 = vmatpush.xpose.msk.msra.mxu1 %vm333_vm0, %v7471_v19  ;;  %537 = vst.msk [vmem:[#allocation2 + $0x190] sm:$0xff] %vm333_vm0, %v504_v20  ;;  %v7495_v27 = vld [vmem:[#allocation2 + $0x1d0] sm:$0xff]  ;;  %v7503_v30 = vld [vmem:[#allocation2 + $0xc8] sm:$0xff]  ;;  %v512_v20 = vld [vmem:[%s7328_s14 + $0xf8] sm:$0xff] }
  0x50   : > { %6200 = vmatpush.xpose.msk.msra.mxu2 %vm333_vm0, %v7477_v21  ;;  %520 = vst.msk [vmem:[#allocation2 + $0x88] sm:$0xff] %vm333_vm0, %v487_v23  ;;  %v7501_v29 = vld [vmem:[#allocation2 + $0xcf] sm:$0xff]  ;;  %v7525_v37 = vld [vmem:[#allocation2 + $0xc7] sm:$0xff] }
  0x51   : > { %6161 = vmatpush.xpose.msk.msra.mxu0 %vm333_vm0, %v7479_v22  ;;  %536 = vst.msk [vmem:[#allocation2 + $0x188] sm:$0xff] %vm333_vm0, %v503_v25  ;;  %v7507_v32 = vld [vmem:[#allocation2 + $0x1cf] sm:$0xff]  ;;  %v7531_v40 = vld [vmem:[#allocation2 + $0x1c7] sm:$0xff] }
  0x52   : > { %6220 = vmatpush.xpose.msk.msra.mxu3 %vm333_vm0, %v7483_v24  ;;  %519 = vst.msk [vmem:[#allocation2 + $0x70] sm:$0xff] %vm333_vm0, %v486_v26  ;;  %v7519_v35 = vld [vmem:[#allocation2 + $0x1c8] sm:$0xff]  ;;  %v7527_v38 = vld [vmem:[#allocation2 + $0xb0] sm:$0xff] }
  0x53   : > { %6181 = vmatpush.xpose.msk.msra.mxu1 %vm333_vm0, %v7495_v27  ;;  %535 = vst.msk [vmem:[#allocation2 + $0x170] sm:$0xff] %vm333_vm0, %v502_v28  ;;  %v7543_v43 = vld [vmem:[#allocation2 + $0x1b0] sm:$0xff]  ;;  %v7551_v46 = vld [vmem:[#allocation2 + $0xa8] sm:$0xff] }
  0x54   : > { %6201 = vmatpush.xpose.msk.msra.mxu2 %vm333_vm0, %v7501_v29  ;;  %518 = vst.msk [vmem:[#allocation2 + $0x68] sm:$0xff] %vm333_vm0, %v485_v31  ;;  %v7549_v45 = vld [vmem:[#allocation2 + $0xaf] sm:$0xff]  ;;  %v7568_v51 = vld [vmem:[#allocation2 + $0xa7] sm:$0xff] }
  0x55   : > { %6162 = vmatpush.xpose.msk.msra.mxu0 %vm333_vm0, %v7503_v30  ;;  %534 = vst.msk [vmem:[#allocation2 + $0x168] sm:$0xff] %vm333_vm0, %v501_v33  ;;  %v7555_v48 = vld [vmem:[#allocation2 + $0x1af] sm:$0xff]  ;;  %v7578_v55 = vld [vmem:[#allocation2 + $0x1a7] sm:$0xff] }
  0x56   : > { %6221 = vmatpush.xpose.msk.msra.mxu3 %vm333_vm0, %v7507_v32  ;;  %517 = vst.msk [vmem:[#allocation2 + $0x50] sm:$0xff] %vm333_vm0, %v484_v34  ;;  %v7566_v50 = vld [vmem:[#allocation2 + $0x1a8] sm:$0xff]  ;;  %v7573_v52 = vld [vmem:[#allocation2 + $0x90] sm:$0xff] }
  0x57   : > { %6182 = vmatpush.xpose.msk.msra.mxu1 %vm333_vm0, %v7519_v35  ;;  %533 = vst.msk [vmem:[#allocation2 + $0x150] sm:$0xff] %vm333_vm0, %v500_v36  ;;  %v7588_v56 = vld [vmem:[#allocation2 + $0x190] sm:$0xff]  ;;  %v7594_v58 = vld [vmem:[#allocation2 + $0x88] sm:$0xff] }
  0x58   : > { %6202 = vmatpush.xpose.msk.msra.mxu2 %vm333_vm0, %v7525_v37  ;;  %516 = vst.msk [vmem:[#allocation2 + $0x48] sm:$0xff] %vm333_vm0, %v483_v39  ;;  %v7592_v57 = vld [vmem:[#allocation2 + $0x8f] sm:$0xff]  ;;  %v7614_v61 = vld [vmem:[#allocation2 + $0x87] sm:$0xff] }
  0x59   : > { %6163 = vmatpush.xpose.msk.msra.mxu0 %vm333_vm0, %v7527_v38  ;;  %532 = vst.msk [vmem:[#allocation2 + $0x148] sm:$0xff] %vm333_vm0, %v499_v41  ;;  %v7596_v59 = vld [vmem:[#allocation2 + $0x18f] sm:$0xff]  ;;  %v7620_v63 = vld [vmem:[#allocation2 + $0x187] sm:$0xff] }
  0x5a   : > { %6222 = vmatpush.xpose.msk.msra.mxu3 %vm333_vm0, %v7531_v40  ;;  %515 = vst.msk [vmem:[#allocation2 + $0x30] sm:$0xff] %vm333_vm0, %v482_v42  ;;  %v7608_v60 = vld [vmem:[#allocation2 + $0x188] sm:$0xff]  ;;  %v7616_v62 = vld [vmem:[#allocation2 + $0x70] sm:$0xff] }
  0x5b   : > { %6183 = vmatpush.xpose.msk.msra.mxu1 %vm333_vm0, %v7543_v43  ;;  %531 = vst.msk [vmem:[#allocation2 + $0x130] sm:$0xff] %vm333_vm0, %v498_v44  ;;  %v7632_v1 = vld [vmem:[#allocation2 + $0x170] sm:$0xff]  ;;  %v7640_v4 = vld [vmem:[#allocation2 + $0x68] sm:$0xff] }
  0x5c   : > { %6203 = vmatpush.xpose.msk.msra.mxu2 %vm333_vm0, %v7549_v45  ;;  %514 = vst.msk [vmem:[#allocation2 + $0x28] sm:$0xff] %vm333_vm0, %v481_v47  ;;  %v7638_v3 = vld [vmem:[#allocation2 + $0x6f] sm:$0xff]  ;;  %v7662_v7 = vld [vmem:[#allocation2 + $0x67] sm:$0xff] }
  0x5d   : > { %6164 = vmatpush.xpose.msk.msra.mxu0 %vm333_vm0, %v7551_v46  ;;  %530 = vst.msk [vmem:[#allocation2 + $0x128] sm:$0xff] %vm333_vm0, %v497_v49  ;;  %v7644_v5 = vld [vmem:[#allocation2 + $0x16f] sm:$0xff]  ;;  %v7668_v9 = vld [vmem:[#allocation2 + $0x167] sm:$0xff] }
  0x5e   : > { %6223 = vmatpush.xpose.msk.msra.mxu3 %vm333_vm0, %v7555_v48  ;;  %529 = vst.msk [vmem:[#allocation2 + $0x110] sm:$0xff] %vm333_vm0, %v496_v53  ;;  %v7656_v6 = vld [vmem:[#allocation2 + $0x168] sm:$0xff]  ;;  %v7664_v8 = vld [vmem:[#allocation2 + $0x50] sm:$0xff] }
  0x5f   : > { %6184 = vmatpush.xpose.msk.msra.mxu1 %vm333_vm0, %v7566_v50  ;;  %528 = vst.msk [vmem:[#allocation2 + $0x108] sm:$0xff] %vm333_vm0, %v495_v54  ;;  %v7680_v10 = vld [vmem:[#allocation2 + $0x150] sm:$0xff]  ;;  %v7688_v12 = vld [vmem:[#allocation2 + $0x48] sm:$0xff] }
  0x60   : > { %6204 = vmatpush.xpose.msk.msra.mxu2 %vm333_vm0, %v7568_v51  ;;  %366 = vst.msk [vmem:[#allocation2 + $0xf8] sm:$0x1] %vm337_vm1, %v10488_v0  ;;  %v7686_v11 = vld [vmem:[#allocation2 + $0x4f] sm:$0xff]  ;;  %v7711_v25 = vld [vmem:[#allocation2 + $0x47] sm:$0xff] }
  0x61   : > { %6165 = vmatpush.xpose.msk.msra.mxu0 %vm333_vm0, %v7573_v52  ;;  %338 = vst.msk [vmem:[#allocation2 + $0x18] sm:$0x1] %vm337_vm1, %v10488_v0  ;;  %v511_v14 = vld [vmem:[%s7328_s14 + $0xf0] sm:$0xff]  ;;  %v7706_v23 = vld [vmem:[#allocation2 + $0x148] sm:$0xff] }
  0x62   : > { %6224 = vmatpush.xpose.msk.msra.mxu3 %vm333_vm0, %v7578_v55  ;;  %342 = vst.msk [vmem:[#allocation2 + $0x38] sm:$0x1] %vm337_vm1, %v10488_v0  ;;  %v7693_v17 = vld [vmem:[#allocation2 + $0x14f] sm:$0xff]  ;;  %v7716_v28 = vld [vmem:[#allocation2 + $0x147] sm:$0xff] }
  0x63   : > { %6185 = vmatpush.xpose.msk.msra.mxu1 %vm333_vm0, %v7588_v56  ;;  %346 = vst.msk [vmem:[#allocation2 + $0x58] sm:$0x1] %vm337_vm1, %v10488_v0  ;;  %v7713_v26 = vld [vmem:[#allocation2 + $0x30] sm:$0xff]  ;;  %v7730_v34 = vld [vmem:[#allocation2 + $0x28] sm:$0xff] }
  0x64   : > { %6205 = vmatpush.xpose.msk.msra.mxu2 %vm333_vm0, %v7592_v57  ;;  %350 = vst.msk [vmem:[#allocation2 + $0x78] sm:$0x1] %vm337_vm1, %v10488_v0  ;;  %v7724_v31 = vld [vmem:[#allocation2 + $0x130] sm:$0xff]  ;;  %v7740_v39 = vld [vmem:[#allocation2 + $0x128] sm:$0xff] }
  0x65   : > { %6166 = vmatpush.xpose.msk.msra.mxu0 %vm333_vm0, %v7594_v58  ;;  %354 = vst.msk [vmem:[#allocation2 + $0x98] sm:$0x1] %vm337_vm1, %v10488_v0  ;;  %v7728_v33 = vld [vmem:[#allocation2 + $0x2f] sm:$0xff]  ;;  %v7744_v41 = vld [vmem:[#allocation2 + $0x27] sm:$0xff] }
  0x66   : > { %6225 = vmatpush.xpose.msk.msra.mxu3 %vm333_vm0, %v7596_v59  ;;  %358 = vst.msk [vmem:[#allocation2 + $0xb8] sm:$0x1] %vm337_vm1, %v10488_v0  ;;  %v7732_v36 = vld [vmem:[#allocation2 + $0x12f] sm:$0xff]  ;;  %v7746_v44 = vld [vmem:[#allocation2 + $0x127] sm:$0xff] }
  0x67   : > { %6186 = vmatpush.xpose.msk.msra.mxu1 %vm333_vm0, %v7608_v60  ;;  %362 = vst.msk [vmem:[#allocation2 + $0xd8] sm:$0x1] %vm337_vm1, %v10488_v0  ;;  %v583_v42 = vld [vmem:[#allocation2 + $0x10] sm:$0xff]  ;;  %v582_v53 = vld [vmem:[#allocation2 + $0x8] sm:$0xff] }
  0x68   : > { %6206 = vmatpush.xpose.msk.msra.mxu2 %vm333_vm0, %v7614_v61  ;;  %370 = vst.msk [vmem:[#allocation2 + $0x118] sm:$0x1] %vm337_vm1, %v10488_v0  ;;  %v7753_v47 = vld [vmem:[#allocation2 + $0x110] sm:$0xff] }
  0x69   : > { %6167 = vmatpush.xpose.msk.msra.mxu0 %vm333_vm0, %v7616_v62  ;;  %374 = vst.msk [vmem:[#allocation2 + $0x138] sm:$0x1] %vm337_vm1, %v10488_v0  ;;  %v547_v49 = vld [vmem:[#allocation2 + $0xf] sm:$0xff] }
  0x6a   : > { %6226 = vmatpush.xpose.msk.msra.mxu3 %vm333_vm0, %v7620_v63  ;;  %378 = vst.msk [vmem:[#allocation2 + $0x158] sm:$0x1] %vm337_vm1, %v10488_v0  ;;  %v7757_v54 = vld [vmem:[#allocation2 + $0x10f] sm:$0xff] }
  0x6b   : > { %6187 = vmatpush.xpose.msk.msra.mxu1 %vm333_vm0, %v7632_v1  ;;  %382 = vst.msk [vmem:[#allocation2 + $0x178] sm:$0x1] %vm337_vm1, %v10488_v0 }
  0x6c   : > { %6207 = vmatpush.xpose.msk.msra.mxu2 %vm333_vm0, %v7638_v3  ;;  %386 = vst.msk [vmem:[#allocation2 + $0x198] sm:$0x1] %vm337_vm1, %v10488_v0 }
  0x6d   : > { %6168 = vmatpush.xpose.msk.msra.mxu0 %vm333_vm0, %v7640_v4  ;;  %390 = vst.msk [vmem:[#allocation2 + $0x1b8] sm:$0x1] %vm337_vm1, %v10488_v0 }
  0x6e   : > { %6227 = vmatpush.xpose.msk.msra.mxu3 %vm333_vm0, %v7644_v5  ;;  %394 = vst.msk [vmem:[#allocation2 + $0x1d8] sm:$0x1] %vm337_vm1, %v10488_v0 }
  0x6f   : > { %6188 = vmatpush.xpose.msk.msra.mxu1 %vm333_vm0, %v7656_v6  ;;  %398 = vst.msk [vmem:[#allocation2 + $0x1f8] sm:$0x1] %vm337_vm1, %v10488_v0 }
  0x70   : > { %6208 = vmatpush.xpose.msk.msra.mxu2 %vm333_vm0, %v7662_v7  ;;  %402 = vst.msk [vmem:[#allocation2 + $0x218] sm:$0x1] %vm337_vm1, %v10488_v0 }
  0x71   : > { %6169 = vmatpush.xpose.msk.msra.mxu0 %vm333_vm0, %v7664_v8  ;;  %406 = vst.msk [vmem:[#allocation2 + $0x238] sm:$0x1] %vm337_vm1, %v10488_v0 }
  0x72   : > { %6228 = vmatpush.xpose.msk.msra.mxu3 %vm333_vm0, %v7668_v9  ;;  %10585 = vst [vmem:[#allocation4_spill] sm:$0xff] %v7706_v23 }
  0x73   : > { %6189 = vmatpush.xpose.msk.msra.mxu1 %vm333_vm0, %v7680_v10  ;;  %544 = vst.msk [vmem:[#allocation2 + $0x208] sm:$0xff] %vm333_vm0, %v511_v14  ;;  %v7759_v14 = vld [vmem:[#allocation2 + $0xf1] sm:$0xff] }
  0x74   : > { %6209 = vmatpush.xpose.msk.msra.mxu2 %vm333_vm0, %v7686_v11  ;;  %10586 = vst [vmem:[#allocation5_spill] sm:$0xff] %v7713_v26 }
  0x75   : > { %6170 = vmatpush.xpose.msk.msra.mxu0 %vm333_vm0, %v7688_v12  ;;  %545 = vst.msk [vmem:[#allocation2 + $0x210] sm:$0xff] %vm333_vm0, %v512_v20  ;;  %v7765_v20 = vld [vmem:[#allocation2 + $0x108] sm:$0xff] }
  0x76   : > { %6229 = vmatpush.xpose.msk.msra.mxu3 %vm333_vm0, %v7693_v17  ;;  %10587 = vst [vmem:[#allocation6_spill] sm:$0xff] %v7724_v31  ;;  %v7771_v0 = vld [vmem:[#allocation2 + $0x1f1] sm:$0xff] }
  0x77   : > { %6190 = vmatpush.xpose.msk.msra.mxu1 %vm333_vm0, %v7706_v23  ;;  %10588 = vst [vmem:[#allocation7_spill] sm:$0xff] %v7730_v34  ;;  %v7803_v23 = vld [vmem:[#allocation2 + $0xd1] sm:$0xff] }
  0x78   : > { %6210 = vmatpush.xpose.msk.msra.mxu2 %vm333_vm0, %v7711_v25  ;;  %10589 = vst [vmem:[#allocation8_spill] sm:$0xff] %v7740_v39 }
  0x79   : > { %6171 = vmatpush.xpose.msk.msra.mxu0 %vm333_vm0, %v7713_v26  ;;  %10590 = vst [vmem:[#allocation9_spill] sm:$0xff] %v7757_v54  ;;  %v7795_v26 = vld [vmem:[#allocation2 + $0x1e9] sm:$0xff] }
  0x7a   : > { %6230 = vmatpush.xpose.msk.msra.mxu3 %vm333_vm0, %v7716_v28 }
  0x7b   : > { %6191 = vmatpush.xpose.msk.msra.mxu1 %vm333_vm0, %v7724_v31  ;;  %v578_v31 = vld [vmem:[%s10479_s1] sm:$0xff] }
  0x7c   : > { %6211 = vmatpush.xpose.msk.msra.mxu2 %vm333_vm0, %v7728_v33 }
  0x7d   : > { %6172 = vmatpush.xpose.msk.msra.mxu0 %vm333_vm0, %v7730_v34  ;;  %v6155_v34 = vld [vmem:[%s10479_s1 + $0x20] sm:$0xff] }
  0x7e   : > { %6231 = vmatpush.xpose.msk.msra.mxu3 %vm333_vm0, %v7732_v36 }
  0x7f   : > { %6192 = vmatpush.xpose.msk.msra.mxu1 %vm333_vm0, %v7740_v39  ;;  %v7773_v39 = vld [vmem:[#allocation2 + $0x107] sm:$0xff] }
  0x80   : > { %6212 = vmatpush.xpose.msk.msra.mxu2 %vm333_vm0, %v7744_v41  ;;  %10591 = vst [vmem:[#allocation10_spill] sm:$0xff] %v7773_v39 }
  0x81   : > { %6173 = vmatpush.xpose.msk.msra.mxu0 %vm333_vm0, %v583_v42  ;;  %v546_v42 = vld [vmem:[#allocation2 + $0x7] sm:$0xff] }
  0x82   : > { %6232 = vmatpush.xpose.msk.msra.mxu3 %vm333_vm0, %v7746_v44 }
  0x83   : > { %6193 = vmatpush.xpose.msk.msra.mxu1 %vm333_vm0, %v7753_v47 }
  0x84   : > { %6213 = vmatpush.xpose.msk.msra.mxu2 %vm333_vm0, %v547_v49  ;;  %v7780_v49 = vld [vmem:[#allocation2 + $0x20f] sm:$0xff] }
  0x85   : > { %6174 = vmatpush.xpose.msk.msra.mxu0 %vm333_vm0, %v582_v53  ;;  %10592 = vst [vmem:[#allocation11_spill] sm:$0xff] %v7780_v49  ;;  %v7782_v53 = vld [vmem:[#allocation2 + $0xe9] sm:$0xff] }
  0x86   : > { %6233 = vmatpush.xpose.msk.msra.mxu3 %vm333_vm0, %v7757_v54 }
  0x87   : > { %6194 = vmatpush.xpose.msk.msra.mxu1 %vm333_vm0, %v7765_v20 }
  0x88   : > { %6175 = vmatmul.msk.f32.vlgmr.msra.gmra.mxu0 %vm333_vm0, %v6155_v34  ;;  %6214 = vmatpush.xpose.msk.msra.mxu2 %vm333_vm0, %v546_v42  ;;  %v7801_v42 = vld [vmem:[#allocation2 + $0x207] sm:$0xff] }
  0x89   : > { %6243 = vmatpush.xpose.msk.msrb.mxu0 %vm333_vm0, %v7759_v14  ;;  %10593 = vst [vmem:[#allocation12_spill] sm:$0xff] %v7801_v42 }
  0x8a   : > { %6234 = vmatpush.xpose.msk.msra.mxu3 %vm333_vm0, %v7773_v39  ;;  %6195 = vmatmul.msk.f32.vlgmr.msra.gmra.mxu1 %vm333_vm0, %v6155_v34  ;;  %v6156_v34 = vld [vmem:[%s10479_s1 + $0x28] sm:$0xff] }
  0x8b   : > { %6263 = vmatpush.xpose.msk.msrb.mxu1 %vm333_vm0, %v7771_v0  ;;  %6215 = vmatmul.msk.f32.vlgmr.msra.gmra.mxu2 %vm333_vm0, %v578_v31 }
  0x8c   : > { %6287 = vmatpush.xpose.msk.msrb.mxu2 %vm333_vm0, %v7757_v54  ;;  %v7821_v54 = vld [vmem:[#allocation2 + $0xc9] sm:$0xff] }
  0x8d   : > { %6244 = vmatpush.xpose.msk.msrb.mxu0 %vm333_vm0, %v7782_v53  ;;  %6235 = vmatmul.msk.f32.vlgmr.msra.gmra.mxu3 %vm333_vm0, %v578_v31  ;;  %v579_v31 = vld [vmem:[%s10479_s1 + $0x8] sm:$0xff] }
  0x8e   : > { %6307 = vmatpush.xpose.msk.msrb.mxu3 %vm333_vm0, %v7780_v49  ;;  %v7812_v49 = vld [vmem:[#allocation2 + $0x1d1] sm:$0xff] }
  0x8f   : > { %6264 = vmatpush.xpose.msk.msrb.mxu1 %vm333_vm0, %v7795_v26 }
  0x90   : > { %6288 = vmatpush.xpose.msk.msrb.mxu2 %vm333_vm0, %v7773_v39  ;;  %6176 = vmatmul.msk.f32.gmra.mxu0 %vm333_vm0, %v6156_v34  ;;  %v7837_v39 = vld [vmem:[#allocation2 + $0xb1] sm:$0xff] }
  0x91   : > { %6245 = vmatpush.xpose.msk.msrb.mxu0 %vm333_vm0, %v7803_v23 }
  0x92   : > { %6308 = vmatpush.xpose.msk.msrb.mxu3 %vm333_vm0, %v7801_v42  ;;  %v7831_v42 = vld [vmem:[#allocation2 + $0x1c9] sm:$0xff]  ;;  %6196 = vmatmul.msk.f32.gmra.mxu1 %vm333_vm0, %v6156_v34 }
  0x93   : > { %6265 = vmatpush.xpose.msk.msrb.mxu1 %vm333_vm0, %v7812_v49  ;;  %6216 = vmatmul.msk.f32.gmra.mxu2 %vm333_vm0, %v579_v31  ;;  %v7855_v34 = vld [vmem:[#allocation2 + $0xa9] sm:$0xff] }
  0x94   : > { %6289 = vmatpush.xpose.msk.msrb.mxu2 %vm333_vm0, %v7459_v15  ;;  %v7846_v15 = vld [vmem:[#allocation2 + $0x1b1] sm:$0xff] }
  0x95   : > { %6246 = vmatpush.xpose.msk.msrb.mxu0 %vm333_vm0, %v7821_v54  ;;  %6236 = vmatmul.msk.f32.gmra.mxu3 %vm333_vm0, %v579_v31  ;;  %v7871_v31 = vld [vmem:[#allocation2 + $0x91] sm:$0xff] }
  0x96   : > { %6309 = vmatpush.xpose.msk.msrb.mxu3 %vm333_vm0, %v7467_v18  ;;  %v6157_v18 = vld [vmem:[%s10479_s1 + $0x30] sm:$0xff] }
  0x97   : > { %6266 = vmatpush.xpose.msk.msrb.mxu1 %vm333_vm0, %v7831_v42 }
  0x98   : > { %6290 = vmatpush.xpose.msk.msrb.mxu2 %vm333_vm0, %v7477_v21  ;;  %6177 = vmatmul.msk.f32.gmra.mxu0 %vm333_vm0, %v6157_v18  ;;  %v580_v21 = vld [vmem:[%s10479_s1 + $0x10] sm:$0xff] }
  0x99   : > { %6247 = vmatpush.xpose.msk.msrb.mxu0 %vm333_vm0, %v7837_v39 }
  0x9a   : > { %6310 = vmatpush.xpose.msk.msrb.mxu3 %vm333_vm0, %v7483_v24  ;;  %v7865_v24 = vld [vmem:[#allocation2 + $0x1a9] sm:$0xff]  ;;  %6197 = vmatmul.msk.f32.gmra.mxu1 %vm333_vm0, %v6157_v18 }
  0x9b   : > { %6267 = vmatpush.xpose.msk.msrb.mxu1 %vm333_vm0, %v7846_v15  ;;  %6217 = vmatmul.msk.f32.gmra.mxu2 %vm333_vm0, %v580_v21  ;;  %v7889_v18 = vld [vmem:[#allocation2 + $0x89] sm:$0xff] }
  0x9c   : > { %6291 = vmatpush.xpose.msk.msrb.mxu2 %vm333_vm0, %v7501_v29  ;;  %v7880_v29 = vld [vmem:[#allocation2 + $0x191] sm:$0xff] }
  0x9d   : > { %6248 = vmatpush.xpose.msk.msrb.mxu0 %vm333_vm0, %v7855_v34  ;;  %6237 = vmatmul.msk.f32.gmra.mxu3 %vm333_vm0, %v580_v21  ;;  %v7905_v21 = vld [vmem:[#allocation2 + $0x71] sm:$0xff] }
  0x9e   : > { %6311 = vmatpush.xpose.msk.msrb.mxu3 %vm333_vm0, %v7507_v32  ;;  %v6158_v32 = vld [vmem:[%s10479_s1 + $0x38] sm:$0xff] }
  0x9f   : > { %6268 = vmatpush.xpose.msk.msrb.mxu1 %vm333_vm0, %v7865_v24 }
  0xa0   : > { %6292 = vmatpush.xpose.msk.msrb.mxu2 %vm333_vm0, %v7525_v37  ;;  %6178 = vmatmul.msk.f32.gmra.mxu0 %vm333_vm0, %v6158_v32  ;;  %v581_v37 = vld [vmem:[%s10479_s1 + $0x18] sm:$0xff] }
  0xa1   : > { %6249 = vmatpush.xpose.msk.msrb.mxu0 %vm333_vm0, %v7871_v31 }
  0xa2   : > { %6312 = vmatpush.xpose.msk.msrb.mxu3 %vm333_vm0, %v7531_v40  ;;  %v7899_v40 = vld [vmem:[#allocation2 + $0x189] sm:$0xff]  ;;  %6198 = vmatmul.msk.f32.gmra.mxu1 %vm333_vm0, %v6158_v32 }
  0xa3   : > { %6269 = vmatpush.xpose.msk.msrb.mxu1 %vm333_vm0, %v7880_v29  ;;  %6218 = vmatmul.msk.f32.gmra.mxu2 %vm333_vm0, %v581_v37  ;;  %v7926_v32 = vld [vmem:[#allocation2 + $0x169] sm:$0xff] }
  0xa4   : > { %6293 = vmatpush.xpose.msk.msrb.mxu2 %vm333_vm0, %v7549_v45  ;;  %v7914_v45 = vld [vmem:[#allocation2 + $0x171] sm:$0xff] }
  0xa5   : > { %6250 = vmatpush.xpose.msk.msrb.mxu0 %vm333_vm0, %v7889_v18  ;;  %6238 = vmatmul.msk.f32.gmra.mxu3 %vm333_vm0, %v581_v37  ;;  %v6283_v37 = vld [vmem:[%s10479_s1 + $0x60] sm:$0xff] }
  0xa6   : > { %6313 = vmatpush.xpose.msk.msrb.mxu3 %vm333_vm0, %v7555_v48  ;;  %v7920_v48 = vld [vmem:[#allocation2 + $0x69] sm:$0xff] }
  0xa7   : > { %6270 = vmatpush.xpose.msk.msrb.mxu1 %vm333_vm0, %v7899_v40 }
  0xa8   : > { %6294 = vmatpush.xpose.msk.msrb.mxu2 %vm333_vm0, %v7568_v51  ;;  %v7932_v51 = vld [vmem:[#allocation2 + $0x51] sm:$0xff] }
  0xa9   : > { %6251 = vmatpush.xpose.msk.msrb.mxu0 %vm333_vm0, %v7905_v21 }
  0xaa   : > { %6314 = vmatpush.xpose.msk.msrb.mxu3 %vm333_vm0, %v7578_v55  ;;  %v7938_v55 = vld [vmem:[#allocation2 + $0x151] sm:$0xff] }
  0xab   : > { %6271 = vmatpush.xpose.msk.msrb.mxu1 %vm333_vm0, %v7914_v45 }
  0xac   : > { %6295 = vmatpush.xpose.msk.msrb.mxu2 %vm333_vm0, %v7592_v57  ;;  %v7944_v57 = vld [vmem:[#allocation2 + $0x49] sm:$0xff] }
  0xad   : > { %6252 = vmatpush.xpose.msk.msrb.mxu0 %vm333_vm0, %v7920_v48 }
  0xae   : > { %6315 = vmatpush.xpose.msk.msrb.mxu3 %vm333_vm0, %v7596_v59  ;;  %v7950_v59 = vld [vmem:[#allocation2 + $0x149] sm:$0xff] }
  0xaf   : > { %6272 = vmatpush.xpose.msk.msrb.mxu1 %vm333_vm0, %v7926_v32 }
  0xb0   : > { %6296 = vmatpush.xpose.msk.msrb.mxu2 %vm333_vm0, %v7614_v61  ;;  %v7956_v61 = vld [vmem:[#allocation2 + $0x31] sm:$0xff] }
  0xb1   : > { %6253 = vmatpush.xpose.msk.msrb.mxu0 %vm333_vm0, %v7932_v51 }
  0xb2   : > { %6316 = vmatpush.xpose.msk.msrb.mxu3 %vm333_vm0, %v7620_v63  ;;  %v7962_v63 = vld [vmem:[#allocation2 + $0x131] sm:$0xff] }
  0xb3   : > { %6273 = vmatpush.xpose.msk.msrb.mxu1 %vm333_vm0, %v7938_v55 }
  0xb4   : > { %6297 = vmatpush.xpose.msk.msrb.mxu2 %vm333_vm0, %v7638_v3  ;;  %v7968_v3 = vld [vmem:[#allocation2 + $0x29] sm:$0xff] }
  0xb5   : > { %6254 = vmatpush.xpose.msk.msrb.mxu0 %vm333_vm0, %v7944_v57 }
  0xb6   : > { %6317 = vmatpush.xpose.msk.msrb.mxu3 %vm333_vm0, %v7644_v5  ;;  %v7974_v5 = vld [vmem:[#allocation2 + $0x129] sm:$0xff] }
  0xb7   : > { %6274 = vmatpush.xpose.msk.msrb.mxu1 %vm333_vm0, %v7950_v59 }
  0xb8   : > { %6298 = vmatpush.xpose.msk.msrb.mxu2 %vm333_vm0, %v7662_v7  ;;  %v952_v7 = vld [vmem:[#allocation2 + $0x11] sm:$0xff] }
  0xb9   : > { %6255 = vmatpush.xpose.msk.msrb.mxu0 %vm333_vm0, %v7956_v61 }
  0xba   : > { %6318 = vmatpush.xpose.msk.msrb.mxu3 %vm333_vm0, %v7668_v9  ;;  %v7984_v9 = vld [vmem:[#allocation2 + $0x111] sm:$0xff] }
  0xbb   : > { %6275 = vmatpush.xpose.msk.msrb.mxu1 %vm333_vm0, %v7962_v63 }
  0xbc   : > { %6299 = vmatpush.xpose.msk.msrb.mxu2 %vm333_vm0, %v7686_v11  ;;  %v951_v11 = vld [vmem:[#allocation2 + $0x9] sm:$0xff] }
  0xbd   : > { %6256 = vmatpush.xpose.msk.msrb.mxu0 %vm333_vm0, %v7968_v3 }
  0xbe   : > { %6319 = vmatpush.xpose.msk.msrb.mxu3 %vm333_vm0, %v7693_v17  ;;  %v7993_v17 = vld [vmem:[#allocation2 + $0x109] sm:$0xff] }
  0xbf   : > { %6276 = vmatpush.xpose.msk.msrb.mxu1 %vm333_vm0, %v7974_v5 }
  0xc0   : > { %6300 = vmatpush.xpose.msk.msrb.mxu2 %vm333_vm0, %v7711_v25  ;;  %v7998_v25 = vld [vmem:[#allocation2 + $0x210] sm:$0xff] }
  0xc1   : > { %6257 = vmatpush.xpose.msk.msrb.mxu0 %vm333_vm0, %v952_v7  ;;  %v8023_v7 = vld [vmem:[#allocation2 + $0x208] sm:$0xff] }
  0xc2   : > { %6320 = vmatpush.xpose.msk.msrb.mxu3 %vm333_vm0, %v7716_v28  ;;  %v8004_v28 = vld [vmem:[#allocation2 + $0x211] sm:$0xff] }
  0xc3   : > { %6277 = vmatpush.xpose.msk.msrb.mxu1 %vm333_vm0, %v7984_v9 }
  0xc4   : > { %6301 = vmatpush.xpose.msk.msrb.mxu2 %vm333_vm0, %v7728_v33  ;;  %v6239_v33 = vld [vmem:[%s10479_s1 + $0x40] sm:$0xff] }
  0xc5   : > { %6258 = vmatpush.xpose.msk.msrb.mxu0 %vm333_vm0, %v951_v11  ;;  %v6240_v11 = vld [vmem:[%s10479_s1 + $0x48] sm:$0xff] }
  0xc6   : > { %6321 = vmatpush.xpose.msk.msrb.mxu3 %vm333_vm0, %v7732_v36 }
  0xc7   : > { %6278 = vmatpush.xpose.msk.msrb.mxu1 %vm333_vm0, %v7993_v17 }
  0xc8   : > { %6302 = vmatpush.xpose.msk.msrb.mxu2 %vm333_vm0, %v7744_v41  ;;  %6259 = vmatmul.msk.f32.vlgmr.msrb.gmra.mxu0 %vm333_vm0, %v6239_v33  ;;  %v8027_v41 = vld [vmem:[#allocation2 + $0x209] sm:$0xff] }
  0xc9   : > { %6331 = vmatpush.xpose.msk.msra.mxu0 %vm333_vm0, %v7753_v47 }
  0xca   : > { %6322 = vmatpush.xpose.msk.msrb.mxu3 %vm333_vm0, %v7746_v44  ;;  %6279 = vmatmul.msk.f32.vlgmr.msrb.gmra.mxu1 %vm333_vm0, %v6239_v33  ;;  %v6284_v33 = vld [vmem:[%s10479_s1 + $0x68] sm:$0xff] }
  0xcb   : > { %6351 = vmatpush.xpose.msk.msra.mxu1 %vm333_vm0, %v7998_v25  ;;  %6303 = vmatmul.msk.f32.vlgmr.msrb.gmra.mxu2 %vm333_vm0, %v6283_v37 }
  0xcc   : > { %6375 = vmatpush.xpose.msk.msra.mxu2 %vm333_vm0, %v7984_v9 }
  0xcd   : > { %6323 = vmatmul.msk.f32.vlgmr.msrb.gmra.mxu3 %vm333_vm0, %v6283_v37  ;;  %6332 = vmatpush.xpose.msk.msra.mxu0 %vm333_vm0, %v7765_v20  ;;  %v1820_v37 = vld [vmem:[#allocation2 + $0x1c7] sm:$0xff] }
  0xce   : > { %6395 = vmatpush.xpose.msk.msra.mxu3 %vm333_vm0, %v8004_v28 }
  0xcf   : > { %6352 = vmatpush.xpose.msk.msra.mxu1 %vm333_vm0, %v8023_v7 }
  0xd0   : > { %6376 = vmatpush.xpose.msk.msra.mxu2 %vm333_vm0, %v7993_v17  ;;  %6260 = vmatmul.msk.f32.gmra.mxu0 %vm333_vm0, %v6240_v11 }
  0xd1   : > { %6333 = vmatpush.xpose.msk.msra.mxu0 %vm333_vm0, %v7348_v2  ;;  %v6285_v2 = vld [vmem:[%s10479_s1 + $0x70] sm:$0xff] }
  0xd2   : > { %6396 = vmatpush.xpose.msk.msra.mxu3 %vm333_vm0, %v8027_v41  ;;  %6280 = vmatmul.msk.f32.gmra.mxu1 %vm333_vm0, %v6240_v11  ;;  %v2031_v11 = vld [vmem:[#allocation2 + $0x1c8] sm:$0xff] }
  0xd3   : > { %6353 = vmatpush.xpose.msk.msra.mxu1 %vm333_vm0, %v7453_v13  ;;  %6304 = vmatmul.msk.f32.gmra.mxu2 %vm333_vm0, %v6284_v33  ;;  %v6242_v13 = vld [vmem:[%s10479_s1 + $0x58] sm:$0xff] }
  0xd4   : > { %6377 = vmatpush.xpose.msk.msra.mxu2 %vm333_vm0, %v7759_v14  ;;  %v2033_v14 = vld [vmem:[#allocation2 + $0x1e8] sm:$0xff] }
  0xd5   : > { %6334 = vmatpush.xpose.msk.msra.mxu0 %vm333_vm0, %v7461_v16  ;;  %6324 = vmatmul.msk.f32.gmra.mxu3 %vm333_vm0, %v6284_v33  ;;  %v6286_v16 = vld [vmem:[%s10479_s1 + $0x78] sm:$0xff]  ;;  %v1803_v33 = vld [vmem:[#allocation2 + $0xaf] sm:$0xff] }
  0xd6   : > { %6397 = vmatpush.xpose.msk.msra.mxu3 %vm333_vm0, %v7771_v0  ;;  %v6241_v0 = vld [vmem:[%s10479_s1 + $0x50] sm:$0xff] }
  0xd7   : > { %6354 = vmatpush.xpose.msk.msra.mxu1 %vm333_vm0, %v7471_v19  ;;  %v10594_v19 = vld [vmem:[#allocation4_spill] sm:$0xff] }
  0xd8   : > { %6378 = vmatpush.xpose.msk.msra.mxu2 %vm333_vm0, %v7782_v53  ;;  %6261 = vmatmul.msk.f32.gmra.mxu0 %vm333_vm0, %v6241_v0  ;;  %v2016_v53 = vld [vmem:[#allocation2 + $0xd0] sm:$0xff] }
  0xd9   : > { %6335 = vmatpush.xpose.msk.msra.mxu0 %vm333_vm0, %v7479_v22  ;;  %v10595_v22 = vld [vmem:[#allocation5_spill] sm:$0xff] }
  0xda   : > { %6398 = vmatpush.xpose.msk.msra.mxu3 %vm333_vm0, %v7795_v26  ;;  %6281 = vmatmul.msk.f32.gmra.mxu1 %vm333_vm0, %v6241_v0  ;;  %v6329_v26 = vld [vmem:[%s10479_s1 + $0x90] sm:$0xff] }
  0xdb   : > { %6355 = vmatpush.xpose.msk.msra.mxu1 %vm333_vm0, %v7495_v27  ;;  %6305 = vmatmul.msk.f32.gmra.mxu2 %vm333_vm0, %v6285_v2  ;;  %v10596_v27 = vld [vmem:[#allocation6_spill] sm:$0xff] }
  0xdc   : > { %6379 = vmatpush.xpose.msk.msra.mxu2 %vm333_vm0, %v7803_v23  ;;  %v2034_v23 = vld [vmem:[#allocation2 + $0x1f0] sm:$0xff] }
  0xdd   : > { %6336 = vmatpush.xpose.msk.msra.mxu0 %vm333_vm0, %v7503_v30  ;;  %6325 = vmatmul.msk.f32.gmra.mxu3 %vm333_vm0, %v6285_v2  ;;  %v10597_v30 = vld [vmem:[#allocation7_spill] sm:$0xff]  ;;  %v1819_v0 = vld [vmem:[#allocation2 + $0x1af] sm:$0xff] }
  0xde   : > { %6399 = vmatpush.xpose.msk.msra.mxu3 %vm333_vm0, %v7812_v49  ;;  %v1821_v49 = vld [vmem:[#allocation2 + $0x1cf] sm:$0xff] }
  0xdf   : > { %6356 = vmatpush.xpose.msk.msra.mxu1 %vm333_vm0, %v7519_v35  ;;  %v1827_v35 = vld [vmem:[#allocation2 + $0x22f] sm:$0xff] }
  0xe0   : > { %6380 = vmatpush.xpose.msk.msra.mxu2 %vm333_vm0, %v7821_v54  ;;  %6262 = vmatmul.msk.f32.gmra.mxu0 %vm333_vm0, %v6242_v13  ;;  %v2017_v54 = vld [vmem:[#allocation2 + $0xe8] sm:$0xff]  ;;  %v2014_v2 = vld [vmem:[#allocation2 + $0xb0] sm:$0xff] }
  0xe1   : > { %6337 = vmatpush.xpose.msk.msra.mxu0 %vm333_vm0, %v7527_v38  ;;  %v10598_v38 = vld [vmem:[#allocation8_spill] sm:$0xff] }
  0xe2   : > { %6400 = vmatpush.xpose.msk.msra.mxu3 %vm333_vm0, %v7831_v42  ;;  %6282 = vmatmul.msk.f32.gmra.mxu1 %vm333_vm0, %v6242_v13  ;;  %v2032_v42 = vld [vmem:[#allocation2 + $0x1d0] sm:$0xff] }
  0xe3   : > { %6357 = vmatpush.xpose.msk.msra.mxu1 %vm333_vm0, %v7543_v43  ;;  %6306 = vmatmul.msk.f32.gmra.mxu2 %vm333_vm0, %v6286_v16  ;;  %v2038_v43 = vld [vmem:[#allocation2 + $0x230] sm:$0xff] }
  0xe4   : > { %6381 = vmatpush.xpose.msk.msra.mxu2 %vm333_vm0, %v7837_v39  ;;  %v2030_v13 = vld [vmem:[#allocation2 + $0x1b0] sm:$0xff] }
  0xe5   : > { %6338 = vmatpush.xpose.msk.msra.mxu0 %vm333_vm0, %v7551_v46  ;;  %6326 = vmatmul.msk.f32.gmra.mxu3 %vm333_vm0, %v6286_v16  ;;  %v6327_v46 = vld [vmem:[%s10479_s1 + $0x80] sm:$0xff] }
  0xe6   : > { %6401 = vmatpush.xpose.msk.msra.mxu3 %vm333_vm0, %v7846_v15  ;;  %v1802_v16 = vld [vmem:[#allocation2 + $0xa7] sm:$0xff] }
  0xe7   : > { %6358 = vmatpush.xpose.msk.msra.mxu1 %vm333_vm0, %v7566_v50  ;;  %v6371_v50 = vld [vmem:[%s10479_s1 + $0xa0] sm:$0xff] }
  0xe8   : > { %6382 = vmatpush.xpose.msk.msra.mxu2 %vm333_vm0, %v7855_v34 }
  0xe9   : > { %6339 = vmatpush.xpose.msk.msra.mxu0 %vm333_vm0, %v7573_v52  ;;  %v1826_v52 = vld [vmem:[#allocation2 + $0x227] sm:$0xff] }
  0xea   : > { %6402 = vmatpush.xpose.msk.msra.mxu3 %vm333_vm0, %v7865_v24 }
  0xeb   : > { %6359 = vmatpush.xpose.msk.msra.mxu1 %vm333_vm0, %v7588_v56  ;;  %v2037_v56 = vld [vmem:[#allocation2 + $0x228] sm:$0xff] }
  0xec   : > { %6383 = vmatpush.xpose.msk.msra.mxu2 %vm333_vm0, %v7871_v31 }
  0xed   : > { %6340 = vmatpush.xpose.msk.msra.mxu0 %vm333_vm0, %v7594_v58  ;;  %v6328_v58 = vld [vmem:[%s10479_s1 + $0x88] sm:$0xff] }
  0xee   : > { %6403 = vmatpush.xpose.msk.msra.mxu3 %vm333_vm0, %v7880_v29 }
  0xef   : > { %6360 = vmatpush.xpose.msk.msra.mxu1 %vm333_vm0, %v7608_v60  ;;  %v10599_v60 = vld [vmem:[#allocation9_spill] sm:$0xff] }
  0xf0   : > { %6384 = vmatpush.xpose.msk.msra.mxu2 %vm333_vm0, %v7889_v18 }
  0xf1   : > { %6341 = vmatpush.xpose.msk.msra.mxu0 %vm333_vm0, %v7616_v62  ;;  %v6372_v62 = vld [vmem:[%s10479_s1 + $0xa8] sm:$0xff] }
  0xf2   : > { %6404 = vmatpush.xpose.msk.msra.mxu3 %vm333_vm0, %v7899_v40 }
  0xf3   : > { %6361 = vmatpush.xpose.msk.msra.mxu1 %vm333_vm0, %v7632_v1  ;;  %v10600_v1 = vld [vmem:[#allocation11_spill] sm:$0xff] }
  0xf4   : > { %6385 = vmatpush.xpose.msk.msra.mxu2 %vm333_vm0, %v7905_v21 }
  0xf5   : > { %6342 = vmatpush.xpose.msk.msra.mxu0 %vm333_vm0, %v7640_v4  ;;  %v10601_v4 = vld [vmem:[#allocation10_spill] sm:$0xff] }
  0xf6   : > { %6405 = vmatpush.xpose.msk.msra.mxu3 %vm333_vm0, %v7914_v45 }
  0xf7   : > { %6362 = vmatpush.xpose.msk.msra.mxu1 %vm333_vm0, %v7656_v6  ;;  %v10602_v6 = vld [vmem:[#allocation12_spill] sm:$0xff] }
  0xf8   : > { %6386 = vmatpush.xpose.msk.msra.mxu2 %vm333_vm0, %v7920_v48 }
  0xf9   : > { %6343 = vmatpush.xpose.msk.msra.mxu0 %vm333_vm0, %v7664_v8  ;;  %v1807_v8 = vld [vmem:[#allocation2 + $0xef] sm:$0xff] }
  0xfa   : > { %6406 = vmatpush.xpose.msk.msra.mxu3 %vm333_vm0, %v7926_v32 }
  0xfb   : > { %6363 = vmatpush.xpose.msk.msra.mxu1 %vm333_vm0, %v7680_v10  ;;  %v1823_v10 = vld [vmem:[#allocation2 + $0x1ef] sm:$0xff] }
  0xfc   : > { %6387 = vmatpush.xpose.msk.msra.mxu2 %vm333_vm0, %v7932_v51 }
  0xfd   : > { %6344 = vmatpush.xpose.msk.msra.mxu0 %vm333_vm0, %v7688_v12  ;;  %v2018_v12 = vld [vmem:[#allocation2 + $0xf0] sm:$0xff] }
  0xfe   : > { %6407 = vmatpush.xpose.msk.msra.mxu3 %vm333_vm0, %v7938_v55 }
  0xff   : > { %6364 = vmatpush.xpose.msk.msra.mxu1 %vm333_vm0, %v10594_v19  ;;  %v1818_v19 = vld [vmem:[#allocation2 + $0x1a7] sm:$0xff] }
 0x100   : > { %6388 = vmatpush.xpose.msk.msra.mxu2 %vm333_vm0, %v7944_v57 }
 0x101   : > { %6345 = vmatpush.xpose.msk.msra.mxu0 %vm333_vm0, %v10595_v22  ;;  %v2013_v22 = vld [vmem:[#allocation2 + $0xa8] sm:$0xff] }
 0x102   : > { %6408 = vmatpush.xpose.msk.msra.mxu3 %vm333_vm0, %v7950_v59 }
 0x103   : > { %6365 = vmatpush.xpose.msk.msra.mxu1 %vm333_vm0, %v10596_v27 }
 0x104   : > { %6389 = vmatpush.xpose.msk.msra.mxu2 %vm333_vm0, %v7956_v61  ;;  %v6330_v61 = vld [vmem:[%s10479_s1 + $0x98] sm:$0xff] }
 0x105   : > { %6346 = vmatpush.xpose.msk.msra.mxu0 %vm333_vm0, %v10597_v30  ;;  %v1801_v30 = vld [vmem:[#allocation2 + $0x8f] sm:$0xff] }
 0x106   : > { %6409 = vmatpush.xpose.msk.msra.mxu3 %vm333_vm0, %v7962_v63 }
 0x107   : > { %6366 = vmatpush.xpose.msk.msra.mxu1 %vm333_vm0, %v10598_v38 }
 0x108   : > { %6390 = vmatpush.xpose.msk.msra.mxu2 %vm333_vm0, %v7968_v3  ;;  %6347 = vmatmul.msk.f32.vlgmr.msra.gmra.mxu0 %vm333_vm0, %v6327_v46  ;;  %v6374_v3 = vld [vmem:[%s10479_s1 + $0xb8] sm:$0xff] }
 0x109   : > { %6419 = vmatpush.xpose.msk.msrb.mxu0 %vm333_vm0, %v7732_v36  ;;  %v6373_v36 = vld [vmem:[%s10479_s1 + $0xb0] sm:$0xff] }
 0x10a   : > { %6410 = vmatpush.xpose.msk.msra.mxu3 %vm333_vm0, %v7974_v5  ;;  %6367 = vmatmul.msk.f32.vlgmr.msra.gmra.mxu1 %vm333_vm0, %v6327_v46  ;;  %v1800_v46 = vld [vmem:[#allocation2 + $0x87] sm:$0xff] }
 0x10b   : > { %6439 = vmatpush.xpose.msk.msrb.mxu1 %vm333_vm0, %v1827_v35  ;;  %6391 = vmatmul.msk.f32.vlgmr.msra.gmra.mxu2 %vm333_vm0, %v6371_v50  ;;  %v1817_v35 = vld [vmem:[#allocation2 + $0x18f] sm:$0xff] }
 0x10c   : > { %6463 = vmatpush.xpose.msk.msrb.mxu2 %vm333_vm0, %v10596_v27  ;;  %v2029_v27 = vld [vmem:[#allocation2 + $0x1a8] sm:$0xff] }
 0x10d   : > { %6411 = vmatmul.msk.f32.vlgmr.msra.gmra.mxu3 %vm333_vm0, %v6371_v50  ;;  %6420 = vmatpush.xpose.msk.msrb.mxu0 %vm333_vm0, %v7746_v44  ;;  %v1806_v44 = vld [vmem:[#allocation2 + $0xe7] sm:$0xff] }
 0x10e   : > { %6483 = vmatpush.xpose.msk.msrb.mxu3 %vm333_vm0, %v2038_v43  ;;  %v2028_v43 = vld [vmem:[#allocation2 + $0x190] sm:$0xff]  ;;  %v1816_v50 = vld [vmem:[#allocation2 + $0x187] sm:$0xff] }
 0x10f   : > { %6440 = vmatpush.xpose.msk.msrb.mxu1 %vm333_vm0, %v1826_v52  ;;  %v2011_v52 = vld [vmem:[#allocation2 + $0x88] sm:$0xff] }
 0x110   : > { %6464 = vmatpush.xpose.msk.msrb.mxu2 %vm333_vm0, %v10598_v38  ;;  %6348 = vmatmul.msk.f32.gmra.mxu0 %vm333_vm0, %v6328_v58  ;;  %v2012_v38 = vld [vmem:[#allocation2 + $0x90] sm:$0xff] }
 0x111   : > { %6421 = vmatpush.xpose.msk.msrb.mxu0 %vm333_vm0, %v10599_v60  ;;  %v1815_v60 = vld [vmem:[#allocation2 + $0x16f] sm:$0xff] }
 0x112   : > { %6484 = vmatpush.xpose.msk.msrb.mxu3 %vm333_vm0, %v2037_v56  ;;  %6368 = vmatmul.msk.f32.gmra.mxu1 %vm333_vm0, %v6328_v58  ;;  %v2027_v56 = vld [vmem:[#allocation2 + $0x188] sm:$0xff] }
 0x113   : > { %6441 = vmatpush.xpose.msk.msrb.mxu1 %vm333_vm0, %v10600_v1  ;;  %6392 = vmatmul.msk.f32.gmra.mxu2 %vm333_vm0, %v6372_v62  ;;  %v1799_v58 = vld [vmem:[#allocation2 + $0x6f] sm:$0xff] }
 0x114   : > { %6465 = vmatpush.xpose.msk.msrb.mxu2 %vm333_vm0, %v7753_v47  ;;  %v1822_v47 = vld [vmem:[#allocation2 + $0x1e7] sm:$0xff]  ;;  %v2026_v1 = vld [vmem:[#allocation2 + $0x170] sm:$0xff] }
 0x115   : > { %6412 = vmatmul.msk.f32.gmra.mxu3 %vm333_vm0, %v6372_v62  ;;  %6422 = vmatpush.xpose.msk.msrb.mxu0 %vm333_vm0, %v10601_v4  ;;  %v2010_v62 = vld [vmem:[#allocation2 + $0x70] sm:$0xff]  ;;  %v1798_v4 = vld [vmem:[#allocation2 + $0x67] sm:$0xff] }
 0x116   : > { %6485 = vmatpush.xpose.msk.msrb.mxu3 %vm333_vm0, %v7998_v25  ;;  %v1804_v25 = vld [vmem:[#allocation2 + $0xc7] sm:$0xff] }
 0x117   : > { %6442 = vmatpush.xpose.msk.msrb.mxu1 %vm333_vm0, %v10602_v6  ;;  %v1814_v6 = vld [vmem:[#allocation2 + $0x167] sm:$0xff] }
 0x118   : > { %6466 = vmatpush.xpose.msk.msrb.mxu2 %vm333_vm0, %v7765_v20  ;;  %6349 = vmatmul.msk.f32.gmra.mxu0 %vm333_vm0, %v6329_v26  ;;  %v1805_v20 = vld [vmem:[#allocation2 + $0xcf] sm:$0xff] }
 0x119   : > { %6423 = vmatpush.xpose.msk.msrb.mxu0 %vm333_vm0, %v1807_v8  ;;  %v2009_v8 = vld [vmem:[#allocation2 + $0x68] sm:$0xff] }
 0x11a   : > { %6486 = vmatpush.xpose.msk.msrb.mxu3 %vm333_vm0, %v8023_v7  ;;  %6369 = vmatmul.msk.f32.gmra.mxu1 %vm333_vm0, %v6329_v26  ;;  %v2015_v7 = vld [vmem:[#allocation2 + $0xc8] sm:$0xff]  ;;  %v2008_v26 = vld [vmem:[#allocation2 + $0x50] sm:$0xff] }
 0x11b   : > { %6443 = vmatpush.xpose.msk.msrb.mxu1 %vm333_vm0, %v1823_v10  ;;  %6393 = vmatmul.msk.f32.gmra.mxu2 %vm333_vm0, %v6373_v36  ;;  %v2025_v10 = vld [vmem:[#allocation2 + $0x168] sm:$0xff] }
 0x11c   : > { %6467 = vmatpush.xpose.msk.msrb.mxu2 %vm333_vm0, %v2018_v12  ;;  %v1797_v12 = vld [vmem:[#allocation2 + $0x4f] sm:$0xff] }
 0x11d   : > { %6413 = vmatmul.msk.f32.gmra.mxu3 %vm333_vm0, %v6373_v36  ;;  %6424 = vmatpush.xpose.msk.msrb.mxu0 %vm333_vm0, %v1806_v44  ;;  %v2024_v36 = vld [vmem:[#allocation2 + $0x150] sm:$0xff]  ;;  %v1796_v44 = vld [vmem:[#allocation2 + $0x47] sm:$0xff] }
 0x11e   : > { %6487 = vmatpush.xpose.msk.msrb.mxu3 %vm333_vm0, %v2034_v23  ;;  %v1813_v23 = vld [vmem:[#allocation2 + $0x14f] sm:$0xff] }
 0x11f   : > { %6444 = vmatpush.xpose.msk.msrb.mxu1 %vm333_vm0, %v1822_v47  ;;  %v1812_v47 = vld [vmem:[#allocation2 + $0x147] sm:$0xff] }
 0x120   : > { %6468 = vmatpush.xpose.msk.msrb.mxu2 %vm333_vm0, %v2017_v54  ;;  %6350 = vmatmul.msk.f32.gmra.mxu0 %vm333_vm0, %v6330_v61  ;;  %v2007_v54 = vld [vmem:[#allocation2 + $0x48] sm:$0xff] }
 0x121   : > { %6425 = vmatpush.xpose.msk.msrb.mxu0 %vm333_vm0, %v1805_v20  ;;  %v2249_v20 = vld [vmem:[#allocation2 + $0x231] sm:$0xff] }
 0x122   : > { %6488 = vmatpush.xpose.msk.msrb.mxu3 %vm333_vm0, %v2033_v14  ;;  %6370 = vmatmul.msk.f32.gmra.mxu1 %vm333_vm0, %v6330_v61  ;;  %v2023_v14 = vld [vmem:[#allocation2 + $0x148] sm:$0xff] }
 0x123   : > { %6445 = vmatpush.xpose.msk.msrb.mxu1 %vm333_vm0, %v1821_v49  ;;  %6394 = vmatmul.msk.f32.gmra.mxu2 %vm333_vm0, %v6374_v3  ;;  %v6415_v49 = vld [vmem:[%s10479_s1 + $0xc0] sm:$0xff]  ;;  %v6460_v61 = vld [vmem:[%s10479_s1 + $0xe8] sm:$0xff] }
 0x124   : > { %6469 = vmatpush.xpose.msk.msrb.mxu2 %vm333_vm0, %v2016_v53  ;;  %v6459_v53 = vld [vmem:[%s10479_s1 + $0xe0] sm:$0xff] }
 0x125   : > { %6414 = vmatmul.msk.f32.gmra.mxu3 %vm333_vm0, %v6374_v3  ;;  %6426 = vmatpush.xpose.msk.msrb.mxu0 %vm333_vm0, %v1804_v25  ;;  %v8323_v3 = vpop.f32.mrf.mxu0  ;;  %v6417_v25 = vld [vmem:[%s10479_s1 + $0xd0] sm:$0xff] }
 0x126   : > { %6489 = vmatpush.xpose.msk.msrb.mxu3 %vm333_vm0, %v2032_v42  ;;  %v2248_v42 = vld [vmem:[#allocation2 + $0x229] sm:$0xff] }
 0x127   : > { %6446 = vmatpush.xpose.msk.msrb.mxu1 %vm333_vm0, %v1820_v37  ;;  %v6461_v37 = vld [vmem:[%s10479_s1 + $0xf0] sm:$0xff] }
 0x128   : > { %6470 = vmatpush.xpose.msk.msrb.mxu2 %vm333_vm0, %v2015_v7  ;;  %v8345_v7 = vpop.f32.mrf.mxu2 }
 0x129   : > { %6427 = vmatpush.xpose.msk.msrb.mxu0 %vm333_vm0, %v1803_v33 }
 0x12a   : > { %6490 = vmatpush.xpose.msk.msrb.mxu3 %vm333_vm0, %v2031_v11  ;;  %v8348_v11 = vpop.f32.mrf.mxu3 }
 0x12b   : > { %6447 = vmatpush.xpose.msk.msrb.mxu1 %vm333_vm0, %v1819_v0 }
 0x12c   : > { %6471 = vmatpush.xpose.msk.msrb.mxu2 %vm333_vm0, %v2014_v2  ;;  %v2227_v2 = vld [vmem:[#allocation2 + $0xd1] sm:$0xff] }
 0x12d   : > { %6428 = vmatpush.xpose.msk.msrb.mxu0 %vm333_vm0, %v1802_v16  ;;  %v8350_v33 = vpop.f32.mrf.mxu0  ;;  %v6418_v16 = vld [vmem:[%s10479_s1 + $0xd8] sm:$0xff] }
 0x12e   : > { %6491 = vmatpush.xpose.msk.msrb.mxu3 %vm333_vm0, %v2030_v13  ;;  %v2243_v13 = vld [vmem:[#allocation2 + $0x1d1] sm:$0xff] }
 0x12f   : > { %6448 = vmatpush.xpose.msk.msrb.mxu1 %vm333_vm0, %v1818_v19  ;;  %v6462_v19 = vld [vmem:[%s10479_s1 + $0xf8] sm:$0xff] }
 0x130   : > { %6472 = vmatpush.xpose.msk.msrb.mxu2 %vm333_vm0, %v2013_v22  ;;  %v2226_v22 = vld [vmem:[#allocation2 + $0xc9] sm:$0xff] }
 0x131   : > { %6429 = vmatpush.xpose.msk.msrb.mxu0 %vm333_vm0, %v1801_v30  ;;  %v2242_v30 = vld [vmem:[#allocation2 + $0x1c9] sm:$0xff] }
 0x132   : > { %6492 = vmatpush.xpose.msk.msrb.mxu3 %vm333_vm0, %v2029_v27  ;;  %v2429_v27 = vld [vmem:[%s10480_s2] sm:$0xff] }
 0x133   : > { %6449 = vmatpush.xpose.msk.msrb.mxu1 %vm333_vm0, %v1817_v35  ;;  %v10501_v35 = vmov 0  }
 0x134   : > { %6473 = vmatpush.xpose.msk.msrb.mxu2 %vm333_vm0, %v2012_v38  ;;  %7243 = vset.pattern.permute.xlu0 %v10501_v35  ;;  %v8373_v38 = vpop.f32.mrf.mxu2 }
 0x135   : > { %6430 = vmatpush.xpose.msk.msrb.mxu0 %vm333_vm0, %v1800_v46  ;;  %2433 = vperm.xlu0 %7243, %v2429_v27   ;;  %v8378_v46 = vpop.f32.mrf.mxu0 }
 0x136   : > { %6493 = vmatpush.xpose.msk.msrb.mxu3 %vm333_vm0, %v2028_v43  ;;  %v8376_v43 = vpop.f32.mrf.mxu3 }
 0x137   : > { %6450 = vmatpush.xpose.msk.msrb.mxu1 %vm333_vm0, %v1816_v50 }
 0x138   : > { %6474 = vmatpush.xpose.msk.msrb.mxu2 %vm333_vm0, %v2011_v52  ;;  %v2430_v52 = vld [vmem:[%s10480_s2 + $0x8] sm:$0xff] }
 0x139   : > { %6431 = vmatpush.xpose.msk.msrb.mxu0 %vm333_vm0, %v1799_v58 }
 0x13a   : > { %6494 = vmatpush.xpose.msk.msrb.mxu3 %vm333_vm0, %v2027_v56 }
 0x13b   : > { %6451 = vmatpush.xpose.msk.msrb.mxu1 %vm333_vm0, %v1815_v60 }
 0x13c   : > { %6475 = vmatpush.xpose.msk.msrb.mxu2 %vm333_vm0, %v2010_v62  ;;  %v8393_v56 = vpop.f32.mrf.mxu2 }
 0x13d   : > { %6432 = vmatpush.xpose.msk.msrb.mxu0 %vm333_vm0, %v1798_v4  ;;  %2438 = vperm.xlu0 %7243, %v2430_v52   ;;  %v8397_v60 = vpop.f32.mrf.mxu0 }
 0x13e   : > { %6495 = vmatpush.xpose.msk.msrb.mxu3 %vm333_vm0, %v2026_v1  ;;  %v8395_v58 = vpop.f32.mrf.mxu3 }
 0x13f   : > { %6452 = vmatpush.xpose.msk.msrb.mxu1 %vm333_vm0, %v1814_v6 }
 0x140   : > { %6476 = vmatpush.xpose.msk.msrb.mxu2 %vm333_vm0, %v2009_v8 }
 0x141   : > { %6433 = vmatpush.xpose.msk.msrb.mxu0 %vm333_vm0, %v1797_v12 }
 0x142   : > { %6496 = vmatpush.xpose.msk.msrb.mxu3 %vm333_vm0, %v2025_v10  ;;  %v6506_v10 = vld [vmem:[%s10479_s1 + $0x118] sm:$0xff] }
 0x143   : > { %6453 = vmatpush.xpose.msk.msrb.mxu1 %vm333_vm0, %v1813_v23 }
 0x144   : > { %6477 = vmatpush.xpose.msk.msrb.mxu2 %vm333_vm0, %v2008_v26 }
 0x145   : > { %6434 = vmatpush.xpose.msk.msrb.mxu0 %vm333_vm0, %v1796_v44 }
 0x146   : > { %6497 = vmatpush.xpose.msk.msrb.mxu3 %vm333_vm0, %v2024_v36 }
 0x147   : > { %6454 = vmatpush.xpose.msk.msrb.mxu1 %vm333_vm0, %v1812_v47 }
 0x148   : > { %6478 = vmatpush.xpose.msk.msrb.mxu2 %vm333_vm0, %v2007_v54  ;;  %6435 = vmatmul.msk.f32.vlgmr.msrb.gmra.mxu0 %vm333_vm0, %v6415_v49 }
 0x149   : > { %6507 = vmatpush.xpose.msk.msra.mxu0 %vm333_vm0, %v7962_v63  ;;  %v6416_v63 = vld [vmem:[%s10479_s1 + $0xc8] sm:$0xff] }
 0x14a   : > { %6498 = vmatpush.xpose.msk.msrb.mxu3 %vm333_vm0, %v2023_v14  ;;  %6455 = vmatmul.msk.f32.vlgmr.msrb.gmra.mxu1 %vm333_vm0, %v6415_v49 }
 0x14b   : > { %6527 = vmatpush.xpose.msk.msra.mxu1 %vm333_vm0, %v2249_v20  ;;  %6479 = vmatmul.msk.f32.vlgmr.msrb.gmra.mxu2 %vm333_vm0, %v6459_v53 }
 0x14d   : > { %6499 = vmatmul.msk.f32.vlgmr.msrb.gmra.mxu3 %vm333_vm0, %v6459_v53  ;;  %6508 = vmatpush.xpose.msk.msra.mxu0 %vm333_vm0, %v7974_v5  ;;  %v8327_v5 = vpop.f32.mrf.mxu1 }
 0x14f   : > { %6528 = vmatpush.xpose.msk.msra.mxu1 %vm333_vm0, %v2248_v42 }
 0x150   : > { %6436 = vmatmul.msk.f32.gmra.mxu0 %vm333_vm0, %v6416_v63 }
 0x151   : > { %6509 = vmatpush.xpose.msk.msra.mxu0 %vm333_vm0, %v7984_v9  ;;  %v2229_v9 = vld [vmem:[#allocation2 + $0xf1] sm:$0xff] }
 0x152   : > { %6456 = vmatmul.msk.f32.gmra.mxu1 %vm333_vm0, %v6416_v63 }
 0x153   : > { %6529 = vmatpush.xpose.msk.msra.mxu1 %vm333_vm0, %v8004_v28  ;;  %6480 = vmatmul.msk.f32.gmra.mxu2 %vm333_vm0, %v6460_v61  ;;  %v2245_v28 = vld [vmem:[#allocation2 + $0x1f1] sm:$0xff] }
 0x155   : > { %6500 = vmatmul.msk.f32.gmra.mxu3 %vm333_vm0, %v6460_v61  ;;  %6510 = vmatpush.xpose.msk.msra.mxu0 %vm333_vm0, %v7993_v17  ;;  %v2228_v17 = vld [vmem:[#allocation2 + $0xe9] sm:$0xff]  ;;  %v8353_v0 = vpop.f32.mrf.mxu1 }
 0x157   : > { %6530 = vmatpush.xpose.msk.msra.mxu1 %vm333_vm0, %v8027_v41  ;;  %v2244_v41 = vld [vmem:[#allocation2 + $0x1e9] sm:$0xff] }
 0x158   : > { %6437 = vmatmul.msk.f32.gmra.mxu0 %vm333_vm0, %v6417_v25 }
 0x159   : > { %6511 = vmatpush.xpose.msk.msra.mxu0 %vm333_vm0, %v2229_v9 }
 0x15a   : > { %6457 = vmatmul.msk.f32.gmra.mxu1 %vm333_vm0, %v6417_v25 }
 0x15b   : > { %6531 = vmatpush.xpose.msk.msra.mxu1 %vm333_vm0, %v2245_v28  ;;  %6481 = vmatmul.msk.f32.gmra.mxu2 %vm333_vm0, %v6461_v37 }
 0x15d   : > { %6501 = vmatmul.msk.f32.gmra.mxu3 %vm333_vm0, %v6461_v37  ;;  %6512 = vmatpush.xpose.msk.msra.mxu0 %vm333_vm0, %v2228_v17  ;;  %v8380_v50 = vpop.f32.mrf.mxu1 }
 0x15f   : > { %6532 = vmatpush.xpose.msk.msra.mxu1 %vm333_vm0, %v2244_v41 }
 0x160   : > { %6438 = vmatmul.msk.f32.gmra.mxu0 %vm333_vm0, %v6418_v16 }
 0x161   : > { %6513 = vmatpush.xpose.msk.msra.mxu0 %vm333_vm0, %v2227_v2 }
 0x162   : > { %6458 = vmatmul.msk.f32.gmra.mxu1 %vm333_vm0, %v6418_v16 }
 0x163   : > { %6533 = vmatpush.xpose.msk.msra.mxu1 %vm333_vm0, %v2243_v13  ;;  %6482 = vmatmul.msk.f32.gmra.mxu2 %vm333_vm0, %v6462_v19  ;;  %v917_v13 = vadd.f32 %v8393_v56, %v8378_v46 }
 0x165   : > { %6502 = vmatmul.msk.f32.gmra.mxu3 %vm333_vm0, %v6462_v19  ;;  %6514 = vmatpush.xpose.msk.msra.mxu0 %vm333_vm0, %v2226_v22  ;;  %v946_v22 = vadd.f32 %v8395_v58, %v8380_v50 }
 0x167   : > { %6534 = vmatpush.xpose.msk.msra.mxu1 %vm333_vm0, %v2242_v30 }
 0x169   : > { %6515 = vmatpush.xpose.msk.msra.mxu0 %vm333_vm0, %v7837_v39  ;;  %v8401_v39 = vpop.f32.mrf.mxu1 }
 0x16b   : > { %6535 = vmatpush.xpose.msk.msra.mxu1 %vm333_vm0, %v7846_v15  ;;  %v4221_v15 = vld [vmem:[%s10482_s4] sm:$0xff] }
 0x16c   : > { %4225 = vperm.xlu0 %7243, %v4221_v15  }
 0x16d   : > { %6516 = vmatpush.xpose.msk.msra.mxu0 %vm333_vm0, %v7855_v34  ;;  %v919_v34 = vpop.f32.mrf.mxu2 }
 0x16e   : > { %v920_v30 = vadd.f32 %v919_v34, %v8397_v60 }
 0x16f   : > { %6536 = vmatpush.xpose.msk.msra.mxu1 %vm333_vm0, %v7865_v24  ;;  %v948_v24 = vpop.f32.mrf.mxu3 }
 0x170   : > { %v949_v52 = vadd.f32 %v948_v24, %v8401_v39 }
 0x171   : > { %6517 = vmatpush.xpose.msk.msra.mxu0 %vm333_vm0, %v7871_v31  ;;  %v8416_v31 = vpop.f32.mrf.mxu0 }
 0x173   : > { %6537 = vmatpush.xpose.msk.msra.mxu1 %vm333_vm0, %v7880_v29  ;;  %v8418_v29 = vpop.f32.mrf.mxu1 }
 0x175   : > { %6518 = vmatpush.xpose.msk.msra.mxu0 %vm333_vm0, %v7889_v18 }
 0x177   : > { %6538 = vmatpush.xpose.msk.msra.mxu1 %vm333_vm0, %v7899_v40  ;;  %v8430_v40 = vpop.f32.mrf.mxu2 }
 0x179   : > { %6519 = vmatpush.xpose.msk.msra.mxu0 %vm333_vm0, %v7905_v21  ;;  %v8428_v18 = vpop.f32.mrf.mxu0 }
 0x17b   : > { %6539 = vmatpush.xpose.msk.msra.mxu1 %vm333_vm0, %v7914_v45  ;;  %v8432_v21 = vpop.f32.mrf.mxu1  ;;  %v8434_v45 = vpop.f32.mrf.mxu3 }
 0x17d   : > { %6520 = vmatpush.xpose.msk.msra.mxu0 %vm333_vm0, %v7920_v48  ;;  %v6503_v48 = vld [vmem:[%s10479_s1 + $0x100] sm:$0xff] }
 0x17f   : > { %6540 = vmatpush.xpose.msk.msra.mxu1 %vm333_vm0, %v7926_v32  ;;  %v8445_v32 = vpop.f32.mrf.mxu2 }
 0x181   : > { %6521 = vmatpush.xpose.msk.msra.mxu0 %vm333_vm0, %v7932_v51 }
 0x183   : > { %6541 = vmatpush.xpose.msk.msra.mxu1 %vm333_vm0, %v7938_v55  ;;  %v8447_v51 = vpop.f32.mrf.mxu3  ;;  %v1119_v55 = vpop.f32.mrf.mxu0 }
 0x184   : > { %v1148_v62 = vpop.f32.mrf.mxu1  ;;  %v1158_v15 = vadd.f32 %v1119_v55, %v917_v13 }
 0x185   : > { %6522 = vmatpush.xpose.msk.msra.mxu0 %vm333_vm0, %v7944_v57  ;;  %v6504_v57 = vld [vmem:[%s10479_s1 + $0x108] sm:$0xff] }
 0x187   : > { %6542 = vmatpush.xpose.msk.msra.mxu1 %vm333_vm0, %v7950_v59  ;;  %v6505_v59 = vld [vmem:[%s10479_s1 + $0x110] sm:$0xff]  ;;  %v1330_v1 = vpop.f32.mrf.mxu2 }
 0x188   : > { %6523 = vmatmul.msk.f32.vlgmr.msra.gmra.mxu0 %vm333_vm0, %v6503_v48 }
 0x18a   : > { %6543 = vmatmul.msk.f32.vlgmr.msra.gmra.mxu1 %vm333_vm0, %v6503_v48  ;;  %v1159_v48 = vadd.f32 %v1148_v62, %v946_v22 }
 0x18b   : > { %v1359_v4 = vpop.f32.mrf.mxu3  ;;  %v1122_v6 = vpop.f32.mrf.mxu0 }
 0x18c   : > { %v1151_v8 = vpop.f32.mrf.mxu1 }
 0x18d   : > { %v1161_v35 = vadd.f32 %v1151_v8, %v949_v52 }
 0x18f   : > { %v1333_v12 = vpop.f32.mrf.mxu2 }
 0x190   : > { %6524 = vmatmul.msk.f32.gmra.mxu0 %vm333_vm0, %v6504_v57 }
 0x192   : > { %6544 = vmatmul.msk.f32.gmra.mxu1 %vm333_vm0, %v6504_v57  ;;  %v1160_v57 = vadd.f32 %v1122_v6, %v920_v30 }
 0x193   : > { %v1362_v23 = vpop.f32.mrf.mxu3  ;;  %v8463_v26 = vpop.f32.mrf.mxu0 }
 0x194   : > { %v8466_v36 = vpop.f32.mrf.mxu1  ;;  %v1371_v50 = vadd.f32 %v1333_v12, %v1160_v57 }
 0x197   : > { %v8468_v44 = vpop.f32.mrf.mxu2 }
 0x198   : > { %6525 = vmatmul.msk.f32.gmra.mxu0 %vm333_vm0, %v6505_v59 }
 0x19a   : > { %6545 = vmatmul.msk.f32.gmra.mxu1 %vm333_vm0, %v6505_v59 }
 0x19b   : > { %v8470_v47 = vpop.f32.mrf.mxu3  ;;  %v8472_v54 = vpop.f32.mrf.mxu0 }
 0x19c   : > { %v8474_v14 = vpop.f32.mrf.mxu1 }
 0x19d   : > { %10603 = vst [vmem:[#allocation4_spill] sm:$0xff] %v8474_v14 }
 0x19f   : > { %v8476_v20 = vpop.f32.mrf.mxu2 }
 0x1a0   : > { %6526 = vmatmul.msk.f32.gmra.mxu0 %vm333_vm0, %v6506_v10  ;;  %10604 = vst [vmem:[#allocation5_spill] sm:$0xff] %v8476_v20 }
 0x1a2   : > { %6546 = vmatmul.msk.f32.gmra.mxu1 %vm333_vm0, %v6506_v10  ;;  %v1369_v10 = vadd.f32 %v1330_v1, %v1158_v15 }
 0x1a3   : > { %v8478_v49 = vpop.f32.mrf.mxu3  ;;  %v1541_v53 = vpop.f32.mrf.mxu0 }
 0x1a4   : > { %10605 = vst [vmem:[#allocation6_spill] sm:$0xff] %v8478_v49  ;;  %v1570_v42 = vpop.f32.mrf.mxu1  ;;  %v1580_v20 = vadd.f32 %v1541_v53, %v1369_v10 }
 0x1a7   : > { %v1752_v63 = vpop.f32.mrf.mxu2 }
 0x1a8   : > { %v1791_v14 = vadd.f32 %v1752_v63, %v1580_v20  ;;  %v943_v63 = vadd.f32 %v8376_v43, %v8353_v0 }
 0x1ab   : > { %v1781_v61 = vpop.f32.mrf.mxu3  ;;  %v1544_v9 = vpop.f32.mrf.mxu0 }
 0x1ac   : > { %v1573_v28 = vpop.f32.mrf.mxu1  ;;  %v1582_v34 = vadd.f32 %v1544_v9, %v1371_v50 }
 0x1af   : > { %v1755_v25 = vpop.f32.mrf.mxu2 }
 0x1b0   : > { %v1793_v55 = vadd.f32 %v1755_v25, %v1582_v34 }
 0x1b3   : > { %v1784_v37 = vpop.f32.mrf.mxu3 }
 0x1c5   : > { %v1958_v17 = vpop.f32.mrf.mxu0 }
 0x1c7   : > { %v1987_v41 = vpop.f32.mrf.mxu1 }
 0x1cd   : > { %v8482_v19 = vpop.f32.mrf.mxu0 }
 0x1ce   : > { %v2169_v2 = vpop.f32.mrf.mxu2  ;;  %10606 = vst [vmem:[#allocation7_spill] sm:$0xff] %v8482_v19  ;;  %v1370_v19 = vadd.f32 %v1359_v4, %v1159_v48 }
 0x1cf   : > { %v8486_v27 = vpop.f32.mrf.mxu1 }
 0x1d0   : > { %v2198_v16 = vpop.f32.mrf.mxu3  ;;  %10607 = vst [vmem:[#allocation8_spill] sm:$0xff] %v8486_v27  ;;  %v1581_v58 = vadd.f32 %v1570_v42, %v1370_v19  ;;  %v1372_v27 = vadd.f32 %v1362_v23, %v1161_v35  ;;  %v911_v35 = vadd.f32 %v8345_v7, %v8323_v3  ;;  %v940_v23 = vadd.f32 %v8348_v11, %v8327_v5 }
 0x1d1   : > { %v10610_v11 = vmov 0.0  }
 0x1d2   : > { %v1792_v60 = vadd.f32 %v1781_v61, %v1581_v58  ;;  %v1583_v39 = vadd.f32 %v1573_v28, %v1372_v27  ;;  %v1155_v20 = vadd.f32 %v8418_v29, %v940_v23  ;;  %446 = vst.msk [vmem:[#allocation3 + $0x128] sm:$0xff] %vm407_vm2, %v10610_v11 }
 0x1d3   : > { %408 = vst.msk [vmem:[#allocation3] sm:$0xff] %vm407_vm2, %v10610_v11 }
 0x1d4   : > { %v1794_v13 = vadd.f32 %v1784_v37, %v1583_v39  ;;  %v1366_v61 = vadd.f32 %v8434_v45, %v1155_v20  ;;  %409 = vst.msk [vmem:[#allocation3 + $0x8] sm:$0xff] %vm407_vm2, %v10610_v11 }
 0x1d5   : > { %v1964_v56 = vpop.f32.mrf.mxu0  ;;  %410 = vst.msk [vmem:[#allocation3 + $0x10] sm:$0xff] %vm407_vm2, %v10610_v11 }
 0x1d6   : > { %v8490_v59 = vpop.f32.mrf.mxu2  ;;  %v2003_v24 = vadd.f32 %v1964_v56, %v1791_v14  ;;  %v1154_v14 = vadd.f32 %v8416_v31, %v911_v35  ;;  %v1577_v3 = vadd.f32 %v8466_v36, %v1366_v61  ;;  %413 = vst.msk [vmem:[#allocation3 + $0x20] sm:$0xff] %vm407_vm2, %v10610_v11 }
 0x1d7   : > { %v1993_v49 = vpop.f32.mrf.mxu1  ;;  %414 = vst.msk [vmem:[#allocation3 + $0x28] sm:$0xff] %vm407_vm2, %v10610_v11  ;;  %v10615_v27 = vld [vmem:[#allocation8_spill] sm:$0xff] }
 0x1d8   : > { %v8492_v46 = vpop.f32.mrf.mxu3  ;;  %v2004_v62 = vadd.f32 %v1993_v49, %v1792_v60  ;;  %v914_v49 = vadd.f32 %v8373_v38, %v8350_v33  ;;  %v1365_v42 = vadd.f32 %v8430_v40, %v1154_v14  ;;  %v1157_v33 = vadd.f32 %v8432_v21, %v943_v63  ;;  %v2434_v21 = vpop.permute.xlu0 %2433  ;;  %415 = vst.msk [vmem:[#allocation3 + $0x30] sm:$0xff] %vm407_vm2, %v10610_v11 }
 0x1d9   : > { %v1788_v38 = vadd.f32 %v8470_v47, %v1577_v3  ;;  %417 = vst.msk [vmem:[#allocation3 + $0x40] sm:$0xff] %vm407_vm2, %v10610_v11 }
 0x1da   : > { %v1576_v9 = vadd.f32 %v8463_v26, %v1365_v42  ;;  %v1156_v5 = vadd.f32 %v8428_v18, %v914_v49  ;;  %v1368_v18 = vadd.f32 %v8447_v51, %v1157_v33  ;;  %v10612_v51 = vld [vmem:[#allocation5_spill] sm:$0xff]  ;;  %418 = vst.msk [vmem:[#allocation3 + $0x48] sm:$0xff] %vm407_vm2, %v10610_v11 }
 0x1db   : > { %v2000_v43 = vadd.f32 %v1987_v41, %v1788_v38  ;;  %419 = vst.msk [vmem:[#allocation3 + $0x50] sm:$0xff] %vm407_vm2, %v10610_v11 }
 0x1dc   : > { %v1787_v7 = vadd.f32 %v8468_v44, %v1576_v9  ;;  %v1367_v31 = vadd.f32 %v8445_v32, %v1156_v5  ;;  %v10611_v32 = vld [vmem:[#allocation4_spill] sm:$0xff]  ;;  %421 = vst.msk [vmem:[#allocation3 + $0x60] sm:$0xff] %vm407_vm2, %v10610_v11 }
 0x1dd   : > { %v1967_v22 = vpop.f32.mrf.mxu0  ;;  %v2211_v40 = vadd.f32 %v2198_v16, %v2000_v43  ;;  %v1579_v47 = vadd.f32 %v10611_v32, %v1368_v18  ;;  %422 = vst.msk [vmem:[#allocation3 + $0x68] sm:$0xff] %vm407_vm2, %v10610_v11 }
 0x1de   : > { %v2175_v6 = vpop.f32.mrf.mxu2  ;;  %v8498_v4 = vadd.f32 %v1967_v22, %v1793_v55  ;;  %v1999_v0 = vadd.f32 %v1958_v17, %v1787_v7  ;;  %v1578_v26 = vadd.f32 %v8472_v54, %v1367_v31  ;;  %v10613_v17 = vld [vmem:[#allocation6_spill] sm:$0xff]  ;;  %423 = vst.msk [vmem:[#allocation3 + $0x70] sm:$0xff] %vm407_vm2, %v10610_v11 }
 0x1df   : > { %v8494_v1 = vadd.f32 %v2175_v6, %v2003_v24  ;;  %v1996_v12 = vpop.f32.mrf.mxu1  ;;  %v1790_v41 = vadd.f32 %v10613_v17, %v1579_v47  ;;  %425 = vst.msk [vmem:[#allocation3 + $0x80] sm:$0xff] %vm407_vm2, %v10610_v11 }
 0x1e0   : > { %v2204_v8 = vpop.f32.mrf.mxu3  ;;  %10608 = vst [vmem:[#allocation9_spill] sm:$0xff] %v8498_v4  ;;  %v8500_v53 = vadd.f32 %v1996_v12, %v1794_v13  ;;  %v2210_v29 = vadd.f32 %v2169_v2, %v1999_v0  ;;  %v1789_v25 = vadd.f32 %v10612_v51, %v1578_v26  ;;  %v10614_v2 = vld [vmem:[#allocation7_spill] sm:$0xff]  ;;  %v2439_v58 = vpop.permute.xlu0 %2438  ;;  %v10618_v13 = vmov 0  }
 0x1e1   : > { %v8496_v30 = vadd.f32 %v2204_v8, %v2004_v62  ;;  %v2002_v52 = vadd.f32 %v10615_v27, %v1790_v41  ;;  %426 = vst.msk [vmem:[#allocation3 + $0x88] sm:$0xff] %vm407_vm2, %v10610_v11 }
 0x1e2   : > { %10609 = vst [vmem:[#allocation11_spill] sm:$0xff] %v8500_v53  ;;  %v2001_v16 = vadd.f32 %v10614_v2, %v1789_v25 }
 0x1e3   : > { %v2213_v57 = vadd.f32 %v8492_v46, %v2002_v52  ;;  %427 = vst.msk [vmem:[#allocation3 + $0x90] sm:$0xff] %vm407_vm2, %v10610_v11 }
 0x1e4   : > { %v2212_v48 = vadd.f32 %v8490_v59, %v2001_v16  ;;  %429 = vst.msk [vmem:[#allocation3 + $0xa0] sm:$0xff] %vm407_vm2, %v10610_v11 }
 0x1e5   : > { %430 = vst.msk [vmem:[#allocation3 + $0xa8] sm:$0xff] %vm407_vm2, %v10610_v11 }
 0x1e6   : > { %431 = vst.msk [vmem:[#allocation3 + $0xb0] sm:$0xff] %vm407_vm2, %v10610_v11 }
 0x1e7   : > { %433 = vst.msk [vmem:[#allocation3 + $0xc0] sm:$0xff] %vm407_vm2, %v10610_v11 }
 0x1e8   : > { %434 = vst.msk [vmem:[#allocation3 + $0xc8] sm:$0xff] %vm407_vm2, %v10610_v11 }
 0x1e9   : > { %435 = vst.msk [vmem:[#allocation3 + $0xd0] sm:$0xff] %vm407_vm2, %v10610_v11 }
 0x1ea   : > { %437 = vst.msk [vmem:[#allocation3 + $0xe0] sm:$0xff] %vm407_vm2, %v10610_v11 }
 0x1eb   : > { %438 = vst.msk [vmem:[#allocation3 + $0xe8] sm:$0xff] %vm407_vm2, %v10610_v11 }
 0x1ec   : > { %439 = vst.msk [vmem:[#allocation3 + $0xf0] sm:$0xff] %vm407_vm2, %v10610_v11 }
 0x1ed   : > { %441 = vst.msk [vmem:[#allocation3 + $0x100] sm:$0xff] %vm407_vm2, %v10610_v11 }
 0x1ee   : > { %442 = vst.msk [vmem:[#allocation3 + $0x108] sm:$0xff] %vm407_vm2, %v10610_v11 }
 0x1ef   : > { %443 = vst.msk [vmem:[#allocation3 + $0x110] sm:$0xff] %vm407_vm2, %v10610_v11 }
 0x1f0   : > { %445 = vst.msk [vmem:[#allocation3 + $0x120] sm:$0xff] %vm407_vm2, %v10610_v11 }
 0x1f1   : > { %447 = vst.msk [vmem:[#allocation3 + $0x130] sm:$0xff] %vm407_vm2, %v10610_v11 }
 0x1f2   : > { %449 = vst.msk [vmem:[#allocation3 + $0x140] sm:$0xff] %vm407_vm2, %v10610_v11 }
 0x1f3   : > { %450 = vst.msk [vmem:[#allocation3 + $0x148] sm:$0xff] %vm407_vm2, %v10610_v11 }
 0x1f4   : > { %451 = vst.msk [vmem:[#allocation3 + $0x150] sm:$0xff] %vm407_vm2, %v10610_v11 }
 0x1f5   : > { %453 = vst.msk [vmem:[#allocation3 + $0x160] sm:$0xff] %vm407_vm2, %v10610_v11 }
 0x1f6   : > { %454 = vst.msk [vmem:[#allocation3 + $0x168] sm:$0xff] %vm407_vm2, %v10610_v11 }
 0x1f7   : > { %455 = vst.msk [vmem:[#allocation3 + $0x170] sm:$0xff] %vm407_vm2, %v10610_v11 }
 0x1f8   : > { %457 = vst.msk [vmem:[#allocation3 + $0x180] sm:$0xff] %vm407_vm2, %v10610_v11 }
 0x1f9   : > { %458 = vst.msk [vmem:[#allocation3 + $0x188] sm:$0xff] %vm407_vm2, %v10610_v11 }
 0x1fa   : > { %459 = vst.msk [vmem:[#allocation3 + $0x190] sm:$0xff] %vm407_vm2, %v10610_v11 }
 0x1fb   : > { %461 = vst.msk [vmem:[#allocation3 + $0x1a0] sm:$0xff] %vm407_vm2, %v10610_v11 }
 0x1fc   : > { %462 = vst.msk [vmem:[#allocation3 + $0x1a8] sm:$0xff] %vm407_vm2, %v10610_v11 }
 0x1fd   : > { %463 = vst.msk [vmem:[#allocation3 + $0x1b0] sm:$0xff] %vm407_vm2, %v10610_v11 }
 0x1fe   : > { %465 = vst.msk [vmem:[#allocation3 + $0x1c0] sm:$0xff] %vm407_vm2, %v10610_v11 }
 0x1ff   : > { %466 = vst.msk [vmem:[#allocation3 + $0x1c8] sm:$0xff] %vm407_vm2, %v10610_v11 }
 0x200   : > { %467 = vst.msk [vmem:[#allocation3 + $0x1d0] sm:$0xff] %vm407_vm2, %v10610_v11 }
 0x201   : > { %469 = vst.msk [vmem:[#allocation3 + $0x1e0] sm:$0xff] %vm407_vm2, %v10610_v11 }
 0x202   : > { %470 = vst.msk [vmem:[#allocation3 + $0x1e8] sm:$0xff] %vm407_vm2, %v10610_v11 }
 0x203   : > { %471 = vst.msk [vmem:[#allocation3 + $0x1f0] sm:$0xff] %vm407_vm2, %v10610_v11 }
 0x204   : > { %473 = vst.msk [vmem:[#allocation3 + $0x200] sm:$0xff] %vm407_vm2, %v10610_v11 }
 0x205   : > { %v2380_v45 = vpop.f32.mrf.mxu0  ;;  %474 = vst.msk [vmem:[#allocation3 + $0x208] sm:$0xff] %vm407_vm2, %v10610_v11 }
 0x206   : > { %v2421_v36 = vadd.f32 %v2380_v45, %v2210_v29  ;;  %475 = vst.msk [vmem:[#allocation3 + $0x210] sm:$0xff] %vm407_vm2, %v10610_v11 }
 0x207   : > { %v2409_v44 = vpop.f32.mrf.mxu1  ;;  %477 = vst.msk [vmem:[#allocation3 + $0x220] sm:$0xff] %vm407_vm2, %v10610_v11 }
 0x208   : > { %v2422_v28 = vadd.f32 %v2409_v44, %v2211_v40  ;;  %v2441_v37 = vadd.f32 %v2434_v21, %v2421_v36  ;;  %478 = vst.msk [vmem:[#allocation3 + $0x228] sm:$0xff] %vm407_vm2, %v10610_v11 }
 0x209   : > { %479 = vst.msk [vmem:[#allocation3 + $0x230] sm:$0xff] %vm407_vm2, %v10610_v11 }
 0x20a   : > { %v2442_v54 = vadd.f32 %v2434_v21, %v2422_v28  ;;  %v2445_v19 = vmax.f32 %v2441_v37, 0.0  ;;  %472 = vst.msk [vmem:[#allocation3 + $0x1f8] sm:$0x1] %vm411_vm3, %v10610_v11 }
 0x20b   : > { %412 = vst.msk [vmem:[#allocation3 + $0x18] sm:$0x1] %vm411_vm3, %v10610_v11 }
 0x20c   : > { %v2446_v15 = vmax.f32 %v2442_v54, 0.0  ;;  %2449 = vxpose.xlu1.b32.start [1/2] (short) %v2445_v19, 128  ;;  %416 = vst.msk [vmem:[#allocation3 + $0x38] sm:$0x1] %vm411_vm3, %v10610_v11 }
 0x20d   : > { %v2383_v10 = vpop.f32.mrf.mxu0  ;;  %420 = vst.msk [vmem:[#allocation3 + $0x58] sm:$0x1] %vm411_vm3, %v10610_v11 }
 0x20e   : > { %2481 = vxpose.xlu2.b32.start [1/2] (short) %v2446_v15, 128  ;;  %v2423_v56 = vadd.f32 %v2383_v10, %v2212_v48  ;;  %424 = vst.msk [vmem:[#allocation3 + $0x78] sm:$0x1] %vm411_vm3, %v10610_v11 }
 0x20f   : > { %v2412_v50 = vpop.f32.mrf.mxu1  ;;  %428 = vst.msk [vmem:[#allocation3 + $0x98] sm:$0x1] %vm411_vm3, %v10610_v11 }
 0x210   : > { %v2424_v60 = vadd.f32 %v2412_v50, %v2213_v57  ;;  %v2443_v59 = vadd.f32 %v2439_v58, %v2423_v56  ;;  %432 = vst.msk [vmem:[#allocation3 + $0xb8] sm:$0x1] %vm411_vm3, %v10610_v11 }
 0x211   : > { %436 = vst.msk [vmem:[#allocation3 + $0xd8] sm:$0x1] %vm411_vm3, %v10610_v11 }
 0x212   : > { %v2444_v46 = vadd.f32 %v2439_v58, %v2424_v60  ;;  %v2447_v34 = vmax.f32 %v2443_v59, 0.0  ;;  %440 = vst.msk [vmem:[#allocation3 + $0xf8] sm:$0x1] %vm411_vm3, %v10610_v11 }
 0x213   : > { %444 = vst.msk [vmem:[#allocation3 + $0x118] sm:$0x1] %vm411_vm3, %v10610_v11 }
 0x214   : > { %v2448_v39 = vmax.f32 %v2444_v46, 0.0  ;;  %2450 = vxpose.xlu1.b32.end [2/2] (short) %v2447_v34, 128  ;;  %448 = vst.msk [vmem:[#allocation3 + $0x138] sm:$0x1] %vm411_vm3, %v10610_v11 }
 0x215   : > { %v2386_v24 = vpop.f32.mrf.mxu0  ;;  %452 = vst.msk [vmem:[#allocation3 + $0x158] sm:$0x1] %vm411_vm3, %v10610_v11 }
 0x216   : > { %2482 = vxpose.xlu2.b32.end [2/2] (short) %v2448_v39, 128  ;;  %v8575_v55 = vadd.f32 %v2386_v24, %v8494_v1  ;;  %456 = vst.msk [vmem:[#allocation3 + $0x178] sm:$0x1] %vm411_vm3, %v10610_v11 }
 0x217   : > { %v2415_v62 = vpop.f32.mrf.mxu1  ;;  %460 = vst.msk [vmem:[#allocation3 + $0x198] sm:$0x1] %vm411_vm3, %v10610_v11 }
 0x218   : > { %10616 = vst [vmem:[#allocation10_spill] sm:$0xff] %v8575_v55  ;;  %v8580_v6 = vadd.f32 %v2415_v62, %v8496_v30 }
 0x219   : > { %464 = vst.msk [vmem:[#allocation3 + $0x1b8] sm:$0x1] %vm411_vm3, %v10610_v11 }
 0x21a   : > { %10617 = vst [vmem:[#allocation12_spill] sm:$0xff] %v8580_v6 }
 0x21b   : > { %468 = vst.msk [vmem:[#allocation3 + $0x1d8] sm:$0x1] %vm411_vm3, %v10610_v11 }
 0x21c   : > { %476 = vst.msk [vmem:[#allocation3 + $0x218] sm:$0x1] %vm411_vm3, %v10610_v11 }
 0x21d   : > { %480 = vst.msk [vmem:[#allocation3 + $0x238] sm:$0x1] %vm411_vm3, %v10610_v11 }
 0x267   : > { %7244 = vset.pattern.permute.xlu1 %v10618_v13  ;;  %v2581_v13 = vld [vmem:[#allocation3 + $0x10] sm:$0xff] }
 0x2a7   : > { %v2497_v1 = vpop.trf.xlu2 }
 0x2a8   : > { %2530 = vst.msk [vmem:[#allocation3 + $0x128] sm:$0xff] %vm407_vm2, %v2497_v1 }
 0x2af   : > { %v2498_v8 = vpop.trf.xlu2 }
 0x2b0   : > { %2531 = vst.msk [vmem:[#allocation3 + $0x130] sm:$0xff] %vm407_vm2, %v2498_v8  ;;  %v2465_v22 = vpop.trf.xlu1 }
 0x2b1   : > { %2514 = vst.msk [vmem:[#allocation3 + $0x28] sm:$0xff] %vm407_vm2, %v2465_v22 }
 0x2b7   : > { %v2499_v30 = vpop.trf.xlu2 }
 0x2b8   : > { %2532 = vst.msk [vmem:[#allocation3 + $0x148] sm:$0xff] %vm407_vm2, %v2499_v30  ;;  %v2466_v12 = vpop.trf.xlu1  ;;  %v8953_v55 = vld [vmem:[#allocation3 + $0x28] sm:$0xff] }
 0x2b9   : > { %2515 = vst.msk [vmem:[#allocation3 + $0x30] sm:$0xff] %vm407_vm2, %v2466_v12  ;;  %v8955_v53 = vld [vmem:[#allocation3 + $0x27] sm:$0xff] }
 0x2ba   : > { %10652 = vst [vmem:[#allocation41_spill] sm:$0xff] %v8953_v55 }
 0x2bf   : > { %v2500_v35 = vpop.trf.xlu2 }
 0x2c0   : > { %2533 = vst.msk [vmem:[#allocation3 + $0x150] sm:$0xff] %vm407_vm2, %v2500_v35  ;;  %v2467_v23 = vpop.trf.xlu1 }
 0x2c1   : > { %2516 = vst.msk [vmem:[#allocation3 + $0x48] sm:$0xff] %vm407_vm2, %v2467_v23 }
 0x2c7   : > { %v2501_v14 = vpop.trf.xlu2 }
 0x2c8   : > { %2534 = vst.msk [vmem:[#allocation3 + $0x168] sm:$0xff] %vm407_vm2, %v2501_v14  ;;  %v2468_v20 = vpop.trf.xlu1 }
 0x2c9   : > { %2517 = vst.msk [vmem:[#allocation3 + $0x50] sm:$0xff] %vm407_vm2, %v2468_v20 }
 0x2cf   : > { %v2502_v49 = vpop.trf.xlu2  ;;  %v8841_v35 = vld [vmem:[#allocation3 + $0x168] sm:$0xff] }
 0x2d0   : > { %2535 = vst.msk [vmem:[#allocation3 + $0x170] sm:$0xff] %vm407_vm2, %v2502_v49  ;;  %v2469_v42 = vpop.trf.xlu1  ;;  %v8843_v23 = vld [vmem:[#allocation3 + $0x167] sm:$0xff]  ;;  %v8857_v49 = vld [vmem:[#allocation3 + $0x150] sm:$0xff] }
 0x2d1   : > { %2518 = vst.msk [vmem:[#allocation3 + $0x68] sm:$0xff] %vm407_vm2, %v2469_v42  ;;  %v8859_v42 = vld [vmem:[#allocation3 + $0x14f] sm:$0xff] }
 0x2d2   : > { %10635 = vst [vmem:[#allocation24_spill] sm:$0xff] %v8843_v23 }
 0x2d3   : > { %10637 = vst [vmem:[#allocation26_spill] sm:$0xff] %v8859_v42 }
 0x2d7   : > { %v2503_v63 = vpop.trf.xlu2  ;;  %v8825_v8 = vld [vmem:[#allocation3 + $0x170] sm:$0xff] }
 0x2d8   : > { %2536 = vst.msk [vmem:[#allocation3 + $0x188] sm:$0xff] %vm407_vm2, %v2503_v63  ;;  %v2470_v61 = vpop.trf.xlu1  ;;  %v8827_v22 = vld [vmem:[#allocation3 + $0x16f] sm:$0xff] }
 0x2d9   : > { %2519 = vst.msk [vmem:[#allocation3 + $0x70] sm:$0xff] %vm407_vm2, %v2470_v61 }
 0x2da   : > { %10633 = vst [vmem:[#allocation22_spill] sm:$0xff] %v8827_v22 }
 0x2df   : > { %v2504_v9 = vpop.trf.xlu2  ;;  %v8809_v39 = vld [vmem:[#allocation3 + $0x188] sm:$0xff] }
 0x2e0   : > { %2537 = vst.msk [vmem:[#allocation3 + $0x190] sm:$0xff] %vm407_vm2, %v2504_v9  ;;  %v2471_v3 = vpop.trf.xlu1  ;;  %v8811_v24 = vld [vmem:[#allocation3 + $0x187] sm:$0xff]  ;;  %v8865_v63 = vld [vmem:[#allocation3 + $0x70] sm:$0xff] }
 0x2e1   : > { %2520 = vst.msk [vmem:[#allocation3 + $0x88] sm:$0xff] %vm407_vm2, %v2471_v3  ;;  %v8867_v61 = vld [vmem:[#allocation3 + $0x6f] sm:$0xff]  ;;  %v8875_v3 = vld [vmem:[#allocation3 + $0x147] sm:$0xff] }
 0x2e2   : > { %10631 = vst [vmem:[#allocation20_spill] sm:$0xff] %v8811_v24  ;;  %v8873_v9 = vld [vmem:[#allocation3 + $0x148] sm:$0xff] }
 0x2e3   : > { %10638 = vst [vmem:[#allocation27_spill] sm:$0xff] %v8867_v61 }
 0x2e4   : > { %10639 = vst [vmem:[#allocation28_spill] sm:$0xff] %v8875_v3 }
 0x2e7   : > { %v2505_v5 = vpop.trf.xlu2  ;;  %v8793_v60 = vld [vmem:[#allocation3 + $0x190] sm:$0xff] }
 0x2e8   : > { %2538 = vst.msk [vmem:[#allocation3 + $0x1a8] sm:$0xff] %vm407_vm2, %v2505_v5  ;;  %v2472_v7 = vpop.trf.xlu1  ;;  %v8795_v59 = vld [vmem:[#allocation3 + $0x18f] sm:$0xff]  ;;  %v8851_v20 = vld [vmem:[#allocation3 + $0x87] sm:$0xff] }
 0x2e9   : > { %2521 = vst.msk [vmem:[#allocation3 + $0x90] sm:$0xff] %vm407_vm2, %v2472_v7  ;;  %v8849_v14 = vld [vmem:[#allocation3 + $0x88] sm:$0xff] }
 0x2ea   : > { %10629 = vst [vmem:[#allocation18_spill] sm:$0xff] %v8795_v59  ;;  %v8881_v5 = vld [vmem:[#allocation3 + $0x68] sm:$0xff] }
 0x2eb   : > { %10636 = vst [vmem:[#allocation25_spill] sm:$0xff] %v8851_v20  ;;  %v8883_v7 = vld [vmem:[#allocation3 + $0x67] sm:$0xff] }
 0x2ec   : > { %10640 = vst [vmem:[#allocation29_spill] sm:$0xff] %v8883_v7 }
 0x2ef   : > { %v2506_v11 = vpop.trf.xlu2  ;;  %v8776_v57 = vld [vmem:[#allocation3 + $0x1a8] sm:$0xff] }
 0x2f0   : > { %2539 = vst.msk [vmem:[#allocation3 + $0x1b0] sm:$0xff] %vm407_vm2, %v2506_v11  ;;  %v2473_v33 = vpop.trf.xlu1  ;;  %v8778_v10 = vld [vmem:[#allocation3 + $0x1a7] sm:$0xff]  ;;  %v8833_v30 = vld [vmem:[#allocation3 + $0x90] sm:$0xff] }
 0x2f1   : > { %2522 = vst.msk [vmem:[#allocation3 + $0xa8] sm:$0xff] %vm407_vm2, %v2473_v33  ;;  %v8835_v12 = vld [vmem:[#allocation3 + $0x8f] sm:$0xff] }
 0x2f2   : > { %10627 = vst [vmem:[#allocation16_spill] sm:$0xff] %v8778_v10  ;;  %v8889_v11 = vld [vmem:[#allocation3 + $0x130] sm:$0xff] }
 0x2f3   : > { %10634 = vst [vmem:[#allocation23_spill] sm:$0xff] %v8835_v12  ;;  %v8891_v33 = vld [vmem:[#allocation3 + $0x12f] sm:$0xff] }
 0x2f4   : > { %10641 = vst [vmem:[#allocation30_spill] sm:$0xff] %v8891_v33 }
 0x2f7   : > { %v2507_v38 = vpop.trf.xlu2  ;;  %v8759_v19 = vld [vmem:[#allocation3 + $0x1b0] sm:$0xff] }
 0x2f8   : > { %2540 = vst.msk [vmem:[#allocation3 + $0x1c8] sm:$0xff] %vm407_vm2, %v2507_v38  ;;  %v2474_v0 = vpop.trf.xlu1  ;;  %v8761_v27 = vld [vmem:[#allocation3 + $0x1af] sm:$0xff]  ;;  %v8819_v1 = vld [vmem:[#allocation3 + $0xa7] sm:$0xff] }
 0x2f9   : > { %2523 = vst.msk [vmem:[#allocation3 + $0xb0] sm:$0xff] %vm407_vm2, %v2474_v0  ;;  %v8817_v62 = vld [vmem:[#allocation3 + $0xa8] sm:$0xff]  ;;  %v8897_v38 = vld [vmem:[#allocation3 + $0x50] sm:$0xff] }
 0x2fa   : > { %10625 = vst [vmem:[#allocation14_spill] sm:$0xff] %v8761_v27  ;;  %v8899_v0 = vld [vmem:[#allocation3 + $0x4f] sm:$0xff] }
 0x2fb   : > { %10632 = vst [vmem:[#allocation21_spill] sm:$0xff] %v8819_v1 }
 0x2fc   : > { %10642 = vst [vmem:[#allocation31_spill] sm:$0xff] %v8897_v38 }
 0x2fd   : > { %10643 = vst [vmem:[#allocation32_spill] sm:$0xff] %v8899_v0 }
 0x2ff   : > { %v2508_v43 = vpop.trf.xlu2  ;;  %v8742_v17 = vld [vmem:[#allocation3 + $0x1c8] sm:$0xff] }
 0x300   : > { %2541 = vst.msk [vmem:[#allocation3 + $0x1d0] sm:$0xff] %vm407_vm2, %v2508_v43  ;;  %v2475_v31 = vpop.trf.xlu1  ;;  %v8744_v41 = vld [vmem:[#allocation3 + $0x1c7] sm:$0xff]  ;;  %v8801_v46 = vld [vmem:[#allocation3 + $0xb0] sm:$0xff] }
 0x301   : > { %2524 = vst.msk [vmem:[#allocation3 + $0xc8] sm:$0xff] %vm407_vm2, %v2475_v31  ;;  %v8803_v34 = vld [vmem:[#allocation3 + $0xaf] sm:$0xff]  ;;  %v8907_v31 = vld [vmem:[#allocation3 + $0x127] sm:$0xff] }
 0x302   : > { %10623 = vst [vmem:[#allocation8_spill] sm:$0xff] %v8744_v41  ;;  %v8905_v43 = vld [vmem:[#allocation3 + $0x128] sm:$0xff] }
 0x303   : > { %10630 = vst [vmem:[#allocation19_spill] sm:$0xff] %v8803_v34 }
 0x304   : > { %10644 = vst [vmem:[#allocation33_spill] sm:$0xff] %v8905_v43 }
 0x305   : > { %10645 = vst [vmem:[#allocation34_spill] sm:$0xff] %v8907_v31 }
 0x307   : > { %v2509_v29 = vpop.trf.xlu2  ;;  %v8725_v47 = vld [vmem:[#allocation3 + $0x1d0] sm:$0xff] }
 0x308   : > { %2542 = vst.msk [vmem:[#allocation3 + $0x1e8] sm:$0xff] %vm407_vm2, %v2509_v29  ;;  %v2476_v18 = vpop.trf.xlu1  ;;  %v8727_v28 = vld [vmem:[#allocation3 + $0x1cf] sm:$0xff]  ;;  %v8786_v58 = vld [vmem:[#allocation3 + $0xc7] sm:$0xff] }
 0x309   : > { %2525 = vst.msk [vmem:[#allocation3 + $0xd0] sm:$0xff] %vm407_vm2, %v2476_v18  ;;  %v8784_v50 = vld [vmem:[#allocation3 + $0xc8] sm:$0xff] }
 0x30a   : > { %10621 = vst [vmem:[#allocation6_spill] sm:$0xff] %v8727_v28  ;;  %v8913_v29 = vld [vmem:[#allocation3 + $0x48] sm:$0xff] }
 0x30b   : > { %10628 = vst [vmem:[#allocation17_spill] sm:$0xff] %v8786_v58  ;;  %v8915_v18 = vld [vmem:[#allocation3 + $0x47] sm:$0xff] }
 0x30c   : > { %10646 = vst [vmem:[#allocation35_spill] sm:$0xff] %v8913_v29 }
 0x30d   : > { %10647 = vst [vmem:[#allocation36_spill] sm:$0xff] %v8915_v18 }
 0x30f   : > { %v2510_v40 = vpop.trf.xlu2  ;;  %v8717_v44 = vld [vmem:[#allocation3 + $0x1e8] sm:$0xff] }
 0x310   : > { %2543 = vst.msk [vmem:[#allocation3 + $0x1f0] sm:$0xff] %vm407_vm2, %v2510_v40  ;;  %v2477_v21 = vpop.trf.xlu1  ;;  %v8719_v32 = vld [vmem:[#allocation3 + $0x1e7] sm:$0xff]  ;;  %v8767_v52 = vld [vmem:[#allocation3 + $0xd0] sm:$0xff] }
 0x311   : > { %2526 = vst.msk [vmem:[#allocation3 + $0xe8] sm:$0xff] %vm407_vm2, %v2477_v21  ;;  %v8769_v15 = vld [vmem:[#allocation3 + $0xcf] sm:$0xff] }
 0x312   : > { %10620 = vst [vmem:[#allocation5_spill] sm:$0xff] %v8719_v32 }
 0x313   : > { %10626 = vst [vmem:[#allocation15_spill] sm:$0xff] %v8769_v15 }
 0x317   : > { %v8708_v45 = vld [vmem:[#allocation3 + $0x1f0] sm:$0xff]  ;;  %v2511_v54 = vpop.trf.xlu2 }
 0x318   : > { %v8710_v26 = vld [vmem:[#allocation3 + $0x1ef] sm:$0xff]  ;;  %6567 = vmatpush.xpose.msk.msra.mxu3 %vm407_vm2, %v8708_v45  ;;  %v2478_v36 = vpop.trf.xlu1  ;;  %v8752_v16 = vld [vmem:[#allocation3 + $0xe7] sm:$0xff]  ;;  %2544 = vst.msk [vmem:[#allocation3 + $0x208] sm:$0xff] %vm407_vm2, %v2511_v54 }
 0x319   : > { %10619 = vst [vmem:[#allocation4_spill] sm:$0xff] %v8710_v26  ;;  %6603 = vmatpush.xpose.msk.msrb.mxu1 %vm407_vm2, %v8710_v26  ;;  %v8750_v2 = vld [vmem:[#allocation3 + $0xe8] sm:$0xff]  ;;  %v8947_v6 = vld [vmem:[#allocation3 + $0x1f1] sm:$0xff] }
 0x31a   : > { %2527 = vst.msk [vmem:[#allocation3 + $0xf0] sm:$0xff] %vm407_vm2, %v2478_v36  ;;  %v8929_v36 = vld [vmem:[#allocation3 + $0x30] sm:$0xff] }
 0x31b   : > { %10624 = vst [vmem:[#allocation13_spill] sm:$0xff] %v8752_v16 }
 0x31c   : > { %6568 = vmatpush.xpose.msk.msra.mxu3 %vm407_vm2, %v8717_v44  ;;  %10649 = vst [vmem:[#allocation38_spill] sm:$0xff] %v8929_v36 }
 0x31d   : > { %6604 = vmatpush.xpose.msk.msrb.mxu1 %vm407_vm2, %v8719_v32 }
 0x31f   : > { %v2512_v56 = vpop.trf.xlu2  ;;  %v8961_v4 = vld [vmem:[#allocation3 + $0x207] sm:$0xff] }
 0x320   : > { %6569 = vmatpush.xpose.msk.msra.mxu3 %vm407_vm2, %v8725_v47  ;;  %v2479_v37 = vpop.trf.xlu1  ;;  %2545 = vst.msk [vmem:[#allocation3 + $0x210] sm:$0xff] %vm407_vm2, %v2512_v56 }
 0x321   : > { %6605 = vmatpush.xpose.msk.msrb.mxu1 %vm407_vm2, %v8727_v28  ;;  %v8733_v51 = vld [vmem:[#allocation3 + $0xf0] sm:$0xff]  ;;  %2528 = vst.msk [vmem:[#allocation3 + $0x108] sm:$0xff] %vm407_vm2, %v2479_v37 }
 0x322   : > { %v8735_v25 = vld [vmem:[#allocation3 + $0xef] sm:$0xff]  ;;  %6549 = vmatpush.xpose.msk.msra.mxu2 %vm407_vm2, %v8733_v51  ;;  %10653 = vst [vmem:[#allocation42_spill] sm:$0xff] %v8961_v4 }
 0x323   : > { %10622 = vst [vmem:[#allocation7_spill] sm:$0xff] %v8735_v25  ;;  %6585 = vmatpush.xpose.msk.msrb.mxu0 %vm407_vm2, %v8735_v25  ;;  %v8931_v37 = vld [vmem:[#allocation3 + $0x2f] sm:$0xff] }
 0x324   : > { %6570 = vmatpush.xpose.msk.msra.mxu3 %vm407_vm2, %v8742_v17 }
 0x325   : > { %6606 = vmatpush.xpose.msk.msrb.mxu1 %vm407_vm2, %v8744_v41 }
 0x326   : > { %6550 = vmatpush.xpose.msk.msra.mxu2 %vm407_vm2, %v8750_v2 }
 0x327   : > { %6586 = vmatpush.xpose.msk.msrb.mxu0 %vm407_vm2, %v8752_v16  ;;  %v8937_v54 = vld [vmem:[#allocation3 + $0x20f] sm:$0xff] }
 0x328   : > { %6571 = vmatpush.xpose.msk.msra.mxu3 %vm407_vm2, %v8759_v19  ;;  %v2480_v48 = vpop.trf.xlu1  ;;  %10650 = vst [vmem:[#allocation39_spill] sm:$0xff] %v8937_v54  ;;  %v8941_v56 = vld [vmem:[#allocation3 + $0x107] sm:$0xff] }
 0x329   : > { %6607 = vmatpush.xpose.msk.msrb.mxu1 %vm407_vm2, %v8761_v27  ;;  %2529 = vst.msk [vmem:[#allocation3 + $0x110] sm:$0xff] %vm407_vm2, %v2480_v48  ;;  %v8939_v48 = vld [vmem:[#allocation3 + $0x108] sm:$0xff] }
 0x32a   : > { %6551 = vmatpush.xpose.msk.msra.mxu2 %vm407_vm2, %v8767_v52  ;;  %10651 = vst [vmem:[#allocation40_spill] sm:$0xff] %v8941_v56 }
 0x32b   : > { %6587 = vmatpush.xpose.msk.msrb.mxu0 %vm407_vm2, %v8769_v15 }
 0x32c   : > { %6572 = vmatpush.xpose.msk.msra.mxu3 %vm407_vm2, %v8776_v57 }
 0x32d   : > { %6608 = vmatpush.xpose.msk.msrb.mxu1 %vm407_vm2, %v8778_v10 }
 0x32e   : > { %6552 = vmatpush.xpose.msk.msra.mxu2 %vm407_vm2, %v8784_v50 }
 0x32f   : > { %6588 = vmatpush.xpose.msk.msrb.mxu0 %vm407_vm2, %v8786_v58 }
 0x330   : > { %6573 = vmatpush.xpose.msk.msra.mxu3 %vm407_vm2, %v8793_v60  ;;  %v8917_v40 = vld [vmem:[#allocation3 + $0x110] sm:$0xff] }
 0x331   : > { %6609 = vmatpush.xpose.msk.msrb.mxu1 %vm407_vm2, %v8795_v59  ;;  %v8923_v21 = vld [vmem:[#allocation3 + $0x10f] sm:$0xff] }
 0x332   : > { %6553 = vmatpush.xpose.msk.msra.mxu2 %vm407_vm2, %v8801_v46  ;;  %10648 = vst [vmem:[#allocation37_spill] sm:$0xff] %v8923_v21 }
 0x333   : > { %6589 = vmatpush.xpose.msk.msrb.mxu0 %vm407_vm2, %v8803_v34 }
 0x334   : > { %6574 = vmatpush.xpose.msk.msra.mxu3 %vm407_vm2, %v8809_v39 }
 0x335   : > { %6610 = vmatpush.xpose.msk.msrb.mxu1 %vm407_vm2, %v8811_v24 }
 0x336   : > { %6554 = vmatpush.xpose.msk.msra.mxu2 %vm407_vm2, %v8817_v62 }
 0x337   : > { %6590 = vmatpush.xpose.msk.msrb.mxu0 %vm407_vm2, %v8819_v1 }
 0x338   : > { %6575 = vmatpush.xpose.msk.msra.mxu3 %vm407_vm2, %v8825_v8 }
 0x339   : > { %6611 = vmatpush.xpose.msk.msrb.mxu1 %vm407_vm2, %v8827_v22 }
 0x33a   : > { %6555 = vmatpush.xpose.msk.msra.mxu2 %vm407_vm2, %v8833_v30 }
 0x33b   : > { %6591 = vmatpush.xpose.msk.msrb.mxu0 %vm407_vm2, %v8835_v12 }
 0x33c   : > { %6576 = vmatpush.xpose.msk.msra.mxu3 %vm407_vm2, %v8841_v35 }
 0x33d   : > { %6612 = vmatpush.xpose.msk.msrb.mxu1 %vm407_vm2, %v8843_v23 }
 0x33e   : > { %6556 = vmatpush.xpose.msk.msra.mxu2 %vm407_vm2, %v8849_v14 }
 0x33f   : > { %6592 = vmatpush.xpose.msk.msrb.mxu0 %vm407_vm2, %v8851_v20 }
 0x340   : > { %6577 = vmatpush.xpose.msk.msra.mxu3 %vm407_vm2, %v8857_v49 }
 0x341   : > { %6613 = vmatpush.xpose.msk.msrb.mxu1 %vm407_vm2, %v8859_v42 }
 0x342   : > { %6557 = vmatpush.xpose.msk.msra.mxu2 %vm407_vm2, %v8865_v63 }
 0x343   : > { %6593 = vmatpush.xpose.msk.msrb.mxu0 %vm407_vm2, %v8867_v61 }
 0x344   : > { %6578 = vmatpush.xpose.msk.msra.mxu3 %vm407_vm2, %v8873_v9 }
 0x345   : > { %6614 = vmatpush.xpose.msk.msrb.mxu1 %vm407_vm2, %v8875_v3 }
 0x346   : > { %6558 = vmatpush.xpose.msk.msra.mxu2 %vm407_vm2, %v8881_v5 }
 0x347   : > { %6594 = vmatpush.xpose.msk.msrb.mxu0 %vm407_vm2, %v8883_v7 }
 0x348   : > { %6579 = vmatpush.xpose.msk.msra.mxu3 %vm407_vm2, %v8889_v11 }
 0x349   : > { %6615 = vmatpush.xpose.msk.msrb.mxu1 %vm407_vm2, %v8891_v33 }
 0x34a   : > { %6559 = vmatpush.xpose.msk.msra.mxu2 %vm407_vm2, %v8897_v38  ;;  %v8979_v38 = vld [vmem:[#allocation3 + $0xf1] sm:$0xff] }
 0x34b   : > { %6595 = vmatpush.xpose.msk.msrb.mxu0 %vm407_vm2, %v8899_v0 }
 0x34c   : > { %6580 = vmatpush.xpose.msk.msra.mxu3 %vm407_vm2, %v8905_v43  ;;  %v8971_v43 = vld [vmem:[#allocation3 + $0x1d1] sm:$0xff] }
 0x34d   : > { %6616 = vmatpush.xpose.msk.msrb.mxu1 %vm407_vm2, %v8907_v31 }
 0x34e   : > { %6560 = vmatpush.xpose.msk.msra.mxu2 %vm407_vm2, %v8913_v29  ;;  %v8963_v29 = vld [vmem:[#allocation3 + $0x1e9] sm:$0xff] }
 0x34f   : > { %6596 = vmatpush.xpose.msk.msrb.mxu0 %vm407_vm2, %v8915_v18 }
 0x350   : > { %6581 = vmatpush.xpose.msk.msra.mxu3 %vm407_vm2, %v8917_v40 }
 0x351   : > { %6617 = vmatpush.xpose.msk.msrb.mxu1 %vm407_vm2, %v8923_v21 }
 0x352   : > { %6561 = vmatpush.xpose.msk.msra.mxu2 %vm407_vm2, %v8929_v36  ;;  %v2547_v36 = vld [vmem:[#allocation3 + $0xf] sm:$0xff] }
 0x353   : > { %6597 = vmatpush.xpose.msk.msrb.mxu0 %vm407_vm2, %v8931_v37 }
 0x354   : > { %6582 = vmatpush.xpose.msk.msra.mxu3 %vm407_vm2, %v8939_v48 }
 0x355   : > { %6618 = vmatpush.xpose.msk.msrb.mxu1 %vm407_vm2, %v8941_v56 }
 0x356   : > { %6562 = vmatpush.xpose.msk.msra.mxu2 %vm407_vm2, %v8953_v55  ;;  %v2580_v55 = vld [vmem:[#allocation3 + $0x8] sm:$0xff] }
 0x357   : > { %6598 = vmatpush.xpose.msk.msrb.mxu0 %vm407_vm2, %v8955_v53 }
 0x358   : > { %6641 = vmatpush.xpose.msk.msrb.mxu3 %vm407_vm2, %v8947_v6 }
 0x359   : > { %6679 = vmatpush.xpose.msk.msra.mxu1 %vm407_vm2, %v8937_v54  ;;  %v2546_v54 = vld [vmem:[#allocation3 + $0x7] sm:$0xff] }
 0x35a   : > { %6563 = vmatpush.xpose.msk.msra.mxu2 %vm407_vm2, %v2581_v13  ;;  %v8985_v13 = vld [vmem:[#allocation3 + $0x1c9] sm:$0xff] }
 0x35b   : > { %6599 = vmatpush.xpose.msk.msrb.mxu0 %vm407_vm2, %v2547_v36  ;;  %v8994_v36 = vld [vmem:[#allocation3 + $0xe9] sm:$0xff] }
 0x35c   : > { %6642 = vmatpush.xpose.msk.msrb.mxu3 %vm407_vm2, %v8963_v29 }
 0x35d   : > { %6680 = vmatpush.xpose.msk.msra.mxu1 %vm407_vm2, %v8961_v4  ;;  %v9169_v4 = vld [vmem:[#allocation3 + $0x29] sm:$0xff] }
 0x35e   : > { %6564 = vmatpush.xpose.msk.msra.mxu2 %vm407_vm2, %v2580_v55  ;;  %v6547_v55 = vld [vmem:[%s10481_s3 + $0x10] sm:$0xff] }
 0x35f   : > { %6600 = vmatpush.xpose.msk.msrb.mxu0 %vm407_vm2, %v2546_v54  ;;  %6583 = vmatmul.msk.f32.vlgmr.msra.gmra.mxu3 %vm407_vm2, %v6547_v55  ;;  %v9002_v54 = vld [vmem:[#allocation3 + $0x1b1] sm:$0xff] }
 0x360   : > { %6643 = vmatpush.xpose.msk.msrb.mxu3 %vm407_vm2, %v8971_v43 }
 0x361   : > { %6681 = vmatpush.xpose.msk.msra.mxu1 %vm407_vm2, %v8710_v26  ;;  %6565 = vmatmul.msk.f32.vlgmr.msra.gmra.mxu2 %vm407_vm2, %v6547_v55  ;;  %v9014_v55 = vld [vmem:[#allocation3 + $0x1a9] sm:$0xff]  ;;  %v6621_v26 = vld [vmem:[%s10481_s3 + $0x20] sm:$0xff] }
 0x362   : > { %6623 = vmatpush.xpose.msk.msrb.mxu2 %vm407_vm2, %v8979_v38 }
 0x363   : > { %6661 = vmatpush.xpose.msk.msra.mxu0 %vm407_vm2, %v8923_v21  ;;  %v9026_v21 = vld [vmem:[#allocation3 + $0xc9] sm:$0xff] }
 0x364   : > { %6644 = vmatpush.xpose.msk.msrb.mxu3 %vm407_vm2, %v8985_v13 }
 0x365   : > { %6682 = vmatpush.xpose.msk.msra.mxu1 %vm407_vm2, %v8719_v32  ;;  %v9008_v32 = vld [vmem:[#allocation3 + $0xd1] sm:$0xff] }
 0x366   : > { %6624 = vmatpush.xpose.msk.msrb.mxu2 %vm407_vm2, %v8994_v36 }
 0x367   : > { %6662 = vmatpush.xpose.msk.msra.mxu0 %vm407_vm2, %v8941_v56  ;;  %v2578_v56 = vld [vmem:[%s10481_s3] sm:$0xff] }
 0x368   : > { %6645 = vmatpush.xpose.msk.msrb.mxu3 %vm407_vm2, %v9002_v54  ;;  %6619 = vmatmul.msk.f32.vlgmr.msrb.gmra.mxu1 %vm407_vm2, %v2578_v56 }
 0x369   : > { %6683 = vmatpush.xpose.msk.msra.mxu1 %vm407_vm2, %v8727_v28  ;;  %v6548_v28 = vld [vmem:[%s10481_s3 + $0x18] sm:$0xff]  ;;  %6601 = vmatmul.msk.f32.vlgmr.msrb.gmra.mxu0 %vm407_vm2, %v2578_v56  ;;  %v2579_v56 = vld [vmem:[%s10481_s3 + $0x8] sm:$0xff] }
 0x36a   : > { %6625 = vmatpush.xpose.msk.msrb.mxu2 %vm407_vm2, %v9008_v32  ;;  %6584 = vmatmul.msk.f32.gmra.mxu3 %vm407_vm2, %v6548_v28 }
 0x36b   : > { %6663 = vmatpush.xpose.msk.msra.mxu0 %vm407_vm2, %v8735_v25  ;;  %6566 = vmatmul.msk.f32.gmra.mxu2 %vm407_vm2, %v6548_v28  ;;  %v9042_v25 = vld [vmem:[#allocation3 + $0xb1] sm:$0xff]  ;;  %v9054_v28 = vld [vmem:[#allocation3 + $0xa9] sm:$0xff] }
 0x36c   : > { %6646 = vmatpush.xpose.msk.msrb.mxu3 %vm407_vm2, %v9014_v55 }
 0x36d   : > { %6684 = vmatpush.xpose.msk.msra.mxu1 %vm407_vm2, %v8744_v41  ;;  %v9034_v41 = vld [vmem:[#allocation3 + $0x191] sm:$0xff] }
 0x36e   : > { %6626 = vmatpush.xpose.msk.msrb.mxu2 %vm407_vm2, %v9026_v21 }
 0x36f   : > { %6664 = vmatpush.xpose.msk.msra.mxu0 %vm407_vm2, %v8752_v16  ;;  %v9048_v16 = vld [vmem:[#allocation3 + $0x189] sm:$0xff] }
 0x370   : > { %6647 = vmatpush.xpose.msk.msrb.mxu3 %vm407_vm2, %v9034_v41  ;;  %6620 = vmatmul.msk.f32.gmra.mxu1 %vm407_vm2, %v2579_v56 }
 0x371   : > { %6685 = vmatpush.xpose.msk.msra.mxu1 %vm407_vm2, %v8761_v27  ;;  %6602 = vmatmul.msk.f32.gmra.mxu0 %vm407_vm2, %v2579_v56  ;;  %v9083_v56 = vld [vmem:[#allocation3 + $0x89] sm:$0xff]  ;;  %v9151_v27 = vld [vmem:[#allocation3 + $0x211] sm:$0xff] }
 0x372   : > { %6627 = vmatpush.xpose.msk.msrb.mxu2 %vm407_vm2, %v9042_v25 }
 0x373   : > { %6665 = vmatpush.xpose.msk.msra.mxu0 %vm407_vm2, %v8769_v15  ;;  %v9063_v15 = vld [vmem:[#allocation3 + $0x171] sm:$0xff] }
 0x374   : > { %6648 = vmatpush.xpose.msk.msrb.mxu3 %vm407_vm2, %v9048_v16 }
 0x375   : > { %6686 = vmatpush.xpose.msk.msra.mxu1 %vm407_vm2, %v8778_v10  ;;  %v9071_v10 = vld [vmem:[#allocation3 + $0x91] sm:$0xff] }
 0x376   : > { %6628 = vmatpush.xpose.msk.msrb.mxu2 %vm407_vm2, %v9054_v28 }
 0x377   : > { %6666 = vmatpush.xpose.msk.msra.mxu0 %vm407_vm2, %v8786_v58  ;;  %v9077_v58 = vld [vmem:[#allocation3 + $0x169] sm:$0xff] }
 0x378   : > { %6649 = vmatpush.xpose.msk.msrb.mxu3 %vm407_vm2, %v9063_v15 }
 0x379   : > { %6687 = vmatpush.xpose.msk.msra.mxu1 %vm407_vm2, %v8795_v59  ;;  %v9089_v59 = vld [vmem:[#allocation3 + $0x151] sm:$0xff] }
 0x37a   : > { %6629 = vmatpush.xpose.msk.msrb.mxu2 %vm407_vm2, %v9071_v10 }
 0x37b   : > { %6667 = vmatpush.xpose.msk.msra.mxu0 %vm407_vm2, %v8803_v34  ;;  %v9095_v34 = vld [vmem:[#allocation3 + $0x71] sm:$0xff] }
 0x37c   : > { %6650 = vmatpush.xpose.msk.msrb.mxu3 %vm407_vm2, %v9077_v58  ;;  %10654 = vst [vmem:[#allocation43_spill] sm:$0xff] %v9095_v34 }
 0x37d   : > { %6688 = vmatpush.xpose.msk.msra.mxu1 %vm407_vm2, %v8811_v24  ;;  %v9101_v24 = vld [vmem:[#allocation3 + $0x149] sm:$0xff] }
 0x37e   : > { %6630 = vmatpush.xpose.msk.msrb.mxu2 %vm407_vm2, %v9083_v56  ;;  %10655 = vst [vmem:[#allocation44_spill] sm:$0xff] %v9101_v24 }
 0x37f   : > { %6668 = vmatpush.xpose.msk.msra.mxu0 %vm407_vm2, %v8819_v1  ;;  %v9107_v1 = vld [vmem:[#allocation3 + $0x69] sm:$0xff] }
 0x380   : > { %6651 = vmatpush.xpose.msk.msrb.mxu3 %vm407_vm2, %v9089_v59  ;;  %10656 = vst [vmem:[#allocation45_spill] sm:$0xff] %v9107_v1 }
 0x381   : > { %6689 = vmatpush.xpose.msk.msra.mxu1 %vm407_vm2, %v8827_v22  ;;  %v9113_v22 = vld [vmem:[#allocation3 + $0x131] sm:$0xff] }
 0x382   : > { %6631 = vmatpush.xpose.msk.msrb.mxu2 %vm407_vm2, %v9095_v34 }
 0x383   : > { %6669 = vmatpush.xpose.msk.msra.mxu0 %vm407_vm2, %v8835_v12  ;;  %v9119_v12 = vld [vmem:[#allocation3 + $0x51] sm:$0xff] }
 0x384   : > { %6652 = vmatpush.xpose.msk.msrb.mxu3 %vm407_vm2, %v9101_v24  ;;  %10657 = vst [vmem:[#allocation46_spill] sm:$0xff] %v9119_v12 }
 0x385   : > { %6690 = vmatpush.xpose.msk.msra.mxu1 %vm407_vm2, %v8843_v23  ;;  %v9125_v23 = vld [vmem:[#allocation3 + $0x129] sm:$0xff] }
 0x386   : > { %6632 = vmatpush.xpose.msk.msrb.mxu2 %vm407_vm2, %v9107_v1 }
 0x387   : > { %6670 = vmatpush.xpose.msk.msra.mxu0 %vm407_vm2, %v8851_v20  ;;  %v9131_v20 = vld [vmem:[#allocation3 + $0x49] sm:$0xff] }
 0x388   : > { %6653 = vmatpush.xpose.msk.msrb.mxu3 %vm407_vm2, %v9113_v22  ;;  %10658 = vst [vmem:[#allocation47_spill] sm:$0xff] %v9131_v20 }
 0x389   : > { %6691 = vmatpush.xpose.msk.msra.mxu1 %vm407_vm2, %v8859_v42  ;;  %v9137_v42 = vld [vmem:[#allocation3 + $0x111] sm:$0xff] }
 0x38a   : > { %6633 = vmatpush.xpose.msk.msrb.mxu2 %vm407_vm2, %v9119_v12 }
 0x38b   : > { %6671 = vmatpush.xpose.msk.msra.mxu0 %vm407_vm2, %v8867_v61  ;;  %v9143_v61 = vld [vmem:[#allocation3 + $0x31] sm:$0xff] }
 0x38c   : > { %6654 = vmatpush.xpose.msk.msrb.mxu3 %vm407_vm2, %v9125_v23  ;;  %10659 = vst [vmem:[#allocation48_spill] sm:$0xff] %v9143_v61 }
 0x38d   : > { %6692 = vmatpush.xpose.msk.msra.mxu1 %vm407_vm2, %v8875_v3  ;;  %v9149_v3 = vld [vmem:[#allocation3 + $0x210] sm:$0xff] }
 0x38e   : > { %6634 = vmatpush.xpose.msk.msrb.mxu2 %vm407_vm2, %v9131_v20 }
 0x38f   : > { %6672 = vmatpush.xpose.msk.msra.mxu0 %vm407_vm2, %v8883_v7  ;;  %v9153_v7 = vld [vmem:[#allocation3 + $0x109] sm:$0xff] }
 0x390   : > { %6655 = vmatpush.xpose.msk.msrb.mxu3 %vm407_vm2, %v9137_v42 }
 0x391   : > { %6693 = vmatpush.xpose.msk.msra.mxu1 %vm407_vm2, %v8891_v33  ;;  %v9177_v33 = vld [vmem:[#allocation3 + $0x208] sm:$0xff] }
 0x392   : > { %6635 = vmatpush.xpose.msk.msrb.mxu2 %vm407_vm2, %v9143_v61  ;;  %v9179_v61 = vld [vmem:[#allocation3 + $0x209] sm:$0xff] }
 0x393   : > { %6673 = vmatpush.xpose.msk.msra.mxu0 %vm407_vm2, %v8899_v0  ;;  %v6659_v0 = vld [vmem:[%s10481_s3 + $0x30] sm:$0xff] }
 0x394   : > { %6656 = vmatpush.xpose.msk.msrb.mxu3 %vm407_vm2, %v9153_v7 }
 0x395   : > { %6694 = vmatpush.xpose.msk.msra.mxu1 %vm407_vm2, %v8907_v31  ;;  %v2912_v31 = vld [vmem:[#allocation3 + $0x11] sm:$0xff] }
 0x396   : > { %6636 = vmatpush.xpose.msk.msrb.mxu2 %vm407_vm2, %v9169_v4 }
 0x397   : > { %6674 = vmatpush.xpose.msk.msra.mxu0 %vm407_vm2, %v8915_v18  ;;  %6657 = vmatmul.msk.f32.vlgmr.msrb.gmra.mxu3 %vm407_vm2, %v6621_v26  ;;  %v2911_v18 = vld [vmem:[#allocation3 + $0x9] sm:$0xff] }
 0x398   : > { %6717 = vmatpush.xpose.msk.msra.mxu3 %vm407_vm2, %v9149_v3  ;;  %6695 = vmatmul.msk.f32.vlgmr.msra.gmra.mxu1 %vm407_vm2, %v6659_v0 }
 0x399   : > { %6755 = vmatpush.xpose.msk.msrb.mxu1 %vm407_vm2, %v9151_v27 }
 0x39a   : > { %6637 = vmatpush.xpose.msk.msrb.mxu2 %vm407_vm2, %v2912_v31  ;;  %v3691_v31 = vld [vmem:[#allocation3 + $0x22f] sm:$0xff] }
 0x39b   : > { %6675 = vmatpush.xpose.msk.msra.mxu0 %vm407_vm2, %v8931_v37  ;;  %v10661_v37 = vld [vmem:[#allocation33_spill] sm:$0xff] }
 0x39c   : > { %6718 = vmatpush.xpose.msk.msra.mxu3 %vm407_vm2, %v9177_v33 }
 0x39d   : > { %6756 = vmatpush.xpose.msk.msrb.mxu1 %vm407_vm2, %v9179_v61 }
 0x39e   : > { %6638 = vmatpush.xpose.msk.msrb.mxu2 %vm407_vm2, %v2911_v18  ;;  %v3878_v18 = vld [vmem:[#allocation3 + $0x230] sm:$0xff] }
 0x39f   : > { %6676 = vmatpush.xpose.msk.msra.mxu0 %vm407_vm2, %v8955_v53  ;;  %v6622_v53 = vld [vmem:[%s10481_s3 + $0x28] sm:$0xff] }
 0x3a0   : > { %6719 = vmatpush.xpose.msk.msra.mxu3 %vm407_vm2, %v8708_v45 }
 0x3a1   : > { %6757 = vmatpush.xpose.msk.msrb.mxu1 %vm407_vm2, %v8947_v6  ;;  %6639 = vmatmul.msk.f32.vlgmr.msrb.gmra.mxu2 %vm407_vm2, %v6621_v26  ;;  %v6660_v26 = vld [vmem:[%s10481_s3 + $0x38] sm:$0xff] }
 0x3a2   : > { %6699 = vmatpush.xpose.msk.msra.mxu2 %vm407_vm2, %v8917_v40  ;;  %6677 = vmatmul.msk.f32.vlgmr.msra.gmra.mxu0 %vm407_vm2, %v6659_v0  ;;  %v10660_v0 = vld [vmem:[#allocation31_spill] sm:$0xff] }
 0x3a3   : > { %6737 = vmatpush.xpose.msk.msrb.mxu0 %vm407_vm2, %v9137_v42  ;;  %6658 = vmatmul.msk.f32.gmra.mxu3 %vm407_vm2, %v6622_v53 }
 0x3a4   : > { %6720 = vmatpush.xpose.msk.msra.mxu3 %vm407_vm2, %v8717_v44  ;;  %6696 = vmatmul.msk.f32.gmra.mxu1 %vm407_vm2, %v6660_v26 }
 0x3a5   : > { %6758 = vmatpush.xpose.msk.msrb.mxu1 %vm407_vm2, %v8963_v29 }
 0x3a6   : > { %6700 = vmatpush.xpose.msk.msra.mxu2 %vm407_vm2, %v8939_v48 }
 0x3a7   : > { %6738 = vmatpush.xpose.msk.msrb.mxu0 %vm407_vm2, %v9153_v7 }
 0x3a8   : > { %6721 = vmatpush.xpose.msk.msra.mxu3 %vm407_vm2, %v8725_v47 }
 0x3a9   : > { %6759 = vmatpush.xpose.msk.msrb.mxu1 %vm407_vm2, %v8971_v43  ;;  %6640 = vmatmul.msk.f32.gmra.mxu2 %vm407_vm2, %v6622_v53  ;;  %v6697_v53 = vld [vmem:[%s10481_s3 + $0x40] sm:$0xff] }
 0x3aa   : > { %6701 = vmatpush.xpose.msk.msra.mxu2 %vm407_vm2, %v8733_v51  ;;  %6678 = vmatmul.msk.f32.gmra.mxu0 %vm407_vm2, %v6660_v26  ;;  %v6735_v26 = vld [vmem:[%s10481_s3 + $0x50] sm:$0xff] }
 0x3ab   : > { %6739 = vmatpush.xpose.msk.msrb.mxu0 %vm407_vm2, %v8979_v38 }
 0x3ac   : > { %6722 = vmatpush.xpose.msk.msra.mxu3 %vm407_vm2, %v8742_v17 }
 0x3ad   : > { %6760 = vmatpush.xpose.msk.msrb.mxu1 %vm407_vm2, %v8985_v13 }
 0x3ae   : > { %6702 = vmatpush.xpose.msk.msra.mxu2 %vm407_vm2, %v8750_v2 }
 0x3af   : > { %6740 = vmatpush.xpose.msk.msrb.mxu0 %vm407_vm2, %v8994_v36 }
 0x3b0   : > { %6723 = vmatpush.xpose.msk.msra.mxu3 %vm407_vm2, %v8759_v19 }
 0x3b1   : > { %6761 = vmatpush.xpose.msk.msrb.mxu1 %vm407_vm2, %v9002_v54 }
 0x3b2   : > { %6703 = vmatpush.xpose.msk.msra.mxu2 %vm407_vm2, %v8767_v52 }
 0x3b3   : > { %6741 = vmatpush.xpose.msk.msrb.mxu0 %vm407_vm2, %v9008_v32 }
 0x3b4   : > { %6724 = vmatpush.xpose.msk.msra.mxu3 %vm407_vm2, %v8776_v57 }
 0x3b5   : > { %6762 = vmatpush.xpose.msk.msrb.mxu1 %vm407_vm2, %v9014_v55 }
 0x3b6   : > { %6704 = vmatpush.xpose.msk.msra.mxu2 %vm407_vm2, %v8784_v50 }
 0x3b7   : > { %6742 = vmatpush.xpose.msk.msrb.mxu0 %vm407_vm2, %v9026_v21 }
 0x3b8   : > { %6725 = vmatpush.xpose.msk.msra.mxu3 %vm407_vm2, %v8793_v60 }
 0x3b9   : > { %6763 = vmatpush.xpose.msk.msrb.mxu1 %vm407_vm2, %v9034_v41 }
 0x3ba   : > { %6705 = vmatpush.xpose.msk.msra.mxu2 %vm407_vm2, %v8801_v46 }
 0x3bb   : > { %6743 = vmatpush.xpose.msk.msrb.mxu0 %vm407_vm2, %v9042_v25 }
 0x3bc   : > { %6726 = vmatpush.xpose.msk.msra.mxu3 %vm407_vm2, %v8809_v39 }
 0x3bd   : > { %6764 = vmatpush.xpose.msk.msrb.mxu1 %vm407_vm2, %v9048_v16 }
 0x3be   : > { %6706 = vmatpush.xpose.msk.msra.mxu2 %vm407_vm2, %v8817_v62 }
 0x3bf   : > { %6744 = vmatpush.xpose.msk.msrb.mxu0 %vm407_vm2, %v9054_v28 }
 0x3c0   : > { %6727 = vmatpush.xpose.msk.msra.mxu3 %vm407_vm2, %v8825_v8 }
 0x3c1   : > { %6765 = vmatpush.xpose.msk.msrb.mxu1 %vm407_vm2, %v9063_v15 }
 0x3c2   : > { %6707 = vmatpush.xpose.msk.msra.mxu2 %vm407_vm2, %v8833_v30 }
 0x3c3   : > { %6745 = vmatpush.xpose.msk.msrb.mxu0 %vm407_vm2, %v9071_v10 }
 0x3c4   : > { %6728 = vmatpush.xpose.msk.msra.mxu3 %vm407_vm2, %v8841_v35 }
 0x3c5   : > { %6766 = vmatpush.xpose.msk.msrb.mxu1 %vm407_vm2, %v9077_v58 }
 0x3c6   : > { %6708 = vmatpush.xpose.msk.msra.mxu2 %vm407_vm2, %v8849_v14 }
 0x3c7   : > { %6746 = vmatpush.xpose.msk.msrb.mxu0 %vm407_vm2, %v9083_v56 }
 0x3c8   : > { %6729 = vmatpush.xpose.msk.msra.mxu3 %vm407_vm2, %v8857_v49 }
 0x3c9   : > { %6767 = vmatpush.xpose.msk.msrb.mxu1 %vm407_vm2, %v9089_v59 }
 0x3ca   : > { %6709 = vmatpush.xpose.msk.msra.mxu2 %vm407_vm2, %v8865_v63 }
 0x3cb   : > { %6747 = vmatpush.xpose.msk.msrb.mxu0 %vm407_vm2, %v9095_v34  ;;  %v10663_v34 = vld [vmem:[#allocation38_spill] sm:$0xff] }
 0x3cc   : > { %6730 = vmatpush.xpose.msk.msra.mxu3 %vm407_vm2, %v8873_v9 }
 0x3cd   : > { %6768 = vmatpush.xpose.msk.msrb.mxu1 %vm407_vm2, %v9101_v24  ;;  %v3877_v24 = vld [vmem:[#allocation3 + $0x228] sm:$0xff] }
 0x3ce   : > { %6710 = vmatpush.xpose.msk.msra.mxu2 %vm407_vm2, %v8881_v5 }
 0x3cf   : > { %6748 = vmatpush.xpose.msk.msrb.mxu0 %vm407_vm2, %v9107_v1  ;;  %v3690_v1 = vld [vmem:[#allocation3 + $0x227] sm:$0xff] }
 0x3d0   : > { %6731 = vmatpush.xpose.msk.msra.mxu3 %vm407_vm2, %v8889_v11 }
 0x3d1   : > { %6769 = vmatpush.xpose.msk.msrb.mxu1 %vm407_vm2, %v9113_v22 }
 0x3d2   : > { %6711 = vmatpush.xpose.msk.msra.mxu2 %vm407_vm2, %v10660_v0 }
 0x3d3   : > { %6749 = vmatpush.xpose.msk.msrb.mxu0 %vm407_vm2, %v9119_v12  ;;  %v10662_v12 = vld [vmem:[#allocation35_spill] sm:$0xff] }
 0x3d4   : > { %6732 = vmatpush.xpose.msk.msra.mxu3 %vm407_vm2, %v10661_v37 }
 0x3d5   : > { %6770 = vmatpush.xpose.msk.msrb.mxu1 %vm407_vm2, %v9125_v23 }
 0x3d6   : > { %6712 = vmatpush.xpose.msk.msra.mxu2 %vm407_vm2, %v10662_v12 }
 0x3d7   : > { %6750 = vmatpush.xpose.msk.msrb.mxu0 %vm407_vm2, %v9131_v20  ;;  %6733 = vmatmul.msk.f32.vlgmr.msra.gmra.mxu3 %vm407_vm2, %v6697_v53  ;;  %v10665_v20 = vld [vmem:[#allocation39_spill] sm:$0xff] }
 0x3d8   : > { %6793 = vmatpush.xpose.msk.msrb.mxu3 %vm407_vm2, %v3691_v31  ;;  %6771 = vmatmul.msk.f32.vlgmr.msrb.gmra.mxu1 %vm407_vm2, %v6735_v26  ;;  %v10664_v31 = vld [vmem:[#allocation48_spill] sm:$0xff] }
 0x3d9   : > { %6831 = vmatpush.xpose.msk.msra.mxu1 %vm407_vm2, %v3878_v18  ;;  %v6698_v18 = vld [vmem:[%s10481_s3 + $0x48] sm:$0xff] }
 0x3da   : > { %6713 = vmatpush.xpose.msk.msra.mxu2 %vm407_vm2, %v10663_v34  ;;  %v10667_v34 = vld [vmem:[#allocation30_spill] sm:$0xff] }
 0x3db   : > { %6751 = vmatpush.xpose.msk.msrb.mxu0 %vm407_vm2, %v10664_v31  ;;  %v6774_v31 = vld [vmem:[%s10481_s3 + $0x68] sm:$0xff] }
 0x3dc   : > { %6794 = vmatpush.xpose.msk.msrb.mxu3 %vm407_vm2, %v3690_v1  ;;  %v10666_v1 = vld [vmem:[#allocation41_spill] sm:$0xff] }
 0x3dd   : > { %6832 = vmatpush.xpose.msk.msra.mxu1 %vm407_vm2, %v3877_v24  ;;  %v6736_v24 = vld [vmem:[%s10481_s3 + $0x58] sm:$0xff] }
 0x3de   : > { %6714 = vmatpush.xpose.msk.msra.mxu2 %vm407_vm2, %v10666_v1 }
 0x3df   : > { %6752 = vmatpush.xpose.msk.msrb.mxu0 %vm407_vm2, %v9169_v4  ;;  %6734 = vmatmul.msk.f32.gmra.mxu3 %vm407_vm2, %v6698_v18  ;;  %v10669_v4 = vld [vmem:[#allocation34_spill] sm:$0xff] }
 0x3e0   : > { %6795 = vmatpush.xpose.msk.msrb.mxu3 %vm407_vm2, %v10665_v20  ;;  %6772 = vmatmul.msk.f32.gmra.mxu1 %vm407_vm2, %v6736_v24  ;;  %v10668_v20 = vld [vmem:[#allocation42_spill] sm:$0xff] }
 0x3e1   : > { %6833 = vmatpush.xpose.msk.msra.mxu1 %vm407_vm2, %v9149_v3  ;;  %6715 = vmatmul.msk.f32.vlgmr.msra.gmra.mxu2 %vm407_vm2, %v6697_v53  ;;  %v10670_v3 = vld [vmem:[#allocation4_spill] sm:$0xff]  ;;  %v10677_v53 = vld [vmem:[#allocation13_spill] sm:$0xff] }
 0x3e2   : > { %6775 = vmatpush.xpose.msk.msrb.mxu2 %vm407_vm2, %v10667_v34  ;;  %6753 = vmatmul.msk.f32.vlgmr.msrb.gmra.mxu0 %vm407_vm2, %v6735_v26  ;;  %v10693_v26 = vld [vmem:[#allocation29_spill] sm:$0xff] }
 0x3e3   : > { %6813 = vmatpush.xpose.msk.msra.mxu0 %vm407_vm2, %v8889_v11  ;;  %v10671_v11 = vld [vmem:[#allocation37_spill] sm:$0xff] }
 0x3e4   : > { %6796 = vmatpush.xpose.msk.msrb.mxu3 %vm407_vm2, %v10668_v20 }
 0x3e5   : > { %6834 = vmatpush.xpose.msk.msra.mxu1 %vm407_vm2, %v9177_v33  ;;  %v10672_v33 = vld [vmem:[#allocation5_spill] sm:$0xff] }
 0x3e6   : > { %6776 = vmatpush.xpose.msk.msrb.mxu2 %vm407_vm2, %v10669_v4 }
 0x3e7   : > { %6814 = vmatpush.xpose.msk.msra.mxu0 %vm407_vm2, %v10661_v37  ;;  %v10673_v37 = vld [vmem:[#allocation40_spill] sm:$0xff] }
 0x3e8   : > { %6797 = vmatpush.xpose.msk.msrb.mxu3 %vm407_vm2, %v10670_v3 }
 0x3e9   : > { %6835 = vmatpush.xpose.msk.msra.mxu1 %vm407_vm2, %v8708_v45  ;;  %6716 = vmatmul.msk.f32.gmra.mxu2 %vm407_vm2, %v6698_v18  ;;  %v10674_v45 = vld [vmem:[#allocation6_spill] sm:$0xff]  ;;  %v10695_v18 = vld [vmem:[#allocation36_spill] sm:$0xff] }
 0x3ea   : > { %6777 = vmatpush.xpose.msk.msrb.mxu2 %vm407_vm2, %v10671_v11  ;;  %6754 = vmatmul.msk.f32.gmra.mxu0 %vm407_vm2, %v6736_v24 }
 0x3eb   : > { %6815 = vmatpush.xpose.msk.msra.mxu0 %vm407_vm2, %v8917_v40  ;;  %v10675_v40 = vld [vmem:[#allocation7_spill] sm:$0xff] }
 0x3ec   : > { %6798 = vmatpush.xpose.msk.msrb.mxu3 %vm407_vm2, %v10672_v33 }
 0x3ed   : > { %6836 = vmatpush.xpose.msk.msra.mxu1 %vm407_vm2, %v8717_v44  ;;  %v10676_v44 = vld [vmem:[#allocation8_spill] sm:$0xff] }
 0x3ee   : > { %6778 = vmatpush.xpose.msk.msrb.mxu2 %vm407_vm2, %v10673_v37 }
 0x3ef   : > { %6816 = vmatpush.xpose.msk.msra.mxu0 %vm407_vm2, %v8939_v48  ;;  %v10678_v48 = vld [vmem:[#allocation14_spill] sm:$0xff] }
 0x3f0   : > { %6799 = vmatpush.xpose.msk.msrb.mxu3 %vm407_vm2, %v10674_v45 }
 0x3f1   : > { %6837 = vmatpush.xpose.msk.msra.mxu1 %vm407_vm2, %v8725_v47  ;;  %v10679_v47 = vld [vmem:[#allocation15_spill] sm:$0xff] }
 0x3f2   : > { %6779 = vmatpush.xpose.msk.msrb.mxu2 %vm407_vm2, %v10675_v40 }
 0x3f3   : > { %6817 = vmatpush.xpose.msk.msra.mxu0 %vm407_vm2, %v8733_v51  ;;  %v10680_v51 = vld [vmem:[#allocation16_spill] sm:$0xff] }
 0x3f4   : > { %6800 = vmatpush.xpose.msk.msrb.mxu3 %vm407_vm2, %v10676_v44 }
 0x3f5   : > { %6838 = vmatpush.xpose.msk.msra.mxu1 %vm407_vm2, %v8742_v17  ;;  %v10681_v17 = vld [vmem:[#allocation17_spill] sm:$0xff] }
 0x3f6   : > { %6780 = vmatpush.xpose.msk.msrb.mxu2 %vm407_vm2, %v10677_v53 }
 0x3f7   : > { %6818 = vmatpush.xpose.msk.msra.mxu0 %vm407_vm2, %v8750_v2  ;;  %v10682_v2 = vld [vmem:[#allocation18_spill] sm:$0xff] }
 0x3f8   : > { %6801 = vmatpush.xpose.msk.msrb.mxu3 %vm407_vm2, %v10678_v48 }
 0x3f9   : > { %6839 = vmatpush.xpose.msk.msra.mxu1 %vm407_vm2, %v8759_v19  ;;  %v10683_v19 = vld [vmem:[#allocation19_spill] sm:$0xff] }
 0x3fa   : > { %6781 = vmatpush.xpose.msk.msrb.mxu2 %vm407_vm2, %v10679_v47 }
 0x3fb   : > { %6819 = vmatpush.xpose.msk.msra.mxu0 %vm407_vm2, %v8767_v52  ;;  %v10684_v52 = vld [vmem:[#allocation20_spill] sm:$0xff] }
 0x3fc   : > { %6802 = vmatpush.xpose.msk.msrb.mxu3 %vm407_vm2, %v10680_v51 }
 0x3fd   : > { %6840 = vmatpush.xpose.msk.msra.mxu1 %vm407_vm2, %v8776_v57  ;;  %v10685_v57 = vld [vmem:[#allocation21_spill] sm:$0xff] }
 0x3fe   : > { %6782 = vmatpush.xpose.msk.msrb.mxu2 %vm407_vm2, %v10681_v17 }
 0x3ff   : > { %6820 = vmatpush.xpose.msk.msra.mxu0 %vm407_vm2, %v8784_v50  ;;  %v10686_v50 = vld [vmem:[#allocation22_spill] sm:$0xff] }
 0x400   : > { %6803 = vmatpush.xpose.msk.msrb.mxu3 %vm407_vm2, %v10682_v2 }
 0x401   : > { %6841 = vmatpush.xpose.msk.msra.mxu1 %vm407_vm2, %v8793_v60  ;;  %v10687_v60 = vld [vmem:[#allocation23_spill] sm:$0xff] }
 0x402   : > { %6783 = vmatpush.xpose.msk.msrb.mxu2 %vm407_vm2, %v10683_v19 }
 0x403   : > { %6821 = vmatpush.xpose.msk.msra.mxu0 %vm407_vm2, %v8801_v46  ;;  %v10688_v46 = vld [vmem:[#allocation24_spill] sm:$0xff] }
 0x404   : > { %6804 = vmatpush.xpose.msk.msrb.mxu3 %vm407_vm2, %v10684_v52 }
 0x405   : > { %6842 = vmatpush.xpose.msk.msra.mxu1 %vm407_vm2, %v8809_v39  ;;  %v10689_v39 = vld [vmem:[#allocation25_spill] sm:$0xff] }
 0x406   : > { %6784 = vmatpush.xpose.msk.msrb.mxu2 %vm407_vm2, %v10685_v57 }
 0x407   : > { %6822 = vmatpush.xpose.msk.msra.mxu0 %vm407_vm2, %v8817_v62  ;;  %v10690_v62 = vld [vmem:[#allocation26_spill] sm:$0xff] }
 0x408   : > { %6805 = vmatpush.xpose.msk.msrb.mxu3 %vm407_vm2, %v10686_v50 }
 0x409   : > { %6843 = vmatpush.xpose.msk.msra.mxu1 %vm407_vm2, %v8825_v8  ;;  %v10691_v8 = vld [vmem:[#allocation27_spill] sm:$0xff] }
 0x40a   : > { %6785 = vmatpush.xpose.msk.msrb.mxu2 %vm407_vm2, %v10687_v60 }
 0x40b   : > { %6823 = vmatpush.xpose.msk.msra.mxu0 %vm407_vm2, %v8833_v30  ;;  %v4065_v30 = vld [vmem:[#allocation3 + $0x231] sm:$0xff] }
 0x40c   : > { %6806 = vmatpush.xpose.msk.msrb.mxu3 %vm407_vm2, %v10688_v46 }
 0x40d   : > { %6844 = vmatpush.xpose.msk.msra.mxu1 %vm407_vm2, %v8841_v35  ;;  %v10692_v35 = vld [vmem:[#allocation28_spill] sm:$0xff] }
 0x40e   : > { %6786 = vmatpush.xpose.msk.msrb.mxu2 %vm407_vm2, %v10689_v39 }
 0x40f   : > { %6824 = vmatpush.xpose.msk.msra.mxu0 %vm407_vm2, %v8849_v14  ;;  %v6773_v14 = vld [vmem:[%s10481_s3 + $0x60] sm:$0xff] }
 0x410   : > { %6807 = vmatpush.xpose.msk.msrb.mxu3 %vm407_vm2, %v10690_v62 }
 0x411   : > { %6845 = vmatpush.xpose.msk.msra.mxu1 %vm407_vm2, %v8857_v49  ;;  %v6811_v49 = vld [vmem:[%s10481_s3 + $0x70] sm:$0xff] }
 0x412   : > { %6787 = vmatpush.xpose.msk.msrb.mxu2 %vm407_vm2, %v10691_v8 }
 0x413   : > { %6825 = vmatpush.xpose.msk.msra.mxu0 %vm407_vm2, %v8865_v63  ;;  %v4064_v63 = vld [vmem:[#allocation3 + $0x229] sm:$0xff] }
 0x414   : > { %6808 = vmatpush.xpose.msk.msrb.mxu3 %vm407_vm2, %v10692_v35 }
 0x415   : > { %6846 = vmatpush.xpose.msk.msra.mxu1 %vm407_vm2, %v8873_v9  ;;  %v10694_v9 = vld [vmem:[#allocation32_spill] sm:$0xff] }
 0x416   : > { %6788 = vmatpush.xpose.msk.msrb.mxu2 %vm407_vm2, %v10693_v26 }
 0x417   : > { %6809 = vmatmul.msk.f32.vlgmr.msrb.gmra.mxu3 %vm407_vm2, %v6773_v14  ;;  %6826 = vmatpush.xpose.msk.msra.mxu0 %vm407_vm2, %v8881_v5  ;;  %v6812_v5 = vld [vmem:[%s10481_s3 + $0x78] sm:$0xff] }
 0x418   : > { %6869 = vmatpush.xpose.msk.msra.mxu3 %vm407_vm2, %v4065_v30  ;;  %6847 = vmatmul.msk.f32.vlgmr.msra.gmra.mxu1 %vm407_vm2, %v6811_v49 }
 0x41a   : > { %6789 = vmatpush.xpose.msk.msrb.mxu2 %vm407_vm2, %v10694_v9  ;;  %v4226_v9 = vpop.permute.xlu0 %4225 }
 0x41b   : > { %6827 = vmatpush.xpose.msk.msra.mxu0 %vm407_vm2, %v10660_v0 }
 0x41c   : > { %6870 = vmatpush.xpose.msk.msra.mxu3 %vm407_vm2, %v4064_v63 }
 0x41e   : > { %6790 = vmatpush.xpose.msk.msrb.mxu2 %vm407_vm2, %v10695_v18 }
 0x41f   : > { %6810 = vmatmul.msk.f32.gmra.mxu3 %vm407_vm2, %v6774_v31  ;;  %6828 = vmatpush.xpose.msk.msra.mxu0 %vm407_vm2, %v10662_v12  ;;  %v9567_v12 = vpop.f32.mrf.mxu2 }
 0x420   : > { %6871 = vmatpush.xpose.msk.msra.mxu3 %vm407_vm2, %v9151_v27  ;;  %6848 = vmatmul.msk.f32.gmra.mxu1 %vm407_vm2, %v6812_v5  ;;  %v10698_v27 = vld [vmem:[#allocation45_spill] sm:$0xff]  ;;  %10702 = vst [vmem:[#allocation33_spill] sm:$0xff] %v9567_v12 }
 0x421   : > { %6791 = vmatmul.msk.f32.vlgmr.msrb.gmra.mxu2 %vm407_vm2, %v6773_v14 }
 0x422   : > { %6851 = vmatpush.xpose.msk.msra.mxu2 %vm407_vm2, %v9113_v22  ;;  %6829 = vmatmul.msk.f32.vlgmr.msra.gmra.mxu0 %vm407_vm2, %v6811_v49 }
 0x424   : > { %6872 = vmatpush.xpose.msk.msra.mxu3 %vm407_vm2, %v9179_v61 }
 0x426   : > { %6852 = vmatpush.xpose.msk.msra.mxu2 %vm407_vm2, %v9125_v23  ;;  %v9569_v23 = vpop.f32.mrf.mxu1 }
 0x427   : > { %10703 = vst [vmem:[#allocation35_spill] sm:$0xff] %v9569_v23  ;;  %v2734_v61 = vpop.f32.mrf.mxu2  ;;  %v4337_v23 = vld [vmem:[#allocation3 + $0x7] sm:$0xff] }
 0x428   : > { %6873 = vmatpush.xpose.msk.msra.mxu3 %vm407_vm2, %v8947_v6  ;;  %v4222_v6 = vld [vmem:[%s10482_s4 + $0x8] sm:$0xff] }
 0x429   : > { %6792 = vmatmul.msk.f32.gmra.mxu2 %vm407_vm2, %v6774_v31  ;;  %4230 = vperm.xlu1 %7244, %v4222_v6  }
 0x42a   : > { %6853 = vmatpush.xpose.msk.msra.mxu2 %vm407_vm2, %v9137_v42  ;;  %6830 = vmatmul.msk.f32.gmra.mxu0 %vm407_vm2, %v6812_v5 }
 0x42c   : > { %6874 = vmatpush.xpose.msk.msra.mxu3 %vm407_vm2, %v8963_v29 }
 0x42e   : > { %6854 = vmatpush.xpose.msk.msra.mxu2 %vm407_vm2, %v9153_v7  ;;  %v2905_v7 = vpop.f32.mrf.mxu1 }
 0x42f   : > { %v2737_v29 = vpop.f32.mrf.mxu2 }
 0x430   : > { %6875 = vmatpush.xpose.msk.msra.mxu3 %vm407_vm2, %v8971_v43 }
 0x432   : > { %6855 = vmatpush.xpose.msk.msra.mxu2 %vm407_vm2, %v8979_v38  ;;  %v9571_v38 = vpop.f32.mrf.mxu0 }
 0x433   : > { %10704 = vst [vmem:[#allocation38_spill] sm:$0xff] %v9571_v38  ;;  %v4523_v38 = vld [vmem:[#allocation3 + $0x8] sm:$0xff] }
 0x434   : > { %6876 = vmatpush.xpose.msk.msra.mxu3 %vm407_vm2, %v8985_v13 }
 0x436   : > { %6856 = vmatpush.xpose.msk.msra.mxu2 %vm407_vm2, %v8994_v36 }
 0x438   : > { %6877 = vmatpush.xpose.msk.msra.mxu3 %vm407_vm2, %v9002_v54  ;;  %v3065_v54 = vpop.f32.mrf.mxu2 }
 0x43a   : > { %6857 = vmatpush.xpose.msk.msra.mxu2 %vm407_vm2, %v9008_v32  ;;  %v6040_v32 = vld [vmem:[%s10486_s8] sm:$0x1f]  ;;  %v2882_v13 = vpop.f32.mrf.mxu0 }
 0x43b   : > { %6043 = vperm.xlu1 %7244, %v6040_v32   ;;  %v2883_v51 = vadd.f32 %v2882_v13, %v2734_v61 }
 0x43c   : > { %6878 = vmatpush.xpose.msk.msra.mxu3 %vm407_vm2, %v9014_v55 }
 0x43d   : > { %v3094_v57 = vadd.f32 %v3065_v54, %v2883_v51 }
 0x43e   : > { %6858 = vmatpush.xpose.msk.msra.mxu2 %vm407_vm2, %v9026_v21  ;;  %v2908_v21 = vpop.f32.mrf.mxu1 }
 0x440   : > { %6879 = vmatpush.xpose.msk.msra.mxu3 %vm407_vm2, %v9034_v41  ;;  %v10697_v41 = vld [vmem:[#allocation44_spill] sm:$0xff]  ;;  %v3068_v0 = vpop.f32.mrf.mxu2 }
 0x442   : > { %6859 = vmatpush.xpose.msk.msra.mxu2 %vm407_vm2, %v9042_v25  ;;  %v10696_v25 = vld [vmem:[#allocation43_spill] sm:$0xff] }
 0x444   : > { %6880 = vmatpush.xpose.msk.msra.mxu3 %vm407_vm2, %v9048_v16  ;;  %v6849_v16 = vld [vmem:[%s10481_s3 + $0x80] sm:$0xff] }
 0x446   : > { %6860 = vmatpush.xpose.msk.msra.mxu2 %vm407_vm2, %v9054_v28  ;;  %v3275_v55 = vpop.f32.mrf.mxu1  ;;  %v2885_v28 = vpop.f32.mrf.mxu0 }
 0x447   : > { %v2886_v8 = vadd.f32 %v2885_v28, %v2737_v29 }
 0x448   : > { %6881 = vmatpush.xpose.msk.msra.mxu3 %vm407_vm2, %v9063_v15  ;;  %v10699_v15 = vld [vmem:[#allocation46_spill] sm:$0xff] }
 0x449   : > { %v3096_v31 = vadd.f32 %v3068_v0, %v2886_v8 }
 0x44a   : > { %6861 = vmatpush.xpose.msk.msra.mxu2 %vm407_vm2, %v9071_v10  ;;  %v6850_v10 = vld [vmem:[%s10481_s3 + $0x88] sm:$0xff] }
 0x44c   : > { %6882 = vmatpush.xpose.msk.msra.mxu3 %vm407_vm2, %v9077_v58  ;;  %v10700_v58 = vld [vmem:[#allocation47_spill] sm:$0xff] }
 0x44e   : > { %6862 = vmatpush.xpose.msk.msra.mxu2 %vm407_vm2, %v9083_v56  ;;  %v3278_v24 = vpop.f32.mrf.mxu1  ;;  %v3252_v1 = vpop.f32.mrf.mxu0 }
 0x44f   : > { %v3281_v30 = vadd.f32 %v3252_v1, %v3094_v57 }
 0x450   : > { %6883 = vmatpush.xpose.msk.msra.mxu3 %vm407_vm2, %v9089_v59  ;;  %v9565_v59 = vpop.f32.mrf.mxu3 }
 0x451   : > { %10701 = vst [vmem:[#allocation31_spill] sm:$0xff] %v9565_v59 }
 0x452   : > { %6863 = vmatpush.xpose.msk.msra.mxu2 %vm407_vm2, %v10696_v25 }
 0x454   : > { %6884 = vmatpush.xpose.msk.msra.mxu3 %vm407_vm2, %v10697_v41 }
 0x456   : > { %6864 = vmatpush.xpose.msk.msra.mxu2 %vm407_vm2, %v10698_v27  ;;  %v3649_v4 = vpop.f32.mrf.mxu1  ;;  %v3255_v3 = vpop.f32.mrf.mxu0 }
 0x457   : > { %6885 = vmatmul.msk.f32.vlgmr.msra.gmra.mxu3 %vm407_vm2, %v6849_v16  ;;  %v3283_v27 = vadd.f32 %v3255_v3, %v3096_v31 }
 0x458   : > { %v2757_v22 = vpop.f32.mrf.mxu3 }
 0x459   : > { %v2906_v11 = vadd.f32 %v2905_v7, %v2757_v22 }
 0x45a   : > { %6865 = vmatpush.xpose.msk.msra.mxu2 %vm407_vm2, %v10699_v15 }
 0x45e   : > { %6866 = vmatpush.xpose.msk.msra.mxu2 %vm407_vm2, %v10700_v58  ;;  %v3652_v40 = vpop.f32.mrf.mxu1 }
 0x45f   : > { %6886 = vmatmul.msk.f32.gmra.mxu3 %vm407_vm2, %v6850_v10  ;;  %v3626_v48 = vpop.f32.mrf.mxu0 }
 0x460   : > { %v2760_v42 = vpop.f32.mrf.mxu3 }
 0x461   : > { %6867 = vmatmul.msk.f32.vlgmr.msra.gmra.mxu2 %vm407_vm2, %v6849_v16  ;;  %v2909_v44 = vadd.f32 %v2908_v21, %v2760_v42 }
 0x464   : > { %v3439_v20 = vpop.f32.mrf.mxu2 }
 0x465   : > { %v3468_v14 = vadd.f32 %v3439_v20, %v3281_v30 }
 0x467   : > { %v3629_v62 = vpop.f32.mrf.mxu0  ;;  %v3655_v32 = vadd.f32 %v3626_v48, %v3468_v14 }
 0x468   : > { %v3088_v43 = vpop.f32.mrf.mxu3 }
 0x469   : > { %6868 = vmatmul.msk.f32.gmra.mxu2 %vm407_vm2, %v6850_v10  ;;  %v3095_v37 = vadd.f32 %v3088_v43, %v2906_v11 }
 0x46b   : > { %v3282_v53 = vadd.f32 %v3275_v55, %v3095_v37 }
 0x46c   : > { %v3442_v45 = vpop.f32.mrf.mxu2 }
 0x46d   : > { %v3470_v58 = vadd.f32 %v3442_v45, %v3283_v27 }
 0x46f   : > { %v3657_v21 = vadd.f32 %v3629_v62, %v3470_v58 }
 0x470   : > { %v3091_v36 = vpop.f32.mrf.mxu3 }
 0x471   : > { %v3097_v17 = vadd.f32 %v3091_v36, %v2909_v44 }
 0x473   : > { %v3284_v60 = vadd.f32 %v3278_v24, %v3097_v17 }
 0x478   : > { %v3462_v56 = vpop.f32.mrf.mxu3 }
 0x479   : > { %v3469_v47 = vadd.f32 %v3462_v56, %v3282_v53 }
 0x47b   : > { %v3656_v19 = vadd.f32 %v3649_v4, %v3469_v47  ;;  %v10705_v4 = vmov 0  }
 0x480   : > { %v3465_v34 = vpop.f32.mrf.mxu3 }
 0x481   : > { %v3471_v39 = vadd.f32 %v3465_v34, %v3284_v60 }
 0x483   : > { %v3658_v26 = vadd.f32 %v3652_v40, %v3471_v39 }
 0x495   : > { %v4024_v50 = vpop.f32.mrf.mxu1 }
 0x49a   : > { %v3837_v33 = vpop.f32.mrf.mxu3 }
 0x49b   : > { %v3844_v46 = vadd.f32 %v3837_v33, %v3656_v19  ;;  %v4231_v7 = vpop.permute.xlu1 %4230 }
 0x49d   : > { %v4031_v35 = vadd.f32 %v4024_v50, %v3844_v46  ;;  %v4027_v25 = vpop.f32.mrf.mxu1  ;;  %v6020_v50 = vld [vmem:[%s10484_s6 + $0x8] sm:$0xff] }
 0x49f   : > { %v4001_v41 = vpop.f32.mrf.mxu0 }
 0x4a2   : > { %v3840_v2 = vpop.f32.mrf.mxu3 }
 0x4a3   : > { %v3846_v5 = vadd.f32 %v3840_v2, %v3658_v26 }
 0x4a4   : > { %v3814_v52 = vpop.f32.mrf.mxu2 }
 0x4a5   : > { %v3843_v15 = vadd.f32 %v3814_v52, %v3655_v32  ;;  %v4033_v10 = vadd.f32 %v4027_v25, %v3846_v5 }
 0x4a7   : > { %v4030_v61 = vadd.f32 %v4001_v41, %v3843_v15  ;;  %v4004_v28 = vpop.f32.mrf.mxu0 }
 0x4ac   : > { %v3817_v18 = vpop.f32.mrf.mxu2 }
 0x4ad   : > { %v3845_v54 = vadd.f32 %v3817_v18, %v3657_v21 }
 0x4af   : > { %v4032_v0 = vadd.f32 %v4004_v28, %v3845_v54 }
 0x4da   : > { %v4211_v49 = vpop.f32.mrf.mxu3 }
 0x4db   : > { %v4218_v63 = vadd.f32 %v4211_v49, %v4031_v35 }
 0x4dd   : > { %v4234_v6 = vadd.f32 %v4226_v9, %v4218_v63 }
 0x4df   : > { %v4238_v16 = vmax.f32 %v4234_v6, 0.0 }
 0x4e1   : > { %4273 = vxpose.xlu0.b32.start [1/2] (short) %v4238_v16, 128 }
 0x4e2   : > { %v4214_v22 = vpop.f32.mrf.mxu3 }
 0x4e3   : > { %v4220_v42 = vadd.f32 %v4214_v22, %v4033_v10 }
 0x4e4   : > { %v4188_v29 = vpop.f32.mrf.mxu2 }
 0x4e5   : > { %v4236_v43 = vadd.f32 %v4231_v7, %v4220_v42  ;;  %v4217_v13 = vadd.f32 %v4188_v29, %v4030_v61 }
 0x4e7   : > { %v4240_v36 = vmax.f32 %v4236_v43, 0.0  ;;  %v4233_v55 = vadd.f32 %v4226_v9, %v4217_v13 }
 0x4e9   : > { %4274 = vxpose.xlu0.b32.end [2/2] (short) %v4240_v36, 128  ;;  %v4237_v56 = vmax.f32 %v4233_v55, 0.0 }
 0x4eb   : > { %4241 = vxpose.xlu2.b32.start [1/2] (short) %v4237_v56, 128 }
 0x4ec   : > { %v4191_v24 = vpop.f32.mrf.mxu2 }
 0x4ed   : > { %v4219_v1 = vadd.f32 %v4191_v24, %v4032_v0 }
 0x4ef   : > { %v4235_v34 = vadd.f32 %v4231_v7, %v4219_v1 }
 0x4f1   : > { %v4239_v20 = vmax.f32 %v4235_v34, 0.0 }
 0x4f3   : > { %4242 = vxpose.xlu2.b32.end [2/2] (short) %v4239_v20, 128 }
 0x555   : > { %7245 = vset.pattern.permute.xlu2 %v10705_v4 }
 0x584   : > { %v4257_v11 = vpop.trf.xlu2 }
 0x585   : > { %v4289_v3 = vpop.trf.xlu0  ;;  %4305 = vst.msk [vmem:[#allocation3 + $0x28] sm:$0xff] %vm407_vm2, %v4257_v11 }
 0x586   : > { %4321 = vst.msk [vmem:[#allocation3 + $0x128] sm:$0xff] %vm407_vm2, %v4289_v3 }
 0x58c   : > { %v4258_v37 = vpop.trf.xlu2 }
 0x58d   : > { %v4290_v33 = vpop.trf.xlu0  ;;  %4306 = vst.msk [vmem:[#allocation3 + $0x30] sm:$0xff] %vm407_vm2, %v4258_v37 }
 0x58e   : > { %4322 = vst.msk [vmem:[#allocation3 + $0x130] sm:$0xff] %vm407_vm2, %v4290_v33 }
 0x594   : > { %v4259_v40 = vpop.trf.xlu2 }
 0x595   : > { %v4291_v45 = vpop.trf.xlu0  ;;  %4307 = vst.msk [vmem:[#allocation3 + $0x48] sm:$0xff] %vm407_vm2, %v4259_v40 }
 0x596   : > { %4323 = vst.msk [vmem:[#allocation3 + $0x148] sm:$0xff] %vm407_vm2, %v4291_v45 }
 0x59c   : > { %v4260_v53 = vpop.trf.xlu2 }
 0x59d   : > { %v4292_v44 = vpop.trf.xlu0  ;;  %4308 = vst.msk [vmem:[#allocation3 + $0x50] sm:$0xff] %vm407_vm2, %v4260_v53 }
 0x59e   : > { %4324 = vst.msk [vmem:[#allocation3 + $0x150] sm:$0xff] %vm407_vm2, %v4292_v44 }
 0x5a4   : > { %v4261_v47 = vpop.trf.xlu2 }
 0x5a5   : > { %v4293_v48 = vpop.trf.xlu0  ;;  %4309 = vst.msk [vmem:[#allocation3 + $0x68] sm:$0xff] %vm407_vm2, %v4261_v47 }
 0x5a6   : > { %4325 = vst.msk [vmem:[#allocation3 + $0x168] sm:$0xff] %vm407_vm2, %v4293_v48 }
 0x5ac   : > { %v4262_v17 = vpop.trf.xlu2 }
 0x5ad   : > { %v4294_v51 = vpop.trf.xlu0  ;;  %4310 = vst.msk [vmem:[#allocation3 + $0x70] sm:$0xff] %vm407_vm2, %v4262_v17  ;;  %v9753_v47 = vld [vmem:[#allocation3 + $0x167] sm:$0xff] }
 0x5ae   : > { %4326 = vst.msk [vmem:[#allocation3 + $0x170] sm:$0xff] %vm407_vm2, %v4294_v51  ;;  %v9755_v51 = vld [vmem:[#allocation3 + $0x168] sm:$0xff] }
 0x5af   : > { %10724 = vst [vmem:[#allocation18_spill] sm:$0xff] %v9753_v47  ;;  %v9757_v17 = vld [vmem:[#allocation3 + $0x67] sm:$0xff] }
 0x5b0   : > { %10725 = vst [vmem:[#allocation19_spill] sm:$0xff] %v9757_v17 }
 0x5b4   : > { %v4263_v19 = vpop.trf.xlu2  ;;  %v9741_v53 = vld [vmem:[#allocation3 + $0x6f] sm:$0xff] }
 0x5b5   : > { %v4295_v2 = vpop.trf.xlu0  ;;  %4311 = vst.msk [vmem:[#allocation3 + $0x88] sm:$0xff] %vm407_vm2, %v4263_v19  ;;  %v9737_v40 = vld [vmem:[#allocation3 + $0x16f] sm:$0xff] }
 0x5b6   : > { %4327 = vst.msk [vmem:[#allocation3 + $0x188] sm:$0xff] %vm407_vm2, %v4295_v2  ;;  %v9739_v44 = vld [vmem:[#allocation3 + $0x170] sm:$0xff]  ;;  %v9761_v2 = vld [vmem:[#allocation3 + $0x68] sm:$0xff] }
 0x5b7   : > { %10722 = vst [vmem:[#allocation16_spill] sm:$0xff] %v9737_v40  ;;  %v9745_v48 = vld [vmem:[#allocation3 + $0x70] sm:$0xff] }
 0x5b8   : > { %10723 = vst [vmem:[#allocation17_spill] sm:$0xff] %v9741_v53  ;;  %v9769_v19 = vld [vmem:[#allocation3 + $0x14f] sm:$0xff] }
 0x5b9   : > { %10726 = vst [vmem:[#allocation20_spill] sm:$0xff] %v9769_v19 }
 0x5bc   : > { %v4264_v57 = vpop.trf.xlu2  ;;  %v9725_v37 = vld [vmem:[#allocation3 + $0x87] sm:$0xff] }
 0x5bd   : > { %v4296_v52 = vpop.trf.xlu0  ;;  %4312 = vst.msk [vmem:[#allocation3 + $0x90] sm:$0xff] %vm407_vm2, %v4264_v57  ;;  %v9721_v11 = vld [vmem:[#allocation3 + $0x187] sm:$0xff]  ;;  %v9773_v57 = vld [vmem:[#allocation3 + $0x4f] sm:$0xff] }
 0x5be   : > { %4328 = vst.msk [vmem:[#allocation3 + $0x190] sm:$0xff] %vm407_vm2, %v4296_v52  ;;  %v9723_v33 = vld [vmem:[#allocation3 + $0x188] sm:$0xff]  ;;  %v9771_v52 = vld [vmem:[#allocation3 + $0x150] sm:$0xff] }
 0x5bf   : > { %10720 = vst [vmem:[#allocation14_spill] sm:$0xff] %v9721_v11  ;;  %v9729_v45 = vld [vmem:[#allocation3 + $0x88] sm:$0xff] }
 0x5c0   : > { %10721 = vst [vmem:[#allocation15_spill] sm:$0xff] %v9725_v37 }
 0x5c1   : > { %10727 = vst [vmem:[#allocation21_spill] sm:$0xff] %v9773_v57 }
 0x5c4   : > { %v4265_v46 = vpop.trf.xlu2  ;;  %v9709_v4 = vld [vmem:[#allocation3 + $0x8f] sm:$0xff] }
 0x5c5   : > { %v4297_v60 = vpop.trf.xlu0  ;;  %4313 = vst.msk [vmem:[#allocation3 + $0xa8] sm:$0xff] %vm407_vm2, %v4265_v46  ;;  %v9705_v34 = vld [vmem:[#allocation3 + $0x18f] sm:$0xff] }
 0x5c6   : > { %4329 = vst.msk [vmem:[#allocation3 + $0x1a8] sm:$0xff] %vm407_vm2, %v4297_v60  ;;  %v9707_v20 = vld [vmem:[#allocation3 + $0x190] sm:$0xff]  ;;  %v9785_v60 = vld [vmem:[#allocation3 + $0x147] sm:$0xff] }
 0x5c7   : > { %6028 = vperm.xlu0 %7243, %v6020_v50   ;;  %10718 = vst [vmem:[#allocation8_spill] sm:$0xff] %v9705_v34  ;;  %v9713_v3 = vld [vmem:[#allocation3 + $0x90] sm:$0xff]  ;;  %v9787_v46 = vld [vmem:[#allocation3 + $0x148] sm:$0xff] }
 0x5c8   : > { %10719 = vst [vmem:[#allocation13_spill] sm:$0xff] %v9709_v4  ;;  %v9777_v50 = vld [vmem:[#allocation3 + $0x50] sm:$0xff] }
 0x5c9   : > { %10728 = vst [vmem:[#allocation22_spill] sm:$0xff] %v9785_v60 }
 0x5cc   : > { %v4266_v62 = vpop.trf.xlu2  ;;  %v9692_v0 = vld [vmem:[#allocation3 + $0xa7] sm:$0xff] }
 0x5cd   : > { %v4298_v39 = vpop.trf.xlu0  ;;  %4314 = vst.msk [vmem:[#allocation3 + $0xb0] sm:$0xff] %vm407_vm2, %v4266_v62  ;;  %v9688_v28 = vld [vmem:[#allocation3 + $0x1a7] sm:$0xff] }
 0x5ce   : > { %4330 = vst.msk [vmem:[#allocation3 + $0x1b0] sm:$0xff] %vm407_vm2, %v4298_v39  ;;  %v9690_v56 = vld [vmem:[#allocation3 + $0x1a8] sm:$0xff] }
 0x5cf   : > { %10716 = vst [vmem:[#allocation6_spill] sm:$0xff] %v9688_v28  ;;  %v9696_v24 = vld [vmem:[#allocation3 + $0xa8] sm:$0xff] }
 0x5d0   : > { %10717 = vst [vmem:[#allocation7_spill] sm:$0xff] %v9692_v0  ;;  %v9793_v39 = vld [vmem:[#allocation3 + $0x47] sm:$0xff] }
 0x5d1   : > { %v9795_v62 = vld [vmem:[#allocation3 + $0x48] sm:$0xff] }
 0x5d4   : > { %v4267_v30 = vpop.trf.xlu2  ;;  %v9676_v54 = vld [vmem:[#allocation3 + $0xaf] sm:$0xff] }
 0x5d5   : > { %v4299_v8 = vpop.trf.xlu0  ;;  %4315 = vst.msk [vmem:[#allocation3 + $0xc8] sm:$0xff] %vm407_vm2, %v4267_v30  ;;  %v9672_v13 = vld [vmem:[#allocation3 + $0x1af] sm:$0xff] }
 0x5d6   : > { %4331 = vst.msk [vmem:[#allocation3 + $0x1c8] sm:$0xff] %vm407_vm2, %v4299_v8  ;;  %v9674_v36 = vld [vmem:[#allocation3 + $0x1b0] sm:$0xff] }
 0x5d7   : > { %10714 = vst [vmem:[#allocation5_spill] sm:$0xff] %v9672_v13  ;;  %v9680_v55 = vld [vmem:[#allocation3 + $0xb0] sm:$0xff] }
 0x5d8   : > { %10715 = vst [vmem:[#allocation40_spill] sm:$0xff] %v9676_v54  ;;  %v9801_v8 = vld [vmem:[#allocation3 + $0x12f] sm:$0xff] }
 0x5d9   : > { %v9803_v30 = vld [vmem:[#allocation3 + $0x130] sm:$0xff] }
 0x5da   : > { %10729 = vst [vmem:[#allocation23_spill] sm:$0xff] %v9803_v30 }
 0x5dc   : > { %v4268_v14 = vpop.trf.xlu2  ;;  %v9659_v43 = vld [vmem:[#allocation3 + $0xc7] sm:$0xff] }
 0x5dd   : > { %v4300_v35 = vpop.trf.xlu0  ;;  %4316 = vst.msk [vmem:[#allocation3 + $0xd0] sm:$0xff] %vm407_vm2, %v4268_v14  ;;  %v9655_v61 = vld [vmem:[#allocation3 + $0x1c7] sm:$0xff]  ;;  %v9809_v14 = vld [vmem:[#allocation3 + $0x30] sm:$0xff] }
 0x5de   : > { %4332 = vst.msk [vmem:[#allocation3 + $0x1d0] sm:$0xff] %vm407_vm2, %v4300_v35  ;;  %v9657_v7 = vld [vmem:[#allocation3 + $0x1c8] sm:$0xff] }
 0x5df   : > { %10712 = vst [vmem:[#allocation4_spill] sm:$0xff] %v9655_v61  ;;  %v9663_v29 = vld [vmem:[#allocation3 + $0xc8] sm:$0xff] }
 0x5e0   : > { %10713 = vst [vmem:[#allocation37_spill] sm:$0xff] %v9659_v43  ;;  %v9805_v35 = vld [vmem:[#allocation3 + $0x2f] sm:$0xff] }
 0x5e1   : > { %10730 = vst [vmem:[#allocation24_spill] sm:$0xff] %v9809_v14 }
 0x5e4   : > { %v4269_v26 = vpop.trf.xlu2  ;;  %v9642_v22 = vld [vmem:[#allocation3 + $0xcf] sm:$0xff] }
 0x5e5   : > { %v4301_v49 = vpop.trf.xlu0  ;;  %4317 = vst.msk [vmem:[#allocation3 + $0xe8] sm:$0xff] %vm407_vm2, %v4269_v26  ;;  %v9638_v15 = vld [vmem:[#allocation3 + $0x1cf] sm:$0xff] }
 0x5e6   : > { %4333 = vst.msk [vmem:[#allocation3 + $0x1e8] sm:$0xff] %vm407_vm2, %v4301_v49  ;;  %v9640_v10 = vld [vmem:[#allocation3 + $0x1d0] sm:$0xff]  ;;  %v9817_v49 = vld [vmem:[#allocation3 + $0x127] sm:$0xff] }
 0x5e7   : > { %10710 = vst [vmem:[#allocation42_spill] sm:$0xff] %v9638_v15  ;;  %v9646_v42 = vld [vmem:[#allocation3 + $0xd0] sm:$0xff]  ;;  %v9819_v26 = vld [vmem:[#allocation3 + $0x128] sm:$0xff] }
 0x5e8   : > { %10711 = vst [vmem:[#allocation34_spill] sm:$0xff] %v9642_v22 }
 0x5e9   : > { %10731 = vst [vmem:[#allocation25_spill] sm:$0xff] %v9819_v26 }
 0x5ec   : > { %v4270_v9 = vpop.trf.xlu2  ;;  %v9626_v16 = vld [vmem:[#allocation3 + $0xe7] sm:$0xff] }
 0x5ed   : > { %v4302_v63 = vpop.trf.xlu0  ;;  %4318 = vst.msk [vmem:[#allocation3 + $0xf0] sm:$0xff] %vm407_vm2, %v4270_v9  ;;  %v9622_v25 = vld [vmem:[#allocation3 + $0x1e7] sm:$0xff] }
 0x5ee   : > { %4334 = vst.msk [vmem:[#allocation3 + $0x1f0] sm:$0xff] %vm407_vm2, %v4302_v63  ;;  %v9624_v41 = vld [vmem:[#allocation3 + $0x1e8] sm:$0xff] }
 0x5ef   : > { %10708 = vst [vmem:[#allocation41_spill] sm:$0xff] %v9622_v25  ;;  %v9630_v27 = vld [vmem:[#allocation3 + $0xe8] sm:$0xff] }
 0x5f0   : > { %10709 = vst [vmem:[#allocation30_spill] sm:$0xff] %v9626_v16  ;;  %v9825_v63 = vld [vmem:[#allocation3 + $0x27] sm:$0xff] }
 0x5f1   : > { %v9827_v9 = vld [vmem:[#allocation3 + $0x28] sm:$0xff] }
 0x5f2   : > { %10732 = vst [vmem:[#allocation26_spill] sm:$0xff] %v9827_v9 }
 0x5f4   : > { %v4271_v18 = vpop.trf.xlu2  ;;  %v9609_v6 = vld [vmem:[#allocation3 + $0xef] sm:$0xff] }
 0x5f5   : > { %v9605_v31 = vld [vmem:[#allocation3 + $0x1ef] sm:$0xff]  ;;  %10707 = vst [vmem:[#allocation39_spill] sm:$0xff] %v9609_v6  ;;  %6887 = vmatpush.xpose.msk.msrb.mxu0 %vm407_vm2, %v9609_v6  ;;  %v4303_v21 = vpop.trf.xlu0 }
 0x5f6   : > { %10706 = vst [vmem:[#allocation48_spill] sm:$0xff] %v9605_v31  ;;  %v9607_v5 = vld [vmem:[#allocation3 + $0x1f0] sm:$0xff]  ;;  %6905 = vmatpush.xpose.msk.msrb.mxu1 %vm407_vm2, %v9605_v31 }
 0x5f7   : > { %v9613_v32 = vld [vmem:[#allocation3 + $0xf0] sm:$0xff]  ;;  %6943 = vmatpush.xpose.msk.msrb.mxu3 %vm407_vm2, %v9607_v5  ;;  %4319 = vst.msk [vmem:[#allocation3 + $0x108] sm:$0xff] %vm407_vm2, %v4271_v18 }
 0x5f8   : > { %6925 = vmatpush.xpose.msk.msrb.mxu2 %vm407_vm2, %v9613_v32  ;;  %4335 = vst.msk [vmem:[#allocation3 + $0x208] sm:$0xff] %vm407_vm2, %v4303_v21  ;;  %v4524_v21 = vld [vmem:[#allocation3 + $0x10] sm:$0xff] }
 0x5f9   : > { %6888 = vmatpush.xpose.msk.msrb.mxu0 %vm407_vm2, %v9626_v16 }
 0x5fa   : > { %6906 = vmatpush.xpose.msk.msrb.mxu1 %vm407_vm2, %v9622_v25 }
 0x5fb   : > { %6944 = vmatpush.xpose.msk.msrb.mxu3 %vm407_vm2, %v9624_v41 }
 0x5fc   : > { %6926 = vmatpush.xpose.msk.msrb.mxu2 %vm407_vm2, %v9630_v27  ;;  %v4272_v58 = vpop.trf.xlu2 }
 0x5fd   : > { %4320 = vst.msk [vmem:[#allocation3 + $0x110] sm:$0xff] %vm407_vm2, %v4272_v58  ;;  %6889 = vmatpush.xpose.msk.msrb.mxu0 %vm407_vm2, %v9642_v22  ;;  %v4304_v1 = vpop.trf.xlu0  ;;  %v4338_v58 = vld [vmem:[#allocation3 + $0xf] sm:$0xff] }
 0x5fe   : > { %6907 = vmatpush.xpose.msk.msrb.mxu1 %vm407_vm2, %v9638_v15  ;;  %4336 = vst.msk [vmem:[#allocation3 + $0x210] sm:$0xff] %vm407_vm2, %v4304_v1  ;;  %v9843_v59 = vld [vmem:[#allocation3 + $0x107] sm:$0xff] }
 0x5ff   : > { %6945 = vmatpush.xpose.msk.msrb.mxu3 %vm407_vm2, %v9640_v10  ;;  %10734 = vst [vmem:[#allocation28_spill] sm:$0xff] %v9843_v59  ;;  %v9845_v12 = vld [vmem:[#allocation3 + $0x108] sm:$0xff] }
 0x600   : > { %6927 = vmatpush.xpose.msk.msrb.mxu2 %vm407_vm2, %v9646_v42 }
 0x601   : > { %6890 = vmatpush.xpose.msk.msrb.mxu0 %vm407_vm2, %v9659_v43 }
 0x602   : > { %6908 = vmatpush.xpose.msk.msrb.mxu1 %vm407_vm2, %v9655_v61 }
 0x603   : > { %6946 = vmatpush.xpose.msk.msrb.mxu3 %vm407_vm2, %v9657_v7 }
 0x604   : > { %6928 = vmatpush.xpose.msk.msrb.mxu2 %vm407_vm2, %v9663_v29  ;;  %v9833_v18 = vld [vmem:[#allocation3 + $0x110] sm:$0xff] }
 0x605   : > { %6891 = vmatpush.xpose.msk.msrb.mxu0 %vm407_vm2, %v9676_v54  ;;  %v9835_v1 = vld [vmem:[#allocation3 + $0x10f] sm:$0xff] }
 0x606   : > { %6909 = vmatpush.xpose.msk.msrb.mxu1 %vm407_vm2, %v9672_v13  ;;  %10733 = vst [vmem:[#allocation27_spill] sm:$0xff] %v9835_v1 }
 0x607   : > { %6947 = vmatpush.xpose.msk.msrb.mxu3 %vm407_vm2, %v9674_v36 }
 0x608   : > { %6929 = vmatpush.xpose.msk.msrb.mxu2 %vm407_vm2, %v9680_v55 }
 0x609   : > { %6892 = vmatpush.xpose.msk.msrb.mxu0 %vm407_vm2, %v9692_v0 }
 0x60a   : > { %6910 = vmatpush.xpose.msk.msrb.mxu1 %vm407_vm2, %v9688_v28 }
 0x60b   : > { %6948 = vmatpush.xpose.msk.msrb.mxu3 %vm407_vm2, %v9690_v56 }
 0x60c   : > { %6930 = vmatpush.xpose.msk.msrb.mxu2 %vm407_vm2, %v9696_v24 }
 0x60d   : > { %6893 = vmatpush.xpose.msk.msrb.mxu0 %vm407_vm2, %v9709_v4 }
 0x60e   : > { %6911 = vmatpush.xpose.msk.msrb.mxu1 %vm407_vm2, %v9705_v34 }
 0x60f   : > { %6949 = vmatpush.xpose.msk.msrb.mxu3 %vm407_vm2, %v9707_v20 }
 0x610   : > { %6931 = vmatpush.xpose.msk.msrb.mxu2 %vm407_vm2, %v9713_v3 }
 0x611   : > { %6894 = vmatpush.xpose.msk.msrb.mxu0 %vm407_vm2, %v9725_v37 }
 0x612   : > { %6912 = vmatpush.xpose.msk.msrb.mxu1 %vm407_vm2, %v9721_v11 }
 0x613   : > { %6950 = vmatpush.xpose.msk.msrb.mxu3 %vm407_vm2, %v9723_v33 }
 0x614   : > { %6932 = vmatpush.xpose.msk.msrb.mxu2 %vm407_vm2, %v9729_v45 }
 0x615   : > { %6895 = vmatpush.xpose.msk.msrb.mxu0 %vm407_vm2, %v9741_v53 }
 0x616   : > { %6913 = vmatpush.xpose.msk.msrb.mxu1 %vm407_vm2, %v9737_v40 }
 0x617   : > { %6951 = vmatpush.xpose.msk.msrb.mxu3 %vm407_vm2, %v9739_v44 }
 0x618   : > { %6933 = vmatpush.xpose.msk.msrb.mxu2 %vm407_vm2, %v9745_v48 }
 0x619   : > { %6896 = vmatpush.xpose.msk.msrb.mxu0 %vm407_vm2, %v9757_v17 }
 0x61a   : > { %6914 = vmatpush.xpose.msk.msrb.mxu1 %vm407_vm2, %v9753_v47 }
 0x61b   : > { %6952 = vmatpush.xpose.msk.msrb.mxu3 %vm407_vm2, %v9755_v51 }
 0x61c   : > { %6934 = vmatpush.xpose.msk.msrb.mxu2 %vm407_vm2, %v9761_v2 }
 0x61d   : > { %6897 = vmatpush.xpose.msk.msrb.mxu0 %vm407_vm2, %v9773_v57 }
 0x61e   : > { %6915 = vmatpush.xpose.msk.msrb.mxu1 %vm407_vm2, %v9769_v19 }
 0x61f   : > { %6953 = vmatpush.xpose.msk.msrb.mxu3 %vm407_vm2, %v9771_v52 }
 0x620   : > { %6935 = vmatpush.xpose.msk.msrb.mxu2 %vm407_vm2, %v9777_v50 }
 0x621   : > { %6898 = vmatpush.xpose.msk.msrb.mxu0 %vm407_vm2, %v9793_v39 }
 0x622   : > { %6916 = vmatpush.xpose.msk.msrb.mxu1 %vm407_vm2, %v9785_v60 }
 0x623   : > { %6954 = vmatpush.xpose.msk.msrb.mxu3 %vm407_vm2, %v9787_v46 }
 0x624   : > { %6936 = vmatpush.xpose.msk.msrb.mxu2 %vm407_vm2, %v9795_v62 }
 0x625   : > { %6899 = vmatpush.xpose.msk.msrb.mxu0 %vm407_vm2, %v9805_v35 }
 0x626   : > { %6917 = vmatpush.xpose.msk.msrb.mxu1 %vm407_vm2, %v9801_v8 }
 0x627   : > { %6955 = vmatpush.xpose.msk.msrb.mxu3 %vm407_vm2, %v9803_v30  ;;  %v9879_v30 = vld [vmem:[#allocation3 + $0xe9] sm:$0xff] }
 0x628   : > { %6937 = vmatpush.xpose.msk.msrb.mxu2 %vm407_vm2, %v9809_v14  ;;  %v9881_v14 = vld [vmem:[#allocation3 + $0x1e9] sm:$0xff] }
 0x629   : > { %6900 = vmatpush.xpose.msk.msrb.mxu0 %vm407_vm2, %v9825_v63 }
 0x62a   : > { %6918 = vmatpush.xpose.msk.msrb.mxu1 %vm407_vm2, %v9817_v49 }
 0x62b   : > { %6956 = vmatpush.xpose.msk.msrb.mxu3 %vm407_vm2, %v9819_v26  ;;  %v9851_v26 = vld [vmem:[#allocation3 + $0x20f] sm:$0xff] }
 0x62c   : > { %6938 = vmatpush.xpose.msk.msrb.mxu2 %vm407_vm2, %v9827_v9  ;;  %10735 = vst [vmem:[#allocation29_spill] sm:$0xff] %v9851_v26  ;;  %v4369_v9 = vld [vmem:[%s10483_s5] sm:$0xff] }
 0x62d   : > { %6901 = vmatpush.xpose.msk.msrb.mxu0 %vm407_vm2, %v4338_v58  ;;  %v9855_v58 = vld [vmem:[#allocation3 + $0xf1] sm:$0xff] }
 0x62e   : > { %6919 = vmatpush.xpose.msk.msrb.mxu1 %vm407_vm2, %v9835_v1 }
 0x62f   : > { %6957 = vmatpush.xpose.msk.msrb.mxu3 %vm407_vm2, %v9833_v18 }
 0x630   : > { %6939 = vmatpush.xpose.msk.msrb.mxu2 %vm407_vm2, %v4524_v21  ;;  %v9857_v21 = vld [vmem:[#allocation3 + $0x1f1] sm:$0xff] }
 0x631   : > { %6902 = vmatpush.xpose.msk.msrb.mxu0 %vm407_vm2, %v4337_v23  ;;  %v6923_v23 = vld [vmem:[%s10483_s5 + $0x10] sm:$0xff] }
 0x632   : > { %6920 = vmatpush.xpose.msk.msrb.mxu1 %vm407_vm2, %v9843_v59 }
 0x633   : > { %6958 = vmatpush.xpose.msk.msrb.mxu3 %vm407_vm2, %v9845_v12 }
 0x634   : > { %6940 = vmatpush.xpose.msk.msrb.mxu2 %vm407_vm2, %v4523_v38  ;;  %6903 = vmatmul.msk.f32.vlgmr.msrb.gmra.mxu0 %vm407_vm2, %v4369_v9  ;;  %v9875_v38 = vld [vmem:[#allocation3 + $0x207] sm:$0xff] }
 0x635   : > { %6963 = vmatpush.xpose.msk.msra.mxu0 %vm407_vm2, %v9855_v58  ;;  %6921 = vmatmul.msk.f32.vlgmr.msrb.gmra.mxu1 %vm407_vm2, %v4369_v9  ;;  %10736 = vst [vmem:[#allocation32_spill] sm:$0xff] %v9875_v38  ;;  %v9891_v9 = vld [vmem:[#allocation3 + $0xd1] sm:$0xff] }
 0x636   : > { %6981 = vmatpush.xpose.msk.msra.mxu1 %vm407_vm2, %v9857_v21  ;;  %6959 = vmatmul.msk.f32.vlgmr.msrb.gmra.mxu3 %vm407_vm2, %v6923_v23 }
 0x637   : > { %7019 = vmatpush.xpose.msk.msra.mxu3 %vm407_vm2, %v9851_v26  ;;  %6941 = vmatmul.msk.f32.vlgmr.msrb.gmra.mxu2 %vm407_vm2, %v6923_v23  ;;  %v9893_v26 = vld [vmem:[#allocation3 + $0x1d1] sm:$0xff]  ;;  %v4370_v23 = vld [vmem:[%s10483_s5 + $0x8] sm:$0xff] }
 0x638   : > { %7001 = vmatpush.xpose.msk.msra.mxu2 %vm407_vm2, %v9835_v1  ;;  %v9915_v1 = vld [vmem:[#allocation3 + $0x1c9] sm:$0xff] }
 0x639   : > { %6964 = vmatpush.xpose.msk.msra.mxu0 %vm407_vm2, %v9879_v30 }
 0x63a   : > { %6982 = vmatpush.xpose.msk.msra.mxu1 %vm407_vm2, %v9881_v14 }
 0x63b   : > { %7020 = vmatpush.xpose.msk.msra.mxu3 %vm407_vm2, %v9875_v38  ;;  %v9913_v38 = vld [vmem:[#allocation3 + $0xc9] sm:$0xff] }
 0x63c   : > { %7002 = vmatpush.xpose.msk.msra.mxu2 %vm407_vm2, %v9843_v59  ;;  %v6924_v59 = vld [vmem:[%s10483_s5 + $0x18] sm:$0xff]  ;;  %6904 = vmatmul.msk.f32.gmra.mxu0 %vm407_vm2, %v4370_v23 }
 0x63d   : > { %6965 = vmatpush.xpose.msk.msra.mxu0 %vm407_vm2, %v9891_v9  ;;  %6922 = vmatmul.msk.f32.gmra.mxu1 %vm407_vm2, %v4370_v23  ;;  %v9925_v23 = vld [vmem:[#allocation3 + $0xb1] sm:$0xff] }
 0x63e   : > { %6983 = vmatpush.xpose.msk.msra.mxu1 %vm407_vm2, %v9893_v26  ;;  %6960 = vmatmul.msk.f32.gmra.mxu3 %vm407_vm2, %v6924_v59 }
 0x63f   : > { %7021 = vmatpush.xpose.msk.msra.mxu3 %vm407_vm2, %v9605_v31  ;;  %6942 = vmatmul.msk.f32.gmra.mxu2 %vm407_vm2, %v6924_v59  ;;  %v9927_v31 = vld [vmem:[#allocation3 + $0x1b1] sm:$0xff]  ;;  %v9937_v59 = vld [vmem:[#allocation3 + $0xa9] sm:$0xff] }
 0x640   : > { %7003 = vmatpush.xpose.msk.msra.mxu2 %vm407_vm2, %v9609_v6  ;;  %v10054_v6 = vld [vmem:[#allocation3 + $0x109] sm:$0xff] }
 0x641   : > { %6966 = vmatpush.xpose.msk.msra.mxu0 %vm407_vm2, %v9913_v38 }
 0x642   : > { %6984 = vmatpush.xpose.msk.msra.mxu1 %vm407_vm2, %v9915_v1 }
 0x643   : > { %7022 = vmatpush.xpose.msk.msra.mxu3 %vm407_vm2, %v9622_v25  ;;  %v9951_v25 = vld [vmem:[#allocation3 + $0x191] sm:$0xff] }
 0x644   : > { %7004 = vmatpush.xpose.msk.msra.mxu2 %vm407_vm2, %v9626_v16  ;;  %v9939_v16 = vld [vmem:[#allocation3 + $0x1a9] sm:$0xff] }
 0x645   : > { %6967 = vmatpush.xpose.msk.msra.mxu0 %vm407_vm2, %v9925_v23 }
 0x646   : > { %6985 = vmatpush.xpose.msk.msra.mxu1 %vm407_vm2, %v9927_v31 }
 0x647   : > { %7023 = vmatpush.xpose.msk.msra.mxu3 %vm407_vm2, %v9638_v15  ;;  %v9963_v15 = vld [vmem:[#allocation3 + $0x189] sm:$0xff] }
 0x648   : > { %7005 = vmatpush.xpose.msk.msra.mxu2 %vm407_vm2, %v9642_v22  ;;  %v9949_v22 = vld [vmem:[#allocation3 + $0x91] sm:$0xff] }
 0x649   : > { %6968 = vmatpush.xpose.msk.msra.mxu0 %vm407_vm2, %v9937_v59 }
 0x64a   : > { %6986 = vmatpush.xpose.msk.msra.mxu1 %vm407_vm2, %v9939_v16 }
 0x64b   : > { %7024 = vmatpush.xpose.msk.msra.mxu3 %vm407_vm2, %v9655_v61  ;;  %v9975_v61 = vld [vmem:[#allocation3 + $0x171] sm:$0xff] }
 0x64c   : > { %7006 = vmatpush.xpose.msk.msra.mxu2 %vm407_vm2, %v9659_v43  ;;  %v9961_v43 = vld [vmem:[#allocation3 + $0x89] sm:$0xff] }
 0x64d   : > { %6969 = vmatpush.xpose.msk.msra.mxu0 %vm407_vm2, %v9949_v22 }
 0x64e   : > { %6987 = vmatpush.xpose.msk.msra.mxu1 %vm407_vm2, %v9951_v25 }
 0x64f   : > { %7025 = vmatpush.xpose.msk.msra.mxu3 %vm407_vm2, %v9672_v13  ;;  %v9987_v13 = vld [vmem:[#allocation3 + $0x169] sm:$0xff] }
 0x650   : > { %7007 = vmatpush.xpose.msk.msra.mxu2 %vm407_vm2, %v9676_v54  ;;  %v9973_v54 = vld [vmem:[#allocation3 + $0x71] sm:$0xff] }
 0x651   : > { %6970 = vmatpush.xpose.msk.msra.mxu0 %vm407_vm2, %v9961_v43 }
 0x652   : > { %6988 = vmatpush.xpose.msk.msra.mxu1 %vm407_vm2, %v9963_v15 }
 0x653   : > { %7026 = vmatpush.xpose.msk.msra.mxu3 %vm407_vm2, %v9688_v28  ;;  %v9999_v28 = vld [vmem:[#allocation3 + $0x151] sm:$0xff] }
 0x654   : > { %7008 = vmatpush.xpose.msk.msra.mxu2 %vm407_vm2, %v9692_v0  ;;  %v9985_v0 = vld [vmem:[#allocation3 + $0x69] sm:$0xff]  ;;  %10738 = vst [vmem:[#allocation43_spill] sm:$0xff] %v9999_v28 }
 0x655   : > { %6971 = vmatpush.xpose.msk.msra.mxu0 %vm407_vm2, %v9973_v54 }
 0x656   : > { %6989 = vmatpush.xpose.msk.msra.mxu1 %vm407_vm2, %v9975_v61 }
 0x657   : > { %7027 = vmatpush.xpose.msk.msra.mxu3 %vm407_vm2, %v9705_v34  ;;  %v10011_v34 = vld [vmem:[#allocation3 + $0x149] sm:$0xff] }
 0x658   : > { %7009 = vmatpush.xpose.msk.msra.mxu2 %vm407_vm2, %v9709_v4  ;;  %v9997_v4 = vld [vmem:[#allocation3 + $0x51] sm:$0xff]  ;;  %10740 = vst [vmem:[#allocation45_spill] sm:$0xff] %v10011_v34 }
 0x659   : > { %6972 = vmatpush.xpose.msk.msra.mxu0 %vm407_vm2, %v9985_v0  ;;  %10737 = vst [vmem:[#allocation36_spill] sm:$0xff] %v9997_v4 }
 0x65a   : > { %6990 = vmatpush.xpose.msk.msra.mxu1 %vm407_vm2, %v9987_v13 }
 0x65b   : > { %7028 = vmatpush.xpose.msk.msra.mxu3 %vm407_vm2, %v9721_v11  ;;  %v10023_v11 = vld [vmem:[#allocation3 + $0x131] sm:$0xff] }
 0x65c   : > { %7010 = vmatpush.xpose.msk.msra.mxu2 %vm407_vm2, %v9725_v37  ;;  %v10009_v37 = vld [vmem:[#allocation3 + $0x49] sm:$0xff] }
 0x65d   : > { %6973 = vmatpush.xpose.msk.msra.mxu0 %vm407_vm2, %v9997_v4  ;;  %10739 = vst [vmem:[#allocation44_spill] sm:$0xff] %v10009_v37 }
 0x65e   : > { %6991 = vmatpush.xpose.msk.msra.mxu1 %vm407_vm2, %v9999_v28 }
 0x65f   : > { %7029 = vmatpush.xpose.msk.msra.mxu3 %vm407_vm2, %v9737_v40  ;;  %v10035_v40 = vld [vmem:[#allocation3 + $0x129] sm:$0xff] }
 0x660   : > { %7011 = vmatpush.xpose.msk.msra.mxu2 %vm407_vm2, %v9741_v53  ;;  %v10021_v53 = vld [vmem:[#allocation3 + $0x31] sm:$0xff] }
 0x661   : > { %6974 = vmatpush.xpose.msk.msra.mxu0 %vm407_vm2, %v10009_v37 }
 0x662   : > { %6992 = vmatpush.xpose.msk.msra.mxu1 %vm407_vm2, %v10011_v34 }
 0x663   : > { %7030 = vmatpush.xpose.msk.msra.mxu3 %vm407_vm2, %v9753_v47  ;;  %v10045_v47 = vld [vmem:[#allocation3 + $0x111] sm:$0xff] }
 0x664   : > { %7012 = vmatpush.xpose.msk.msra.mxu2 %vm407_vm2, %v9757_v17  ;;  %v10033_v17 = vld [vmem:[#allocation3 + $0x29] sm:$0xff]  ;;  %10741 = vst [vmem:[#allocation46_spill] sm:$0xff] %v10045_v47 }
 0x665   : > { %6975 = vmatpush.xpose.msk.msra.mxu0 %vm407_vm2, %v10021_v53 }
 0x666   : > { %6993 = vmatpush.xpose.msk.msra.mxu1 %vm407_vm2, %v10023_v11 }
 0x667   : > { %7031 = vmatpush.xpose.msk.msra.mxu3 %vm407_vm2, %v9769_v19  ;;  %v4710_v19 = vld [vmem:[#allocation3 + $0x9] sm:$0xff] }
 0x668   : > { %7013 = vmatpush.xpose.msk.msra.mxu2 %vm407_vm2, %v9773_v57  ;;  %v4711_v57 = vld [vmem:[#allocation3 + $0x11] sm:$0xff] }
 0x669   : > { %6976 = vmatpush.xpose.msk.msra.mxu0 %vm407_vm2, %v10033_v17 }
 0x66a   : > { %6994 = vmatpush.xpose.msk.msra.mxu1 %vm407_vm2, %v10035_v40 }
 0x66b   : > { %7032 = vmatpush.xpose.msk.msra.mxu3 %vm407_vm2, %v9785_v60  ;;  %v10085_v60 = vld [vmem:[#allocation3 + $0x208] sm:$0xff] }
 0x66c   : > { %7014 = vmatpush.xpose.msk.msra.mxu2 %vm407_vm2, %v9793_v39 }
 0x66d   : > { %6977 = vmatpush.xpose.msk.msra.mxu0 %vm407_vm2, %v4711_v57  ;;  %v10063_v57 = vld [vmem:[#allocation3 + $0x210] sm:$0xff] }
 0x66e   : > { %6995 = vmatpush.xpose.msk.msra.mxu1 %vm407_vm2, %v10045_v47 }
 0x66f   : > { %7033 = vmatpush.xpose.msk.msra.mxu3 %vm407_vm2, %v9801_v8 }
 0x670   : > { %7015 = vmatpush.xpose.msk.msra.mxu2 %vm407_vm2, %v9805_v35  ;;  %v6961_v35 = vld [vmem:[%s10483_s5 + $0x20] sm:$0xff] }
 0x671   : > { %6978 = vmatpush.xpose.msk.msra.mxu0 %vm407_vm2, %v4710_v19  ;;  %v10072_v19 = vld [vmem:[#allocation3 + $0x211] sm:$0xff] }
 0x672   : > { %6996 = vmatpush.xpose.msk.msra.mxu1 %vm407_vm2, %v10054_v6 }
 0x673   : > { %7034 = vmatpush.xpose.msk.msra.mxu3 %vm407_vm2, %v9817_v49 }
 0x674   : > { %7016 = vmatpush.xpose.msk.msra.mxu2 %vm407_vm2, %v9825_v63  ;;  %v6999_v63 = vld [vmem:[%s10483_s5 + $0x30] sm:$0xff]  ;;  %6979 = vmatmul.msk.f32.vlgmr.msra.gmra.mxu0 %vm407_vm2, %v6961_v35 }
 0x675   : > { %7039 = vmatpush.xpose.msk.msrb.mxu0 %vm407_vm2, %v9833_v18  ;;  %6997 = vmatmul.msk.f32.vlgmr.msra.gmra.mxu1 %vm407_vm2, %v6961_v35  ;;  %v6962_v35 = vld [vmem:[%s10483_s5 + $0x28] sm:$0xff] }
 0x676   : > { %7057 = vmatpush.xpose.msk.msrb.mxu1 %vm407_vm2, %v10063_v57  ;;  %7035 = vmatmul.msk.f32.vlgmr.msra.gmra.mxu3 %vm407_vm2, %v6999_v63 }
 0x677   : > { %7095 = vmatpush.xpose.msk.msrb.mxu3 %vm407_vm2, %v10072_v19  ;;  %7017 = vmatmul.msk.f32.vlgmr.msra.gmra.mxu2 %vm407_vm2, %v6999_v63  ;;  %v7000_v63 = vld [vmem:[%s10483_s5 + $0x38] sm:$0xff] }
 0x678   : > { %7077 = vmatpush.xpose.msk.msrb.mxu2 %vm407_vm2, %v10045_v47  ;;  %v10091_v47 = vld [vmem:[#allocation3 + $0x209] sm:$0xff] }
 0x679   : > { %7040 = vmatpush.xpose.msk.msrb.mxu0 %vm407_vm2, %v9845_v12 }
 0x67a   : > { %7058 = vmatpush.xpose.msk.msrb.mxu1 %vm407_vm2, %v10085_v60 }
 0x67b   : > { %7096 = vmatpush.xpose.msk.msrb.mxu3 %vm407_vm2, %v10091_v47 }
 0x67c   : > { %7078 = vmatpush.xpose.msk.msrb.mxu2 %vm407_vm2, %v10054_v6  ;;  %6980 = vmatmul.msk.f32.gmra.mxu0 %vm407_vm2, %v6962_v35 }
 0x67d   : > { %7041 = vmatpush.xpose.msk.msrb.mxu0 %vm407_vm2, %v9613_v32  ;;  %6998 = vmatmul.msk.f32.gmra.mxu1 %vm407_vm2, %v6962_v35  ;;  %v10742_v35 = vld [vmem:[#allocation24_spill] sm:$0xff] }
 0x67e   : > { %7059 = vmatpush.xpose.msk.msrb.mxu1 %vm407_vm2, %v9607_v5  ;;  %7036 = vmatmul.msk.f32.gmra.mxu3 %vm407_vm2, %v7000_v63 }
 0x67f   : > { %7097 = vmatpush.xpose.msk.msrb.mxu3 %vm407_vm2, %v9857_v21  ;;  %7018 = vmatmul.msk.f32.gmra.mxu2 %vm407_vm2, %v7000_v63  ;;  %v10743_v63 = vld [vmem:[#allocation23_spill] sm:$0xff] }
 0x680   : > { %7079 = vmatpush.xpose.msk.msrb.mxu2 %vm407_vm2, %v9855_v58 }
 0x681   : > { %7042 = vmatpush.xpose.msk.msrb.mxu0 %vm407_vm2, %v9630_v27 }
 0x682   : > { %7060 = vmatpush.xpose.msk.msrb.mxu1 %vm407_vm2, %v9624_v41 }
 0x683   : > { %7098 = vmatpush.xpose.msk.msrb.mxu3 %vm407_vm2, %v9881_v14 }
 0x684   : > { %7080 = vmatpush.xpose.msk.msrb.mxu2 %vm407_vm2, %v9879_v30 }
 0x685   : > { %7043 = vmatpush.xpose.msk.msrb.mxu0 %vm407_vm2, %v9646_v42 }
 0x686   : > { %7061 = vmatpush.xpose.msk.msrb.mxu1 %vm407_vm2, %v9640_v10 }
 0x687   : > { %7099 = vmatpush.xpose.msk.msrb.mxu3 %vm407_vm2, %v9893_v26 }
 0x688   : > { %7081 = vmatpush.xpose.msk.msrb.mxu2 %vm407_vm2, %v9891_v9 }
 0x689   : > { %7044 = vmatpush.xpose.msk.msrb.mxu0 %vm407_vm2, %v9663_v29 }
 0x68a   : > { %7062 = vmatpush.xpose.msk.msrb.mxu1 %vm407_vm2, %v9657_v7 }
 0x68b   : > { %7100 = vmatpush.xpose.msk.msrb.mxu3 %vm407_vm2, %v9915_v1 }
 0x68c   : > { %7082 = vmatpush.xpose.msk.msrb.mxu2 %vm407_vm2, %v9913_v38 }
 0x68d   : > { %7045 = vmatpush.xpose.msk.msrb.mxu0 %vm407_vm2, %v9680_v55 }
 0x68e   : > { %7063 = vmatpush.xpose.msk.msrb.mxu1 %vm407_vm2, %v9674_v36 }
 0x68f   : > { %7101 = vmatpush.xpose.msk.msrb.mxu3 %vm407_vm2, %v9927_v31 }
 0x690   : > { %7083 = vmatpush.xpose.msk.msrb.mxu2 %vm407_vm2, %v9925_v23 }
 0x691   : > { %7046 = vmatpush.xpose.msk.msrb.mxu0 %vm407_vm2, %v9696_v24 }
 0x692   : > { %7064 = vmatpush.xpose.msk.msrb.mxu1 %vm407_vm2, %v9690_v56 }
 0x693   : > { %7102 = vmatpush.xpose.msk.msrb.mxu3 %vm407_vm2, %v9939_v16 }
 0x694   : > { %7084 = vmatpush.xpose.msk.msrb.mxu2 %vm407_vm2, %v9937_v59 }
 0x695   : > { %7047 = vmatpush.xpose.msk.msrb.mxu0 %vm407_vm2, %v9713_v3 }
 0x696   : > { %7065 = vmatpush.xpose.msk.msrb.mxu1 %vm407_vm2, %v9707_v20 }
 0x697   : > { %7103 = vmatpush.xpose.msk.msrb.mxu3 %vm407_vm2, %v9951_v25 }
 0x698   : > { %7085 = vmatpush.xpose.msk.msrb.mxu2 %vm407_vm2, %v9949_v22 }
 0x699   : > { %7048 = vmatpush.xpose.msk.msrb.mxu0 %vm407_vm2, %v9729_v45 }
 0x69a   : > { %7066 = vmatpush.xpose.msk.msrb.mxu1 %vm407_vm2, %v9723_v33 }
 0x69b   : > { %7104 = vmatpush.xpose.msk.msrb.mxu3 %vm407_vm2, %v9963_v15 }
 0x69c   : > { %7086 = vmatpush.xpose.msk.msrb.mxu2 %vm407_vm2, %v9961_v43 }
 0x69d   : > { %7049 = vmatpush.xpose.msk.msrb.mxu0 %vm407_vm2, %v9745_v48 }
 0x69e   : > { %7067 = vmatpush.xpose.msk.msrb.mxu1 %vm407_vm2, %v9739_v44 }
 0x69f   : > { %7105 = vmatpush.xpose.msk.msrb.mxu3 %vm407_vm2, %v9975_v61 }
 0x6a0   : > { %7087 = vmatpush.xpose.msk.msrb.mxu2 %vm407_vm2, %v9973_v54 }
 0x6a1   : > { %7050 = vmatpush.xpose.msk.msrb.mxu0 %vm407_vm2, %v9761_v2 }
 0x6a2   : > { %7068 = vmatpush.xpose.msk.msrb.mxu1 %vm407_vm2, %v9755_v51 }
 0x6a3   : > { %7106 = vmatpush.xpose.msk.msrb.mxu3 %vm407_vm2, %v9987_v13 }
 0x6a4   : > { %7088 = vmatpush.xpose.msk.msrb.mxu2 %vm407_vm2, %v9985_v0 }
 0x6a5   : > { %7051 = vmatpush.xpose.msk.msrb.mxu0 %vm407_vm2, %v9777_v50 }
 0x6a6   : > { %7069 = vmatpush.xpose.msk.msrb.mxu1 %vm407_vm2, %v9771_v52 }
 0x6a7   : > { %7107 = vmatpush.xpose.msk.msrb.mxu3 %vm407_vm2, %v9999_v28  ;;  %v5489_v28 = vld [vmem:[#allocation3 + $0x22f] sm:$0xff] }
 0x6a8   : > { %7089 = vmatpush.xpose.msk.msrb.mxu2 %vm407_vm2, %v9997_v4  ;;  %v10744_v4 = vld [vmem:[#allocation26_spill] sm:$0xff] }
 0x6a9   : > { %7052 = vmatpush.xpose.msk.msrb.mxu0 %vm407_vm2, %v9795_v62 }
 0x6aa   : > { %7070 = vmatpush.xpose.msk.msrb.mxu1 %vm407_vm2, %v9787_v46 }
 0x6ab   : > { %7108 = vmatpush.xpose.msk.msrb.mxu3 %vm407_vm2, %v10011_v34  ;;  %v5676_v34 = vld [vmem:[#allocation3 + $0x230] sm:$0xff] }
 0x6ac   : > { %7090 = vmatpush.xpose.msk.msrb.mxu2 %vm407_vm2, %v10009_v37  ;;  %v10745_v37 = vld [vmem:[#allocation25_spill] sm:$0xff] }
 0x6ad   : > { %7053 = vmatpush.xpose.msk.msrb.mxu0 %vm407_vm2, %v10742_v35  ;;  %v5675_v35 = vld [vmem:[#allocation3 + $0x228] sm:$0xff] }
 0x6ae   : > { %7071 = vmatpush.xpose.msk.msrb.mxu1 %vm407_vm2, %v10743_v63 }
 0x6af   : > { %7109 = vmatpush.xpose.msk.msrb.mxu3 %vm407_vm2, %v10023_v11 }
 0x6b0   : > { %7091 = vmatpush.xpose.msk.msrb.mxu2 %vm407_vm2, %v10021_v53  ;;  %v7037_v53 = vld [vmem:[%s10483_s5 + $0x40] sm:$0xff] }
 0x6b1   : > { %7054 = vmatpush.xpose.msk.msrb.mxu0 %vm407_vm2, %v10744_v4  ;;  %v7075_v4 = vld [vmem:[%s10483_s5 + $0x50] sm:$0xff] }
 0x6b2   : > { %7072 = vmatpush.xpose.msk.msrb.mxu1 %vm407_vm2, %v10745_v37 }
 0x6b3   : > { %7110 = vmatpush.xpose.msk.msrb.mxu3 %vm407_vm2, %v10035_v40 }
 0x6b4   : > { %7092 = vmatpush.xpose.msk.msrb.mxu2 %vm407_vm2, %v10033_v17  ;;  %v5488_v17 = vld [vmem:[#allocation3 + $0x227] sm:$0xff]  ;;  %7055 = vmatmul.msk.f32.vlgmr.msrb.gmra.mxu0 %vm407_vm2, %v7037_v53 }
 0x6b5   : > { %7115 = vmatpush.xpose.msk.msra.mxu0 %vm407_vm2, %v9801_v8  ;;  %7073 = vmatmul.msk.f32.vlgmr.msrb.gmra.mxu1 %vm407_vm2, %v7037_v53  ;;  %v10747_v8 = vld [vmem:[#allocation29_spill] sm:$0xff]  ;;  %v10752_v53 = vld [vmem:[#allocation30_spill] sm:$0xff] }
 0x6b6   : > { %7133 = vmatpush.xpose.msk.msra.mxu1 %vm407_vm2, %v5489_v28  ;;  %7111 = vmatmul.msk.f32.vlgmr.msrb.gmra.mxu3 %vm407_vm2, %v7075_v4  ;;  %v7038_v28 = vld [vmem:[%s10483_s5 + $0x48] sm:$0xff] }
 0x6b7   : > { %7171 = vmatpush.xpose.msk.msra.mxu3 %vm407_vm2, %v5676_v34  ;;  %7093 = vmatmul.msk.f32.vlgmr.msrb.gmra.mxu2 %vm407_vm2, %v7075_v4  ;;  %v10746_v34 = vld [vmem:[#allocation27_spill] sm:$0xff]  ;;  %v10753_v4 = vld [vmem:[#allocation41_spill] sm:$0xff] }
 0x6b8   : > { %7153 = vmatpush.xpose.msk.msra.mxu2 %vm407_vm2, %v10743_v63  ;;  %v10749_v63 = vld [vmem:[#allocation32_spill] sm:$0xff] }
 0x6b9   : > { %7116 = vmatpush.xpose.msk.msra.mxu0 %vm407_vm2, %v9817_v49  ;;  %v7076_v49 = vld [vmem:[%s10483_s5 + $0x58] sm:$0xff] }
 0x6ba   : > { %7134 = vmatpush.xpose.msk.msra.mxu1 %vm407_vm2, %v5488_v17 }
 0x6bb   : > { %7172 = vmatpush.xpose.msk.msra.mxu3 %vm407_vm2, %v5675_v35 }
 0x6bc   : > { %7154 = vmatpush.xpose.msk.msra.mxu2 %vm407_vm2, %v10745_v37  ;;  %7056 = vmatmul.msk.f32.gmra.mxu0 %vm407_vm2, %v7038_v28  ;;  %v10748_v37 = vld [vmem:[#allocation28_spill] sm:$0xff] }
 0x6bd   : > { %7117 = vmatpush.xpose.msk.msra.mxu0 %vm407_vm2, %v10746_v34  ;;  %7074 = vmatmul.msk.f32.gmra.mxu1 %vm407_vm2, %v7038_v28 }
 0x6be   : > { %7135 = vmatpush.xpose.msk.msra.mxu1 %vm407_vm2, %v10747_v8  ;;  %7112 = vmatmul.msk.f32.gmra.mxu3 %vm407_vm2, %v7076_v49 }
 0x6bf   : > { %7173 = vmatpush.xpose.msk.msra.mxu3 %vm407_vm2, %v10063_v57  ;;  %7094 = vmatmul.msk.f32.gmra.mxu2 %vm407_vm2, %v7076_v49  ;;  %v10751_v57 = vld [vmem:[#allocation48_spill] sm:$0xff] }
 0x6c0   : > { %7155 = vmatpush.xpose.msk.msra.mxu2 %vm407_vm2, %v9833_v18  ;;  %v10750_v18 = vld [vmem:[#allocation39_spill] sm:$0xff] }
 0x6c1   : > { %7118 = vmatpush.xpose.msk.msra.mxu0 %vm407_vm2, %v10748_v37 }
 0x6c2   : > { %7136 = vmatpush.xpose.msk.msra.mxu1 %vm407_vm2, %v10749_v63  ;;  %v10778_v63 = vld [vmem:[#allocation9_spill] sm:$0xff] }
 0x6c3   : > { %7174 = vmatpush.xpose.msk.msra.mxu3 %vm407_vm2, %v10085_v60  ;;  %v10755_v60 = vld [vmem:[#allocation42_spill] sm:$0xff] }
 0x6c4   : > { %7156 = vmatpush.xpose.msk.msra.mxu2 %vm407_vm2, %v9845_v12  ;;  %v10754_v12 = vld [vmem:[#allocation34_spill] sm:$0xff] }
 0x6c5   : > { %7119 = vmatpush.xpose.msk.msra.mxu0 %vm407_vm2, %v10750_v18  ;;  %v10779_v18 = vld [vmem:[#allocation33_spill] sm:$0xff] }
 0x6c6   : > { %7137 = vmatpush.xpose.msk.msra.mxu1 %vm407_vm2, %v10751_v57  ;;  %v2216_v57 = vadd.f32 %v10779_v18, %v10778_v63 }
 0x6c7   : > { %7175 = vmatpush.xpose.msk.msra.mxu3 %vm407_vm2, %v9607_v5  ;;  %v10756_v5 = vld [vmem:[#allocation37_spill] sm:$0xff] }
 0x6c8   : > { %7157 = vmatpush.xpose.msk.msra.mxu2 %vm407_vm2, %v9613_v32  ;;  %v10757_v32 = vld [vmem:[#allocation4_spill] sm:$0xff] }
 0x6c9   : > { %7120 = vmatpush.xpose.msk.msra.mxu0 %vm407_vm2, %v10752_v53  ;;  %v10780_v53 = vld [vmem:[#allocation11_spill] sm:$0xff] }
 0x6ca   : > { %7138 = vmatpush.xpose.msk.msra.mxu1 %vm407_vm2, %v10753_v4  ;;  %v10781_v4 = vld [vmem:[#allocation31_spill] sm:$0xff] }
 0x6cb   : > { %7176 = vmatpush.xpose.msk.msra.mxu3 %vm407_vm2, %v9624_v41  ;;  %v10758_v41 = vld [vmem:[#allocation40_spill] sm:$0xff] }
 0x6cc   : > { %7158 = vmatpush.xpose.msk.msra.mxu2 %vm407_vm2, %v9630_v27  ;;  %v10759_v27 = vld [vmem:[#allocation5_spill] sm:$0xff] }
 0x6cd   : > { %7121 = vmatpush.xpose.msk.msra.mxu0 %vm407_vm2, %v10754_v12  ;;  %v2217_v12 = vadd.f32 %v10781_v4, %v10780_v53  ;;  %v6039_v4 = vld [vmem:[%s10485_s7] sm:$0x1f] }
 0x6ce   : > { %7139 = vmatpush.xpose.msk.msra.mxu1 %vm407_vm2, %v10755_v60  ;;  %v10782_v60 = vld [vmem:[#allocation38_spill] sm:$0xff] }
 0x6cf   : > { %7177 = vmatpush.xpose.msk.msra.mxu3 %vm407_vm2, %v9640_v10  ;;  %v10760_v10 = vld [vmem:[#allocation7_spill] sm:$0xff] }
 0x6d0   : > { %7159 = vmatpush.xpose.msk.msra.mxu2 %vm407_vm2, %v9646_v42  ;;  %v10761_v42 = vld [vmem:[#allocation6_spill] sm:$0xff] }
 0x6d1   : > { %7122 = vmatpush.xpose.msk.msra.mxu0 %vm407_vm2, %v10756_v5  ;;  %v2427_v5 = vadd.f32 %v10782_v60, %v2216_v57 }
 0x6d2   : > { %7140 = vmatpush.xpose.msk.msra.mxu1 %vm407_vm2, %v10757_v32  ;;  %v10783_v32 = vld [vmem:[#allocation35_spill] sm:$0xff] }
 0x6d3   : > { %7178 = vmatpush.xpose.msk.msra.mxu3 %vm407_vm2, %v9657_v7  ;;  %v10762_v7 = vld [vmem:[#allocation13_spill] sm:$0xff] }
 0x6d4   : > { %7160 = vmatpush.xpose.msk.msra.mxu2 %vm407_vm2, %v9663_v29  ;;  %v10763_v29 = vld [vmem:[#allocation8_spill] sm:$0xff] }
 0x6d5   : > { %7123 = vmatpush.xpose.msk.msra.mxu0 %vm407_vm2, %v10758_v41  ;;  %v2428_v41 = vadd.f32 %v10783_v32, %v2217_v12  ;;  %v6044_v12 = vpop.permute.xlu1 %6043 }
 0x6d6   : > { %7141 = vmatpush.xpose.msk.msra.mxu1 %vm407_vm2, %v10759_v27  ;;  %v10784_v27 = vld [vmem:[#allocation10_spill] sm:$0xff] }
 0x6d7   : > { %7179 = vmatpush.xpose.msk.msra.mxu3 %vm407_vm2, %v9674_v36  ;;  %v10764_v36 = vld [vmem:[#allocation15_spill] sm:$0xff] }
 0x6d8   : > { %7161 = vmatpush.xpose.msk.msra.mxu2 %vm407_vm2, %v9680_v55  ;;  %v10765_v55 = vld [vmem:[#allocation14_spill] sm:$0xff] }
 0x6d9   : > { %7124 = vmatpush.xpose.msk.msra.mxu0 %vm407_vm2, %v10760_v10 }
 0x6da   : > { %7142 = vmatpush.xpose.msk.msra.mxu1 %vm407_vm2, %v10761_v42  ;;  %v10785_v42 = vld [vmem:[#allocation12_spill] sm:$0xff] }
 0x6db   : > { %7180 = vmatpush.xpose.msk.msra.mxu3 %vm407_vm2, %v9690_v56  ;;  %v10766_v56 = vld [vmem:[#allocation17_spill] sm:$0xff] }
 0x6dc   : > { %7162 = vmatpush.xpose.msk.msra.mxu2 %vm407_vm2, %v9696_v24  ;;  %v10767_v24 = vld [vmem:[#allocation16_spill] sm:$0xff] }
 0x6dd   : > { %7125 = vmatpush.xpose.msk.msra.mxu0 %vm407_vm2, %v10762_v7 }
 0x6de   : > { %7143 = vmatpush.xpose.msk.msra.mxu1 %vm407_vm2, %v10763_v29 }
 0x6df   : > { %7181 = vmatpush.xpose.msk.msra.mxu3 %vm407_vm2, %v9707_v20  ;;  %v10768_v20 = vld [vmem:[#allocation19_spill] sm:$0xff] }
 0x6e0   : > { %7163 = vmatpush.xpose.msk.msra.mxu2 %vm407_vm2, %v9713_v3  ;;  %v10769_v3 = vld [vmem:[#allocation18_spill] sm:$0xff] }
 0x6e1   : > { %7126 = vmatpush.xpose.msk.msra.mxu0 %vm407_vm2, %v10764_v36 }
 0x6e2   : > { %7144 = vmatpush.xpose.msk.msra.mxu1 %vm407_vm2, %v10765_v55 }
 0x6e3   : > { %7182 = vmatpush.xpose.msk.msra.mxu3 %vm407_vm2, %v9723_v33  ;;  %v10770_v33 = vld [vmem:[#allocation21_spill] sm:$0xff] }
 0x6e4   : > { %7164 = vmatpush.xpose.msk.msra.mxu2 %vm407_vm2, %v9729_v45  ;;  %v10771_v45 = vld [vmem:[#allocation20_spill] sm:$0xff] }
 0x6e5   : > { %7127 = vmatpush.xpose.msk.msra.mxu0 %vm407_vm2, %v10766_v56 }
 0x6e6   : > { %7145 = vmatpush.xpose.msk.msra.mxu1 %vm407_vm2, %v10767_v24 }
 0x6e7   : > { %7183 = vmatpush.xpose.msk.msra.mxu3 %vm407_vm2, %v9739_v44  ;;  %v5863_v44 = vld [vmem:[#allocation3 + $0x231] sm:$0xff] }
 0x6e8   : > { %7165 = vmatpush.xpose.msk.msra.mxu2 %vm407_vm2, %v9745_v48  ;;  %v10772_v48 = vld [vmem:[#allocation22_spill] sm:$0xff] }
 0x6e9   : > { %7128 = vmatpush.xpose.msk.msra.mxu0 %vm407_vm2, %v10768_v20 }
 0x6ea   : > { %7146 = vmatpush.xpose.msk.msra.mxu1 %vm407_vm2, %v10769_v3 }
 0x6eb   : > { %7184 = vmatpush.xpose.msk.msra.mxu3 %vm407_vm2, %v9755_v51  ;;  %v7113_v51 = vld [vmem:[%s10483_s5 + $0x60] sm:$0xff] }
 0x6ec   : > { %7166 = vmatpush.xpose.msk.msra.mxu2 %vm407_vm2, %v9761_v2  ;;  %v7151_v2 = vld [vmem:[%s10483_s5 + $0x70] sm:$0xff] }
 0x6ed   : > { %7129 = vmatpush.xpose.msk.msra.mxu0 %vm407_vm2, %v10770_v33 }
 0x6ee   : > { %7147 = vmatpush.xpose.msk.msra.mxu1 %vm407_vm2, %v10771_v45 }
 0x6ef   : > { %7185 = vmatpush.xpose.msk.msra.mxu3 %vm407_vm2, %v9771_v52  ;;  %v5862_v52 = vld [vmem:[#allocation3 + $0x229] sm:$0xff] }
 0x6f0   : > { %7167 = vmatpush.xpose.msk.msra.mxu2 %vm407_vm2, %v9777_v50  ;;  %v7152_v50 = vld [vmem:[%s10483_s5 + $0x78] sm:$0xff] }
 0x6f1   : > { %7130 = vmatpush.xpose.msk.msra.mxu0 %vm407_vm2, %v9793_v39 }
 0x6f2   : > { %7148 = vmatpush.xpose.msk.msra.mxu1 %vm407_vm2, %v10772_v48 }
 0x6f3   : > { %7186 = vmatpush.xpose.msk.msra.mxu3 %vm407_vm2, %v9787_v46  ;;  %v10773_v46 = vld [vmem:[#allocation46_spill] sm:$0xff] }
 0x6f4   : > { %7168 = vmatpush.xpose.msk.msra.mxu2 %vm407_vm2, %v9795_v62  ;;  %7131 = vmatmul.msk.f32.vlgmr.msra.gmra.mxu0 %vm407_vm2, %v7113_v51 }
 0x6f5   : > { %7191 = vmatpush.xpose.msk.msrb.mxu0 %vm407_vm2, %v10023_v11  ;;  %7149 = vmatmul.msk.f32.vlgmr.msra.gmra.mxu1 %vm407_vm2, %v7113_v51  ;;  %v7114_v11 = vld [vmem:[%s10483_s5 + $0x68] sm:$0xff] }
 0x6f6   : > { %7209 = vmatpush.xpose.msk.msrb.mxu1 %vm407_vm2, %v5863_v44  ;;  %7187 = vmatmul.msk.f32.vlgmr.msra.gmra.mxu3 %vm407_vm2, %v7151_v2 }
 0x6f7   : > { %7169 = vmatmul.msk.f32.vlgmr.msra.gmra.mxu2 %vm407_vm2, %v7151_v2 }
 0x6f9   : > { %7192 = vmatpush.xpose.msk.msrb.mxu0 %vm407_vm2, %v10035_v40  ;;  %v4677_v40 = vpop.f32.mrf.mxu2 }
 0x6fa   : > { %7210 = vmatpush.xpose.msk.msrb.mxu1 %vm407_vm2, %v5862_v52 }
 0x6fc   : > { %7132 = vmatmul.msk.f32.gmra.mxu0 %vm407_vm2, %v7114_v11 }
 0x6fd   : > { %7193 = vmatpush.xpose.msk.msrb.mxu0 %vm407_vm2, %v10773_v46  ;;  %7150 = vmatmul.msk.f32.gmra.mxu1 %vm407_vm2, %v7114_v11 }
 0x6fe   : > { %7211 = vmatpush.xpose.msk.msrb.mxu1 %vm407_vm2, %v10072_v19  ;;  %7188 = vmatmul.msk.f32.gmra.mxu3 %vm407_vm2, %v7152_v50 }
 0x6ff   : > { %7170 = vmatmul.msk.f32.gmra.mxu2 %vm407_vm2, %v7152_v50 }
 0x701   : > { %7194 = vmatpush.xpose.msk.msrb.mxu0 %vm407_vm2, %v10054_v6  ;;  %v10774_v6 = vld [vmem:[#allocation36_spill] sm:$0xff] }
 0x702   : > { %7212 = vmatpush.xpose.msk.msrb.mxu1 %vm407_vm2, %v10091_v47  ;;  %v4700_v47 = vpop.f32.mrf.mxu3 }
 0x705   : > { %7195 = vmatpush.xpose.msk.msrb.mxu0 %vm407_vm2, %v9855_v58 }
 0x706   : > { %7213 = vmatpush.xpose.msk.msrb.mxu1 %vm407_vm2, %v9857_v21 }
 0x709   : > { %7196 = vmatpush.xpose.msk.msrb.mxu0 %vm407_vm2, %v9879_v30  ;;  %v4680_v30 = vpop.f32.mrf.mxu2 }
 0x70a   : > { %7214 = vmatpush.xpose.msk.msrb.mxu1 %vm407_vm2, %v9881_v14  ;;  %v4703_v14 = vpop.f32.mrf.mxu3 }
 0x70d   : > { %7197 = vmatpush.xpose.msk.msrb.mxu0 %vm407_vm2, %v9891_v9 }
 0x70e   : > { %7215 = vmatpush.xpose.msk.msrb.mxu1 %vm407_vm2, %v9893_v26 }
 0x711   : > { %7198 = vmatpush.xpose.msk.msrb.mxu0 %vm407_vm2, %v9913_v38  ;;  %v5051_v58 = vpop.f32.mrf.mxu2 }
 0x712   : > { %7216 = vmatpush.xpose.msk.msrb.mxu1 %vm407_vm2, %v9915_v1  ;;  %v5074_v21 = vpop.f32.mrf.mxu3 }
 0x715   : > { %7199 = vmatpush.xpose.msk.msrb.mxu0 %vm407_vm2, %v9925_v23 }
 0x716   : > { %7217 = vmatpush.xpose.msk.msrb.mxu1 %vm407_vm2, %v9927_v31  ;;  %v6019_v31 = vld [vmem:[%s10484_s6] sm:$0xff] }
 0x717   : > { %6023 = vperm.xlu2 %7245, %v6019_v31  }
 0x719   : > { %7200 = vmatpush.xpose.msk.msrb.mxu0 %vm407_vm2, %v9937_v59  ;;  %v5054_v23 = vpop.f32.mrf.mxu2 }
 0x71a   : > { %7218 = vmatpush.xpose.msk.msrb.mxu1 %vm407_vm2, %v9939_v16  ;;  %v10776_v16 = vld [vmem:[#allocation44_spill] sm:$0xff]  ;;  %v5077_v59 = vpop.f32.mrf.mxu3 }
 0x71d   : > { %7201 = vmatpush.xpose.msk.msrb.mxu0 %vm407_vm2, %v9949_v22  ;;  %v7189_v22 = vld [vmem:[%s10483_s5 + $0x80] sm:$0xff] }
 0x71e   : > { %7219 = vmatpush.xpose.msk.msrb.mxu1 %vm407_vm2, %v9951_v25  ;;  %v10775_v25 = vld [vmem:[#allocation43_spill] sm:$0xff] }
 0x721   : > { %7202 = vmatpush.xpose.msk.msrb.mxu0 %vm407_vm2, %v9961_v43  ;;  %v4490_v43 = vpop.f32.mrf.mxu0 }
 0x722   : > { %7220 = vmatpush.xpose.msk.msrb.mxu1 %vm407_vm2, %v9963_v15  ;;  %v10777_v15 = vld [vmem:[#allocation45_spill] sm:$0xff]  ;;  %v4519_v10 = vadd.f32 %v4490_v43, %v10784_v27 }
 0x724   : > { %v4706_v55 = vadd.f32 %v4677_v40, %v4519_v10 }
 0x725   : > { %7203 = vmatpush.xpose.msk.msrb.mxu0 %vm407_vm2, %v9973_v54 }
 0x726   : > { %7221 = vmatpush.xpose.msk.msrb.mxu1 %vm407_vm2, %v9975_v61  ;;  %v7190_v61 = vld [vmem:[%s10483_s5 + $0x88] sm:$0xff] }
 0x729   : > { %7204 = vmatpush.xpose.msk.msrb.mxu0 %vm407_vm2, %v9985_v0  ;;  %v4493_v54 = vpop.f32.mrf.mxu0 }
 0x72a   : > { %7222 = vmatpush.xpose.msk.msrb.mxu1 %vm407_vm2, %v9987_v13  ;;  %v4513_v13 = vpop.f32.mrf.mxu1  ;;  %v4521_v24 = vadd.f32 %v4493_v54, %v2427_v5 }
 0x72b   : > { %v4520_v7 = vadd.f32 %v4513_v13, %v10785_v42 }
 0x72c   : > { %v4708_v45 = vadd.f32 %v4680_v30, %v4521_v24 }
 0x72d   : > { %7205 = vmatpush.xpose.msk.msrb.mxu0 %vm407_vm2, %v10774_v6  ;;  %v4707_v56 = vadd.f32 %v4700_v47, %v4520_v7 }
 0x72e   : > { %7223 = vmatpush.xpose.msk.msrb.mxu1 %vm407_vm2, %v10775_v25 }
 0x731   : > { %7206 = vmatpush.xpose.msk.msrb.mxu0 %vm407_vm2, %v10776_v16  ;;  %v4864_v39 = vpop.f32.mrf.mxu0 }
 0x732   : > { %7224 = vmatpush.xpose.msk.msrb.mxu1 %vm407_vm2, %v10777_v15  ;;  %v4516_v0 = vpop.f32.mrf.mxu1  ;;  %v4893_v48 = vadd.f32 %v4864_v39, %v4706_v55 }
 0x733   : > { %v4522_v20 = vadd.f32 %v4516_v0, %v2428_v41 }
 0x734   : > { %7207 = vmatmul.msk.f32.vlgmr.msrb.gmra.mxu0 %vm407_vm2, %v7189_v22  ;;  %v5080_v2 = vadd.f32 %v5051_v58, %v4893_v48 }
 0x735   : > { %7225 = vmatmul.msk.f32.vlgmr.msrb.gmra.mxu1 %vm407_vm2, %v7189_v22  ;;  %v4709_v44 = vadd.f32 %v4703_v14, %v4522_v20 }
 0x739   : > { %v4867_v26 = vpop.f32.mrf.mxu0  ;;  %v5448_v28 = vpop.f32.mrf.mxu3 }
 0x73a   : > { %v4887_v62 = vpop.f32.mrf.mxu1  ;;  %v5425_v35 = vpop.f32.mrf.mxu2  ;;  %v4895_v11 = vadd.f32 %v4867_v26, %v4708_v45 }
 0x73b   : > { %v4894_v51 = vadd.f32 %v4887_v62, %v4707_v56 }
 0x73c   : > { %7208 = vmatmul.msk.f32.gmra.mxu0 %vm407_vm2, %v7190_v61  ;;  %v5082_v46 = vadd.f32 %v5054_v23, %v4895_v11 }
 0x73d   : > { %7226 = vmatmul.msk.f32.gmra.mxu1 %vm407_vm2, %v7190_v61  ;;  %v5081_v52 = vadd.f32 %v5074_v21, %v4894_v51 }
 0x741   : > { %v5238_v38 = vpop.f32.mrf.mxu0  ;;  %v5451_v37 = vpop.f32.mrf.mxu3 }
 0x742   : > { %v4890_v1 = vpop.f32.mrf.mxu1  ;;  %v5428_v49 = vpop.f32.mrf.mxu2  ;;  %v5267_v6 = vadd.f32 %v5238_v38, %v5080_v2 }
 0x743   : > { %v4896_v50 = vadd.f32 %v4890_v1, %v4709_v44 }
 0x744   : > { %v5454_v22 = vadd.f32 %v5425_v35, %v5267_v6 }
 0x745   : > { %v5083_v31 = vadd.f32 %v5077_v59, %v4896_v50 }
 0x749   : > { %v5241_v19 = vpop.f32.mrf.mxu0 }
 0x74a   : > { %v5261_v9 = vpop.f32.mrf.mxu1  ;;  %v5269_v43 = vadd.f32 %v5241_v19, %v5082_v46 }
 0x74b   : > { %v5268_v25 = vadd.f32 %v5261_v9, %v5081_v52 }
 0x74c   : > { %v5456_v54 = vadd.f32 %v5428_v49, %v5269_v43 }
 0x74d   : > { %v5455_v61 = vadd.f32 %v5448_v28, %v5268_v25 }
 0x752   : > { %v5264_v17 = vpop.f32.mrf.mxu1 }
 0x753   : > { %v5270_v13 = vadd.f32 %v5264_v17, %v5083_v31  ;;  %v6029_v17 = vpop.permute.xlu0 %6028 }
 0x755   : > { %v5457_v0 = vadd.f32 %v5451_v37, %v5270_v13 }
 0x771   : > { %v5612_v34 = vpop.f32.mrf.mxu0  ;;  %v6024_v23 = vpop.permute.xlu2 %6023 }
 0x772   : > { %v5635_v8 = vpop.f32.mrf.mxu1  ;;  %v5641_v40 = vadd.f32 %v5612_v34, %v5454_v22 }
 0x773   : > { %v5642_v47 = vadd.f32 %v5635_v8, %v5455_v61 }
 0x779   : > { %v5615_v29 = vpop.f32.mrf.mxu0  ;;  %v5822_v33 = vpop.f32.mrf.mxu3 }
 0x77a   : > { %v5638_v36 = vpop.f32.mrf.mxu1  ;;  %v5799_v3 = vpop.f32.mrf.mxu2  ;;  %v5829_v14 = vadd.f32 %v5822_v33, %v5642_v47  ;;  %v5643_v26 = vadd.f32 %v5615_v29, %v5456_v54 }
 0x77b   : > { %v5828_v30 = vadd.f32 %v5799_v3, %v5641_v40  ;;  %v5644_v1 = vadd.f32 %v5638_v36, %v5457_v0 }
 0x781   : > { %v5825_v62 = vpop.f32.mrf.mxu3 }
 0x782   : > { %v5802_v39 = vpop.f32.mrf.mxu2  ;;  %v5831_v21 = vadd.f32 %v5825_v62, %v5644_v1 }
 0x783   : > { %v5830_v58 = vadd.f32 %v5802_v39, %v5643_v26 }
 0x7b1   : > { %v5986_v16 = vpop.f32.mrf.mxu0 }
 0x7b2   : > { %v6009_v15 = vpop.f32.mrf.mxu1  ;;  %v6015_v38 = vadd.f32 %v5986_v16, %v5828_v30 }
 0x7b3   : > { %v6016_v9 = vadd.f32 %v6009_v15, %v5829_v14 }
 0x7b4   : > { %v6031_v49 = vadd.f32 %v6024_v23, %v6015_v38 }
 0x7b5   : > { %v6032_v34 = vadd.f32 %v6024_v23, %v6016_v9 }
 0x7b6   : > { %v6035_v57 = vmax.f32 %v6031_v49, 0.0 }
 0x7b7   : > { %v6036_v53 = vmax.f32 %v6032_v34, 0.0 }
 0x7b9   : > { %v5989_v59 = vpop.f32.mrf.mxu0 }
 0x7ba   : > { %v6012_v35 = vpop.f32.mrf.mxu1  ;;  %v6017_v28 = vadd.f32 %v5989_v59, %v5830_v58 }
 0x7bb   : > { %v6018_v19 = vadd.f32 %v6012_v35, %v5831_v21 }
 0x7bc   : > { %v6033_v8 = vadd.f32 %v6029_v17, %v6017_v28 }
 0x7bd   : > { %v6034_v37 = vadd.f32 %v6029_v17, %v6018_v19 }
 0x7be   : > { %v6037_v63 = vmax.f32 %v6033_v8, 0.0 }
 0x7bf   : > { %v6038_v18 = vmax.f32 %v6034_v37, 0.0 }
 0x7c0   : > { %6063 = vmatpush.msrb.mxu2 %v6037_v63 }
 0x7c1   : > { %6083 = vmatpush.msrb.mxu3 %v6038_v18 }
 0x7c2   : > { %6064 = vmatpush.msrb.mxu2 %v6035_v57 }
 0x7c3   : > { %6084 = vmatpush.msrb.mxu3 %v6036_v53  ;;  %7227 = vmatmul.msk.f32.vlgmr.msrb.gmra.mxu2 %vm407_vm2, %v6039_v4 }
 0x7c4   : > { %7228 = vmatmul.msk.f32.vlgmr.msrb.gmra.mxu3 %vm407_vm2, %v6039_v4 }
 0x846   : > { %v6066_v60 = vpop.f32.mrf.mxu2 }
 0x847   : > { %v6086_v5 = vpop.f32.mrf.mxu3  ;;  %v6067_v32 = vadd.f32 %v6066_v60, %v6044_v12 }
 0x848   : > { %v6087_v41 = vadd.f32 %v6086_v5, %v6044_v12 }
 0x849   : > { %6089 = vst [vmem:[%s332_s26] sm:$0x1f] %v6067_v32 }
 0x84a   : > { %6090 = vst [vmem:[%s332_s26 + $0x8] sm:$0x1f] %v6087_v41 }
 0x84b PF: > { %s19_s30 = sadd.s32 1, %s7252_s30  }
 0x84c   : > { %p16_p4 = scmp.ge.s32.totalorder %s19_s30, 4  }
 0x84e   :  { %18 = sbr.rel (!%p16_p4) target bundleno = 1 (0x1), region = 114 }

</bundles_post_ra>
